<compile_context>
chip_gen: v7x
topology: tpu7x:2x2x1
jax: 0.10.0
libtpu: 0.0.40
codegen_flags: <defaults>
</compile_context>

<pallas_src>
import functools

import jax
import jax.numpy as jnp
from jax.experimental import pallas as pl
from jax.experimental.pallas import tpu as pltpu

MM_DTYPE = jnp.bfloat16          # MXU-native input dtype (accumulation stays f32)


def _default_vmem_limit():
    """Chip-aware VMEM cap: ~3/4 of physical, capped at 100 MiB (v5e/v6e have 128 MiB,
    v7x only 64 MiB). Falls back to a universally safe 32 MiB."""
    try:
        cap = pltpu.get_tpu_info().vmem_capacity_bytes
        return int(min(int(cap * 3) // 4, 100 * 1024 * 1024))
    except Exception:
        return 32 * 1024 * 1024


_VMEM_LIMIT = _default_vmem_limit()


# ------------------------------ Pallas kernels ------------------------------

def _mm_bn_relu_kernel(x_ref, w_ref, g_ref, b_ref, o_ref, *, groups, count, eps):
    """Fused (M,K)@(K,G*C) matmul + train-mode BatchNorm + ReLU.

    Output columns are grouped as (g, c) with channel c fastest; BN statistics pool
    over the M rows AND the G column groups (phases / spatial taps), matching
    per-channel BatchNorm2d over the NHWC feature map. Whole layer sits in VMEM.
    Stats are computed on the XLU/VPU (no MXU, no group-reduction matrix).
    """
    y = jnp.dot(x_ref[...], w_ref[...], preferred_element_type=jnp.float32)  # (Mp, G*C) f32
    c = g_ref.shape[-1]
    # Row (sublane) reduction on the XLU; zero-padded rows contribute nothing and
    # `count` uses the true element count.
    rsum = jnp.sum(y, axis=0, keepdims=True)        # (1, G*C)
    rsq = jnp.sum(y * y, axis=0, keepdims=True)     # (1, G*C)
    # Static lane-slice fold over the G column groups (VPU adds on a single row).
    s = rsum[:, 0:c]
    q = rsq[:, 0:c]
    for g in range(1, groups):
        s = s + rsum[:, g * c:(g + 1) * c]
        q = q + rsq[:, g * c:(g + 1) * c]
    mean = s / count                                # (1, C)
    var = q / count - mean * mean                   # biased var (train-mode BN)
    scale = g_ref[...] * jax.lax.rsqrt(var + eps)   # (1, C)
    shift = b_ref[...] - mean * scale
    scale_cols = jnp.tile(scale, (1, groups))       # (1, G*C), tiled once (hoisted)
    shift_cols = jnp.tile(shift, (1, groups))
    o_ref[...] = jnp.maximum(y * scale_cols + shift_cols, 0.0).astype(o_ref.dtype)


def _mm_t_tanh_kernel(w_ref, x_ref, o_ref):
    """Transposed final layer: (4*Cout, K) @ (K, tile_M) with tanh fused into the
    epilogue. The big M dim is the lane dim -> unmasked, lane-dense bf16 stores."""
    y = jnp.dot(w_ref[...], x_ref[...], preferred_element_type=jnp.float32)
    o_ref[...] = jnp.tanh(y).astype(o_ref.dtype)


# ------------------------------ kernel wrappers ------------------------------

def fused_matmul_bn_relu(xm, wm, gamma, beta, eps=1e-5):
    """xm: (M, K) bf16 im2col matrix, wm: (K, G*C) bf16, gamma/beta: (1, C) f32.
    Returns bf16 (M, G*C)."""
    M, K = xm.shape
    GC = wm.shape[1]
    C = gamma.shape[-1]
    groups = GC // C
    Mp = max(8, ((M + 7) // 8) * 8)          # keep the MXU/sublane dims happy
    if Mp != M:
        xm = jnp.pad(xm, ((0, Mp - M), (0, 0)))
    kern = functools.partial(_mm_bn_relu_kernel, groups=groups,
                             count=float(M * groups), eps=eps)
    # TODO(synk): single VMEM block keeps BN stats one-pass (fine for these shapes);
    # large batches (esp. on v7x's 64 MiB VMEM / 2 TCs) need an M-tiled two-pass
    # streaming-stats variant with a megacore-parallel matmul pass.
    out = pl.pallas_call(
        kern,
        out_shape=jax.ShapeDtypeStruct((Mp, GC), MM_DTYPE),
        compiler_params=pltpu.CompilerParams(vmem_limit_bytes=_VMEM_LIMIT),
    )(xm, wm, gamma, beta)
    return out[:M]


def matmul_tanh_t(wT, xmT, tn=1024):
    """wT: (R, K) bf16, xmT: (K, M) bf16 -> tanh(wT @ xmT) bf16 (R, M), tiled over
    the lane-dense M (column) dimension with a 'parallel' grid."""
    R, K = wT.shape
    _, M = xmT.shape
    tn = min(tn, M)
    grid = pl.cdiv(M, tn)
    Mp = grid * tn
    if Mp != M:
        xmT = jnp.pad(xmT, ((0, 0), (0, Mp - M)))
    out = pl.pallas_call(
        _mm_t_tanh_kernel,
        out_shape=jax.ShapeDtypeStruct((R, Mp), MM_DTYPE),
        grid_spec=pltpu.PrefetchScalarGridSpec(
            num_scalar_prefetch=0,
            grid=(grid,),
            in_specs=[pl.BlockSpec((R, K), lambda i: (0, 0)),
                      pl.BlockSpec((K, tn), lambda i: (0, i))],
            out_specs=pl.BlockSpec((R, tn), lambda i: (0, i)),
        ),
        compiler_params=pltpu.CompilerParams(
            dimension_semantics=("parallel",),
            vmem_limit_bytes=_VMEM_LIMIT),
    )(wT, xmT)
    return out[:, :M]


# --------------------- ConvTranspose2d lowering helpers ----------------------

def _full_weight_1x1(w_t):
    """Layer 1: stride=1, pad=0, 1x1 input -> plain matmul.
    w_t: (Cin, Cout, 4, 4) -> (Cin, 16*Cout), columns ordered (kh, kw, co)."""
    cin, cout, k, _ = w_t.shape
    return jnp.transpose(w_t, (0, 2, 3, 1)).reshape(cin, k * k * cout)


def _phase_weight(w_t):
    """stride=2, padding=1, K=4 ConvTranspose2d -> combined sub-pixel (phase) weight.

    Rows ordered (tap_h, tap_w, ci) over a 3x3 tap window of the (pad-1) input;
    columns ordered (phase_h, phase_w, co). Tap (th) with phase (rh) selects original
    kernel row kh = 3 + rh - 2*th (zero if outside [0,4)), same for columns."""
    cin, cout, K, _ = w_t.shape
    rows = []
    for th in range(3):
        for tw in range(3):
            cols = []
            for rh in range(2):
                for rw in range(2):
                    kh = 3 + rh - 2 * th
                    kw = 3 + rw - 2 * tw
                    if 0 <= kh < K and 0 <= kw < K:
                        cols.append(w_t[:, :, kh, kw])              # (Cin, Cout)
                    else:
                        cols.append(jnp.zeros((cin, cout), w_t.dtype))
            rows.append(jnp.concatenate(cols, axis=1))               # (Cin, 4*Cout)
    w = jnp.stack(rows, axis=0)                                      # (9, Cin, 4*Cout)
    return w.reshape(9 * cin, 4 * cout)


def _im2col_3x3(x):
    """x: (N, H, W, Cin) NHWC -> (N*H*W, 9*Cin); tap order (th, tw, ci).
    TODO(synk): taps are materialized by XLA under jit; generating them in-kernel
    from a VMEM-resident NHWC block would remove this HBM pass (biggest remaining
    HBM-traffic item per review)."""
    n, h, w, cin = x.shape
    xp = jnp.pad(x, ((0, 0), (1, 1), (1, 1), (0, 0)))
    taps = [xp[:, th:th + h, tw:tw + w, :] for th in range(3) for tw in range(3)]
    return jnp.stack(taps, axis=3).reshape(n * h * w, 9 * cin)


def _im2col_3x3_t(x):
    """Transposed im2col for the final layer: (N, H, W, Cin) -> (9*Cin, N*H*W);
    rows ordered (th, tw, ci), columns ordered (n, h, w)."""
    n, h, w, cin = x.shape
    xp = jnp.pad(x, ((0, 0), (1, 1), (1, 1), (0, 0)))
    taps = [xp[:, th:th + h, tw:tw + w, :] for th in range(3) for tw in range(3)]
    t = jnp.stack(taps, axis=0)                       # (9, N, H, W, Cin)
    t = jnp.transpose(t, (0, 4, 1, 2, 3))             # (9, Cin, N, H, W)
    return t.reshape(9 * cin, n * h * w)


def _interleave_phases(y, n, h, w, cout):
    """y: (N*H*W, 4*Cout) with columns (rh, rw, co) -> NHWC (N, 2H, 2W, Cout)."""
    y = y.reshape(n, h, w, 2, 2, cout)
    y = jnp.transpose(y, (0, 1, 3, 2, 4, 5))
    return y.reshape(n, 2 * h, 2 * w, cout)


# ------------------------------ parameters ----------------------------------

def init_generator_params(key, latent_vector_size, generator_latent_maps,
                          number_of_colors):
    gm = generator_latent_maps
    shapes = [
        (latent_vector_size, gm * 8, 4, 4),
        (gm * 8, gm * 4, 4, 4),
        (gm * 4, gm * 2, 4, 4),
        (gm * 2, gm, 4, 4),
        (gm, number_of_colors, 4, 4),
    ]
    params = {}
    keys = jax.random.split(key, len(shapes))
    for i, (k, shp) in enumerate(zip(keys, shapes), start=1):
        params[f"w{i}"] = 0.02 * jax.random.normal(k, shp, jnp.float32)
        if i < 5:  # BatchNorm affine params (PyTorch default init)
            c = shp[1]
            params[f"g{i}"] = jnp.ones((c,), jnp.float32)
            params[f"b{i}"] = jnp.zeros((c,), jnp.float32)
    return params


def prepare_params(params):
    """One-time conversion of PyTorch-layout weights into bf16 matmul matrices
    (kept out of the jitted forward). The final layer weight is stored transposed
    so the big spatial dim lands in lanes at run time."""
    def bn_layer(wmat, gamma, beta):
        c = gamma.shape[0]
        return dict(w=wmat.astype(MM_DTYPE),
                    gamma=gamma.reshape(1, c).astype(jnp.float32),
                    beta=beta.reshape(1, c).astype(jnp.float32))

    # TODO(synk): pad tiny-K weights (layer1 K=latent, layer5 K=9*gm) to MXU-friendly
    # multiples and widen N for layers 3-4 (GC=64/32) once these layers stop being
    # HBM-latency bound at small batch.
    prep = {
        "l1": bn_layer(_full_weight_1x1(params["w1"]), params["g1"], params["b1"]),
        "mid": [bn_layer(_phase_weight(params[f"w{i}"]), params[f"g{i}"],
                         params[f"b{i}"]) for i in (2, 3, 4)],
        "w5T": jnp.transpose(_phase_weight(params["w5"])).astype(MM_DTYPE),  # (4*colors, 9*gm)
    }
    return prep


# ------------------------------- Generator ----------------------------------

@jax.jit
def generator_forward(z_nchw, prep):
    """z_nchw: (N, latent, 1, 1) -> (N, colors, 64, 64), matching the PyTorch module."""
    # TODO(synk): nn.parallel.data_parallel multi-GPU branch has no TPU analog;
    # single-device forward only.
    n = z_nchw.shape[0]
    x = z_nchw.reshape(n, -1).astype(MM_DTYPE)                       # (N, latent)

    # layer 1: ConvTranspose2d(latent -> 8*gm, k=4, s=1, p=0) + BN + ReLU
    l1 = prep["l1"]
    y = fused_matmul_bn_relu(x, l1["w"], l1["gamma"], l1["beta"])
    x = y.reshape(n, 4, 4, l1["gamma"].shape[-1])                    # NHWC (N,4,4,8gm)

    # layers 2-4: ConvTranspose2d(k=4, s=2, p=1) + BN + ReLU (phase decomposition)
    for layer in prep["mid"]:
        nb, h, w, _ = x.shape
        xm = _im2col_3x3(x)                                          # (N*H*W, 9*Cin)
        y = fused_matmul_bn_relu(xm, layer["w"], layer["gamma"],
                                 layer["beta"])                      # (N*H*W, 4*Cout)
        x = _interleave_phases(y, nb, h, w, y.shape[1] // 4)

    # layer 5: ConvTranspose2d(gm -> colors, k=4, s=2, p=1) + Tanh, computed
    # transposed so the stores are lane-dense: (4*colors, 9*gm) @ (9*gm, N*H*W)
    nb, h, w, _ = x.shape
    xmT = _im2col_3x3_t(x)                                           # (9*gm, N*H*W)
    y = matmul_tanh_t(prep["w5T"], xmT)                              # (4*colors, N*H*W) bf16
    cout = y.shape[0] // 4
    y = y.reshape(2, 2, cout, nb, h, w)                              # (rh, rw, co, n, i, j)
    y = jnp.transpose(y, (3, 2, 4, 0, 5, 1))                         # (n, co, i, rh, j, rw)
    return y.reshape(nb, cout, 2 * h, 2 * w).astype(jnp.float32)     # NCHW


# ---------------------------------- main -------------------------------------

if __name__ == "__main__":
    batch = 2
    latent_vector_size = 8
    generator_latent_maps = 8
    number_of_colors = 3

    root = jax.random.PRNGKey(0)
    kp, kz = jax.random.split(root)
    params = init_generator_params(kp, latent_vector_size,
                                   generator_latent_maps, number_of_colors)
    prep = prepare_params(params)
    z = jax.random.normal(kz, (batch, latent_vector_size, 1, 1), jnp.float32)

    out = generator_forward(z, prep)
    out = jax.block_until_ready(out)

    assert out.shape == (batch, number_of_colors, 64, 64), out.shape
    assert bool(jnp.all(jnp.isfinite(out)))
    assert bool(jnp.all(jnp.abs(out) <= 1.0 + 1e-6))  # tanh range
    print("KERNEL_OK")
</pallas_src>

<mosaic_0001>
module attributes {stable_mosaic.version = 11 : i64} {
  func.func @_mm_bn_relu_kernel(%arg0: memref<8x8xbf16, #tpu.memory_space<vmem>>, %arg1: memref<8x1024xbf16, #tpu.memory_space<vmem>>, %arg2: memref<1x64xf32, #tpu.memory_space<vmem>>, %arg3: memref<1x64xf32, #tpu.memory_space<vmem>>, %arg4: memref<8x1024xbf16, #tpu.memory_space<vmem>>) attributes {dimension_semantics = [], scalar_prefetch = 0 : i64, scratch_operands = 0 : i64, tpu.core_type = #tpu.core_type<tc>} {
    %c0 = arith.constant 0 : index
    %c0_0 = arith.constant 0 : index
    %0 = vector.load %arg0[%c0, %c0_0] : memref<8x8xbf16, #tpu.memory_space<vmem>>, vector<8x8xbf16>
    %c0_1 = arith.constant 0 : index
    %c0_2 = arith.constant 0 : index
    %1 = vector.load %arg1[%c0_1, %c0_2] : memref<8x1024xbf16, #tpu.memory_space<vmem>>, vector<8x1024xbf16>
    %cst = arith.constant dense<0.000000e+00> : vector<8x1024xf32>
    %2 = tpu.matmul %0, %1, %cst {dimension_numbers = #tpu.dot_dimension_numbers<[1], [0], [0], [1], [0, 0, 1, 1], [], []>} : vector<8x8xbf16>, vector<8x1024xbf16>, vector<8x1024xf32> -> vector<8x1024xf32>
    %cst_3 = arith.constant dense<0.000000e+00> : vector<1024xf32>
    %3 = vector.multi_reduction <add>, %2, %cst_3 [0] : vector<8x1024xf32> to vector<1024xf32>
    %4 = vector.shape_cast %3 : vector<1024xf32> to vector<1x1024xf32>
    %5 = arith.mulf %2, %2 : vector<8x1024xf32>
    %cst_4 = arith.constant dense<0.000000e+00> : vector<1024xf32>
    %6 = vector.multi_reduction <add>, %5, %cst_4 [0] : vector<8x1024xf32> to vector<1024xf32>
    %7 = vector.shape_cast %6 : vector<1024xf32> to vector<1x1024xf32>
    %8 = vector.extract_strided_slice %4 {offsets = [0, 0], sizes = [1, 64], strides = [1, 1]} : vector<1x1024xf32> to vector<1x64xf32>
    %9 = vector.extract_strided_slice %7 {offsets = [0, 0], sizes = [1, 64], strides = [1, 1]} : vector<1x1024xf32> to vector<1x64xf32>
    %10 = vector.extract_strided_slice %4 {offsets = [0, 64], sizes = [1, 64], strides = [1, 1]} : vector<1x1024xf32> to vector<1x64xf32>
    %11 = arith.addf %8, %10 : vector<1x64xf32>
    %12 = vector.extract_strided_slice %7 {offsets = [0, 64], sizes = [1, 64], strides = [1, 1]} : vector<1x1024xf32> to vector<1x64xf32>
    %13 = arith.addf %9, %12 : vector<1x64xf32>
    %14 = vector.extract_strided_slice %4 {offsets = [0, 128], sizes = [1, 64], strides = [1, 1]} : vector<1x1024xf32> to vector<1x64xf32>
    %15 = arith.addf %11, %14 : vector<1x64xf32>
    %16 = vector.extract_strided_slice %7 {offsets = [0, 128], sizes = [1, 64], strides = [1, 1]} : vector<1x1024xf32> to vector<1x64xf32>
    %17 = arith.addf %13, %16 : vector<1x64xf32>
    %18 = vector.extract_strided_slice %4 {offsets = [0, 192], sizes = [1, 64], strides = [1, 1]} : vector<1x1024xf32> to vector<1x64xf32>
    %19 = arith.addf %15, %18 : vector<1x64xf32>
    %20 = vector.extract_strided_slice %7 {offsets = [0, 192], sizes = [1, 64], strides = [1, 1]} : vector<1x1024xf32> to vector<1x64xf32>
    %21 = arith.addf %17, %20 : vector<1x64xf32>
    %22 = vector.extract_strided_slice %4 {offsets = [0, 256], sizes = [1, 64], strides = [1, 1]} : vector<1x1024xf32> to vector<1x64xf32>
    %23 = arith.addf %19, %22 : vector<1x64xf32>
    %24 = vector.extract_strided_slice %7 {offsets = [0, 256], sizes = [1, 64], strides = [1, 1]} : vector<1x1024xf32> to vector<1x64xf32>
    %25 = arith.addf %21, %24 : vector<1x64xf32>
    %26 = vector.extract_strided_slice %4 {offsets = [0, 320], sizes = [1, 64], strides = [1, 1]} : vector<1x1024xf32> to vector<1x64xf32>
    %27 = arith.addf %23, %26 : vector<1x64xf32>
    %28 = vector.extract_strided_slice %7 {offsets = [0, 320], sizes = [1, 64], strides = [1, 1]} : vector<1x1024xf32> to vector<1x64xf32>
    %29 = arith.addf %25, %28 : vector<1x64xf32>
    %30 = vector.extract_strided_slice %4 {offsets = [0, 384], sizes = [1, 64], strides = [1, 1]} : vector<1x1024xf32> to vector<1x64xf32>
    %31 = arith.addf %27, %30 : vector<1x64xf32>
    %32 = vector.extract_strided_slice %7 {offsets = [0, 384], sizes = [1, 64], strides = [1, 1]} : vector<1x1024xf32> to vector<1x64xf32>
    %33 = arith.addf %29, %32 : vector<1x64xf32>
    %34 = vector.extract_strided_slice %4 {offsets = [0, 448], sizes = [1, 64], strides = [1, 1]} : vector<1x1024xf32> to vector<1x64xf32>
    %35 = arith.addf %31, %34 : vector<1x64xf32>
    %36 = vector.extract_strided_slice %7 {offsets = [0, 448], sizes = [1, 64], strides = [1, 1]} : vector<1x1024xf32> to vector<1x64xf32>
    %37 = arith.addf %33, %36 : vector<1x64xf32>
    %38 = vector.extract_strided_slice %4 {offsets = [0, 512], sizes = [1, 64], strides = [1, 1]} : vector<1x1024xf32> to vector<1x64xf32>
    %39 = arith.addf %35, %38 : vector<1x64xf32>
    %40 = vector.extract_strided_slice %7 {offsets = [0, 512], sizes = [1, 64], strides = [1, 1]} : vector<1x1024xf32> to vector<1x64xf32>
    %41 = arith.addf %37, %40 : vector<1x64xf32>
    %42 = vector.extract_strided_slice %4 {offsets = [0, 576], sizes = [1, 64], strides = [1, 1]} : vector<1x1024xf32> to vector<1x64xf32>
    %43 = arith.addf %39, %42 : vector<1x64xf32>
    %44 = vector.extract_strided_slice %7 {offsets = [0, 576], sizes = [1, 64], strides = [1, 1]} : vector<1x1024xf32> to vector<1x64xf32>
    %45 = arith.addf %41, %44 : vector<1x64xf32>
    %46 = vector.extract_strided_slice %4 {offsets = [0, 640], sizes = [1, 64], strides = [1, 1]} : vector<1x1024xf32> to vector<1x64xf32>
    %47 = arith.addf %43, %46 : vector<1x64xf32>
    %48 = vector.extract_strided_slice %7 {offsets = [0, 640], sizes = [1, 64], strides = [1, 1]} : vector<1x1024xf32> to vector<1x64xf32>
    %49 = arith.addf %45, %48 : vector<1x64xf32>
    %50 = vector.extract_strided_slice %4 {offsets = [0, 704], sizes = [1, 64], strides = [1, 1]} : vector<1x1024xf32> to vector<1x64xf32>
    %51 = arith.addf %47, %50 : vector<1x64xf32>
    %52 = vector.extract_strided_slice %7 {offsets = [0, 704], sizes = [1, 64], strides = [1, 1]} : vector<1x1024xf32> to vector<1x64xf32>
    %53 = arith.addf %49, %52 : vector<1x64xf32>
    %54 = vector.extract_strided_slice %4 {offsets = [0, 768], sizes = [1, 64], strides = [1, 1]} : vector<1x1024xf32> to vector<1x64xf32>
    %55 = arith.addf %51, %54 : vector<1x64xf32>
    %56 = vector.extract_strided_slice %7 {offsets = [0, 768], sizes = [1, 64], strides = [1, 1]} : vector<1x1024xf32> to vector<1x64xf32>
    %57 = arith.addf %53, %56 : vector<1x64xf32>
    %58 = vector.extract_strided_slice %4 {offsets = [0, 832], sizes = [1, 64], strides = [1, 1]} : vector<1x1024xf32> to vector<1x64xf32>
    %59 = arith.addf %55, %58 : vector<1x64xf32>
    %60 = vector.extract_strided_slice %7 {offsets = [0, 832], sizes = [1, 64], strides = [1, 1]} : vector<1x1024xf32> to vector<1x64xf32>
    %61 = arith.addf %57, %60 : vector<1x64xf32>
    %62 = vector.extract_strided_slice %4 {offsets = [0, 896], sizes = [1, 64], strides = [1, 1]} : vector<1x1024xf32> to vector<1x64xf32>
    %63 = arith.addf %59, %62 : vector<1x64xf32>
    %64 = vector.extract_strided_slice %7 {offsets = [0, 896], sizes = [1, 64], strides = [1, 1]} : vector<1x1024xf32> to vector<1x64xf32>
    %65 = arith.addf %61, %64 : vector<1x64xf32>
    %66 = vector.extract_strided_slice %4 {offsets = [0, 960], sizes = [1, 64], strides = [1, 1]} : vector<1x1024xf32> to vector<1x64xf32>
    %67 = arith.addf %63, %66 : vector<1x64xf32>
    %68 = vector.extract_strided_slice %7 {offsets = [0, 960], sizes = [1, 64], strides = [1, 1]} : vector<1x1024xf32> to vector<1x64xf32>
    %69 = arith.addf %65, %68 : vector<1x64xf32>
    %cst_5 = arith.constant 3.200000e+01 : f32
    %70 = vector.broadcast %cst_5 : f32 to vector<1x64xf32>
    %71 = arith.divf %67, %70 : vector<1x64xf32>
    %cst_6 = arith.constant 3.200000e+01 : f32
    %72 = vector.broadcast %cst_6 : f32 to vector<1x64xf32>
    %73 = arith.divf %69, %72 : vector<1x64xf32>
    %74 = arith.mulf %71, %71 : vector<1x64xf32>
    %75 = arith.subf %73, %74 : vector<1x64xf32>
    %c0_7 = arith.constant 0 : index
    %c0_8 = arith.constant 0 : index
    %76 = vector.load %arg2[%c0_7, %c0_8] : memref<1x64xf32, #tpu.memory_space<vmem>>, vector<1x64xf32>
    %cst_9 = arith.constant 9.99999974E-6 : f32
    %77 = vector.broadcast %cst_9 : f32 to vector<1x64xf32>
    %78 = arith.addf %75, %77 : vector<1x64xf32>
    %79 = math.rsqrt %78 : vector<1x64xf32>
    %80 = arith.mulf %76, %79 : vector<1x64xf32>
    %c0_10 = arith.constant 0 : index
    %c0_11 = arith.constant 0 : index
    %81 = vector.load %arg3[%c0_10, %c0_11] : memref<1x64xf32, #tpu.memory_space<vmem>>, vector<1x64xf32>
    %82 = arith.mulf %71, %80 : vector<1x64xf32>
    %83 = arith.subf %81, %82 : vector<1x64xf32>
    %84 = tpu.concatenate %80, %80, %80, %80, %80, %80, %80, %80, %80, %80, %80, %80, %80, %80, %80, %80 in 1 : vector<1x64xf32>, vector<1x64xf32>, vector<1x64xf32>, vector<1x64xf32>, vector<1x64xf32>, vector<1x64xf32>, vector<1x64xf32>, vector<1x64xf32>, vector<1x64xf32>, vector<1x64xf32>, vector<1x64xf32>, vector<1x64xf32>, vector<1x64xf32>, vector<1x64xf32>, vector<1x64xf32>, vector<1x64xf32> -> vector<1x1024xf32>
    %85 = tpu.concatenate %83, %83, %83, %83, %83, %83, %83, %83, %83, %83, %83, %83, %83, %83, %83, %83 in 1 : vector<1x64xf32>, vector<1x64xf32>, vector<1x64xf32>, vector<1x64xf32>, vector<1x64xf32>, vector<1x64xf32>, vector<1x64xf32>, vector<1x64xf32>, vector<1x64xf32>, vector<1x64xf32>, vector<1x64xf32>, vector<1x64xf32>, vector<1x64xf32>, vector<1x64xf32>, vector<1x64xf32>, vector<1x64xf32> -> vector<1x1024xf32>
    %86 = vector.broadcast %84 : vector<1x1024xf32> to vector<8x1024xf32>
    %87 = arith.mulf %2, %86 : vector<8x1024xf32>
    %88 = vector.broadcast %85 : vector<1x1024xf32> to vector<8x1024xf32>
    %89 = arith.addf %87, %88 : vector<8x1024xf32>
    %cst_12 = arith.constant 0.000000e+00 : f32
    %90 = vector.broadcast %cst_12 : f32 to vector<8x1024xf32>
    %91 = arith.maximumf %89, %90 : vector<8x1024xf32>
    %92 = arith.truncf %91 : vector<8x1024xf32> to vector<8x1024xbf16>
    %c0_13 = arith.constant 0 : index
    %c0_14 = arith.constant 0 : index
    %93 = vector.load %arg4[%c0_13, %c0_14] : memref<8x1024xbf16, #tpu.memory_space<vmem>>, vector<8x1024xbf16>
    tpu.vector_store %arg4[%c0_13, %c0_14], %92 {strides = array<i32>} : memref<8x1024xbf16, #tpu.memory_space<vmem>>, vector<8x1024xbf16>,
    return
  }
}

module attributes {stable_mosaic.version = 11 : i64} {
  func.func @_mm_bn_relu_kernel(%arg0: memref<32x576xbf16, #tpu.memory_space<vmem>>, %arg1: memref<576x128xbf16, #tpu.memory_space<vmem>>, %arg2: memref<1x32xf32, #tpu.memory_space<vmem>>, %arg3: memref<1x32xf32, #tpu.memory_space<vmem>>, %arg4: memref<32x128xbf16, #tpu.memory_space<vmem>>) attributes {dimension_semantics = [], scalar_prefetch = 0 : i64, scratch_operands = 0 : i64, tpu.core_type = #tpu.core_type<tc>} {
    %c0 = arith.constant 0 : index
    %c0_0 = arith.constant 0 : index
    %0 = vector.load %arg0[%c0, %c0_0] : memref<32x576xbf16, #tpu.memory_space<vmem>>, vector<32x576xbf16>
    %c0_1 = arith.constant 0 : index
    %c0_2 = arith.constant 0 : index
    %1 = vector.load %arg1[%c0_1, %c0_2] : memref<576x128xbf16, #tpu.memory_space<vmem>>, vector<576x128xbf16>
    %cst = arith.constant dense<0.000000e+00> : vector<32x128xf32>
    %2 = tpu.matmul %0, %1, %cst {dimension_numbers = #tpu.dot_dimension_numbers<[1], [0], [0], [1], [0, 0, 1, 1], [], []>} : vector<32x576xbf16>, vector<576x128xbf16>, vector<32x128xf32> -> vector<32x128xf32>
    %cst_3 = arith.constant dense<0.000000e+00> : vector<128xf32>
    %3 = vector.multi_reduction <add>, %2, %cst_3 [0] : vector<32x128xf32> to vector<128xf32>
    %4 = vector.shape_cast %3 : vector<128xf32> to vector<1x128xf32>
    %5 = arith.mulf %2, %2 : vector<32x128xf32>
    %cst_4 = arith.constant dense<0.000000e+00> : vector<128xf32>
    %6 = vector.multi_reduction <add>, %5, %cst_4 [0] : vector<32x128xf32> to vector<128xf32>
    %7 = vector.shape_cast %6 : vector<128xf32> to vector<1x128xf32>
    %8 = vector.extract_strided_slice %4 {offsets = [0, 0], sizes = [1, 32], strides = [1, 1]} : vector<1x128xf32> to vector<1x32xf32>
    %9 = vector.extract_strided_slice %7 {offsets = [0, 0], sizes = [1, 32], strides = [1, 1]} : vector<1x128xf32> to vector<1x32xf32>
    %10 = vector.extract_strided_slice %4 {offsets = [0, 32], sizes = [1, 32], strides = [1, 1]} : vector<1x128xf32> to vector<1x32xf32>
    %11 = arith.addf %8, %10 : vector<1x32xf32>
    %12 = vector.extract_strided_slice %7 {offsets = [0, 32], sizes = [1, 32], strides = [1, 1]} : vector<1x128xf32> to vector<1x32xf32>
    %13 = arith.addf %9, %12 : vector<1x32xf32>
    %14 = vector.extract_strided_slice %4 {offsets = [0, 64], sizes = [1, 32], strides = [1, 1]} : vector<1x128xf32> to vector<1x32xf32>
    %15 = arith.addf %11, %14 : vector<1x32xf32>
    %16 = vector.extract_strided_slice %7 {offsets = [0, 64], sizes = [1, 32], strides = [1, 1]} : vector<1x128xf32> to vector<1x32xf32>
    %17 = arith.addf %13, %16 : vector<1x32xf32>
    %18 = vector.extract_strided_slice %4 {offsets = [0, 96], sizes = [1, 32], strides = [1, 1]} : vector<1x128xf32> to vector<1x32xf32>
    %19 = arith.addf %15, %18 : vector<1x32xf32>
    %20 = vector.extract_strided_slice %7 {offsets = [0, 96], sizes = [1, 32], strides = [1, 1]} : vector<1x128xf32> to vector<1x32xf32>
    %21 = arith.addf %17, %20 : vector<1x32xf32>
    %cst_5 = arith.constant 1.280000e+02 : f32
    %22 = vector.broadcast %cst_5 : f32 to vector<1x32xf32>
    %23 = arith.divf %19, %22 : vector<1x32xf32>
    %cst_6 = arith.constant 1.280000e+02 : f32
    %24 = vector.broadcast %cst_6 : f32 to vector<1x32xf32>
    %25 = arith.divf %21, %24 : vector<1x32xf32>
    %26 = arith.mulf %23, %23 : vector<1x32xf32>
    %27 = arith.subf %25, %26 : vector<1x32xf32>
    %c0_7 = arith.constant 0 : index
    %c0_8 = arith.constant 0 : index
    %28 = vector.load %arg2[%c0_7, %c0_8] : memref<1x32xf32, #tpu.memory_space<vmem>>, vector<1x32xf32>
    %cst_9 = arith.constant 9.99999974E-6 : f32
    %29 = vector.broadcast %cst_9 : f32 to vector<1x32xf32>
    %30 = arith.addf %27, %29 : vector<1x32xf32>
    %31 = math.rsqrt %30 : vector<1x32xf32>
    %32 = arith.mulf %28, %31 : vector<1x32xf32>
    %c0_10 = arith.constant 0 : index
    %c0_11 = arith.constant 0 : index
    %33 = vector.load %arg3[%c0_10, %c0_11] : memref<1x32xf32, #tpu.memory_space<vmem>>, vector<1x32xf32>
    %34 = arith.mulf %23, %32 : vector<1x32xf32>
    %35 = arith.subf %33, %34 : vector<1x32xf32>
    %36 = tpu.concatenate %32, %32, %32, %32 in 1 : vector<1x32xf32>, vector<1x32xf32>, vector<1x32xf32>, vector<1x32xf32> -> vector<1x128xf32>
    %37 = tpu.concatenate %35, %35, %35, %35 in 1 : vector<1x32xf32>, vector<1x32xf32>, vector<1x32xf32>, vector<1x32xf32> -> vector<1x128xf32>
    %38 = vector.broadcast %36 : vector<1x128xf32> to vector<32x128xf32>
    %39 = arith.mulf %2, %38 : vector<32x128xf32>
    %40 = vector.broadcast %37 : vector<1x128xf32> to vector<32x128xf32>
    %41 = arith.addf %39, %40 : vector<32x128xf32>
    %cst_12 = arith.constant 0.000000e+00 : f32
    %42 = vector.broadcast %cst_12 : f32 to vector<32x128xf32>
    %43 = arith.maximumf %41, %42 : vector<32x128xf32>
    %44 = arith.truncf %43 : vector<32x128xf32> to vector<32x128xbf16>
    %c0_13 = arith.constant 0 : index
    %c0_14 = arith.constant 0 : index
    %45 = vector.load %arg4[%c0_13, %c0_14] : memref<32x128xbf16, #tpu.memory_space<vmem>>, vector<32x128xbf16>
    tpu.vector_store %arg4[%c0_13, %c0_14], %44 {strides = array<i32>} : memref<32x128xbf16, #tpu.memory_space<vmem>>, vector<32x128xbf16>,
    return
  }
}

module attributes {stable_mosaic.version = 11 : i64} {
  func.func @_mm_bn_relu_kernel(%arg0: memref<128x288xbf16, #tpu.memory_space<vmem>>, %arg1: memref<288x64xbf16, #tpu.memory_space<vmem>>, %arg2: memref<1x16xf32, #tpu.memory_space<vmem>>, %arg3: memref<1x16xf32, #tpu.memory_space<vmem>>, %arg4: memref<128x64xbf16, #tpu.memory_space<vmem>>) attributes {dimension_semantics = [], scalar_prefetch = 0 : i64, scratch_operands = 0 : i64, tpu.core_type = #tpu.core_type<tc>} {
    %c0 = arith.constant 0 : index
    %c0_0 = arith.constant 0 : index
    %0 = vector.load %arg0[%c0, %c0_0] : memref<128x288xbf16, #tpu.memory_space<vmem>>, vector<128x288xbf16>
    %c0_1 = arith.constant 0 : index
    %c0_2 = arith.constant 0 : index
    %1 = vector.load %arg1[%c0_1, %c0_2] : memref<288x64xbf16, #tpu.memory_space<vmem>>, vector<288x64xbf16>
    %cst = arith.constant dense<0.000000e+00> : vector<128x64xf32>
    %2 = tpu.matmul %0, %1, %cst {dimension_numbers = #tpu.dot_dimension_numbers<[1], [0], [0], [1], [0, 0, 1, 1], [], []>} : vector<128x288xbf16>, vector<288x64xbf16>, vector<128x64xf32> -> vector<128x64xf32>
    %cst_3 = arith.constant dense<0.000000e+00> : vector<64xf32>
    %3 = vector.multi_reduction <add>, %2, %cst_3 [0] : vector<128x64xf32> to vector<64xf32>
    %4 = vector.shape_cast %3 : vector<64xf32> to vector<1x64xf32>
    %5 = arith.mulf %2, %2 : vector<128x64xf32>
    %cst_4 = arith.constant dense<0.000000e+00> : vector<64xf32>
    %6 = vector.multi_reduction <add>, %5, %cst_4 [0] : vector<128x64xf32> to vector<64xf32>
    %7 = vector.shape_cast %6 : vector<64xf32> to vector<1x64xf32>
    %8 = vector.extract_strided_slice %4 {offsets = [0, 0], sizes = [1, 16], strides = [1, 1]} : vector<1x64xf32> to vector<1x16xf32>
    %9 = vector.extract_strided_slice %7 {offsets = [0, 0], sizes = [1, 16], strides = [1, 1]} : vector<1x64xf32> to vector<1x16xf32>
    %10 = vector.extract_strided_slice %4 {offsets = [0, 16], sizes = [1, 16], strides = [1, 1]} : vector<1x64xf32> to vector<1x16xf32>
    %11 = arith.addf %8, %10 : vector<1x16xf32>
    %12 = vector.extract_strided_slice %7 {offsets = [0, 16], sizes = [1, 16], strides = [1, 1]} : vector<1x64xf32> to vector<1x16xf32>
    %13 = arith.addf %9, %12 : vector<1x16xf32>
    %14 = vector.extract_strided_slice %4 {offsets = [0, 32], sizes = [1, 16], strides = [1, 1]} : vector<1x64xf32> to vector<1x16xf32>
    %15 = arith.addf %11, %14 : vector<1x16xf32>
    %16 = vector.extract_strided_slice %7 {offsets = [0, 32], sizes = [1, 16], strides = [1, 1]} : vector<1x64xf32> to vector<1x16xf32>
    %17 = arith.addf %13, %16 : vector<1x16xf32>
    %18 = vector.extract_strided_slice %4 {offsets = [0, 48], sizes = [1, 16], strides = [1, 1]} : vector<1x64xf32> to vector<1x16xf32>
    %19 = arith.addf %15, %18 : vector<1x16xf32>
    %20 = vector.extract_strided_slice %7 {offsets = [0, 48], sizes = [1, 16], strides = [1, 1]} : vector<1x64xf32> to vector<1x16xf32>
    %21 = arith.addf %17, %20 : vector<1x16xf32>
    %cst_5 = arith.constant 5.120000e+02 : f32
    %22 = vector.broadcast %cst_5 : f32 to vector<1x16xf32>
    %23 = arith.divf %19, %22 : vector<1x16xf32>
    %cst_6 = arith.constant 5.120000e+02 : f32
    %24 = vector.broadcast %cst_6 : f32 to vector<1x16xf32>
    %25 = arith.divf %21, %24 : vector<1x16xf32>
    %26 = arith.mulf %23, %23 : vector<1x16xf32>
    %27 = arith.subf %25, %26 : vector<1x16xf32>
    %c0_7 = arith.constant 0 : index
    %c0_8 = arith.constant 0 : index
    %28 = vector.load %arg2[%c0_7, %c0_8] : memref<1x16xf32, #tpu.memory_space<vmem>>, vector<1x16xf32>
    %cst_9 = arith.constant 9.99999974E-6 : f32
    %29 = vector.broadcast %cst_9 : f32 to vector<1x16xf32>
    %30 = arith.addf %27, %29 : vector<1x16xf32>
    %31 = math.rsqrt %30 : vector<1x16xf32>
    %32 = arith.mulf %28, %31 : vector<1x16xf32>
    %c0_10 = arith.constant 0 : index
    %c0_11 = arith.constant 0 : index
    %33 = vector.load %arg3[%c0_10, %c0_11] : memref<1x16xf32, #tpu.memory_space<vmem>>, vector<1x16xf32>
    %34 = arith.mulf %23, %32 : vector<1x16xf32>
    %35 = arith.subf %33, %34 : vector<1x16xf32>
    %36 = tpu.concatenate %32, %32, %32, %32 in 1 : vector<1x16xf32>, vector<1x16xf32>, vector<1x16xf32>, vector<1x16xf32> -> vector<1x64xf32>
    %37 = tpu.concatenate %35, %35, %35, %35 in 1 : vector<1x16xf32>, vector<1x16xf32>, vector<1x16xf32>, vector<1x16xf32> -> vector<1x64xf32>
    %38 = vector.broadcast %36 : vector<1x64xf32> to vector<128x64xf32>
    %39 = arith.mulf %2, %38 : vector<128x64xf32>
    %40 = vector.broadcast %37 : vector<1x64xf32> to vector<128x64xf32>
    %41 = arith.addf %39, %40 : vector<128x64xf32>
    %cst_12 = arith.constant 0.000000e+00 : f32
    %42 = vector.broadcast %cst_12 : f32 to vector<128x64xf32>
    %43 = arith.maximumf %41, %42 : vector<128x64xf32>
    %44 = arith.truncf %43 : vector<128x64xf32> to vector<128x64xbf16>
    %c0_13 = arith.constant 0 : index
    %c0_14 = arith.constant 0 : index
    %45 = vector.load %arg4[%c0_13, %c0_14] : memref<128x64xbf16, #tpu.memory_space<vmem>>, vector<128x64xbf16>
    tpu.vector_store %arg4[%c0_13, %c0_14], %44 {strides = array<i32>} : memref<128x64xbf16, #tpu.memory_space<vmem>>, vector<128x64xbf16>,
    return
  }
}

module attributes {stable_mosaic.version = 11 : i64} {
  func.func @_mm_bn_relu_kernel(%arg0: memref<512x144xbf16, #tpu.memory_space<vmem>>, %arg1: memref<144x32xbf16, #tpu.memory_space<vmem>>, %arg2: memref<1x8xf32, #tpu.memory_space<vmem>>, %arg3: memref<1x8xf32, #tpu.memory_space<vmem>>, %arg4: memref<512x32xbf16, #tpu.memory_space<vmem>>) attributes {dimension_semantics = [], scalar_prefetch = 0 : i64, scratch_operands = 0 : i64, tpu.core_type = #tpu.core_type<tc>} {
    %c0 = arith.constant 0 : index
    %c0_0 = arith.constant 0 : index
    %0 = vector.load %arg0[%c0, %c0_0] : memref<512x144xbf16, #tpu.memory_space<vmem>>, vector<512x144xbf16>
    %c0_1 = arith.constant 0 : index
    %c0_2 = arith.constant 0 : index
    %1 = vector.load %arg1[%c0_1, %c0_2] : memref<144x32xbf16, #tpu.memory_space<vmem>>, vector<144x32xbf16>
    %cst = arith.constant dense<0.000000e+00> : vector<512x32xf32>
    %2 = tpu.matmul %0, %1, %cst {dimension_numbers = #tpu.dot_dimension_numbers<[1], [0], [0], [1], [0, 0, 1, 1], [], []>} : vector<512x144xbf16>, vector<144x32xbf16>, vector<512x32xf32> -> vector<512x32xf32>
    %cst_3 = arith.constant dense<0.000000e+00> : vector<32xf32>
    %3 = vector.multi_reduction <add>, %2, %cst_3 [0] : vector<512x32xf32> to vector<32xf32>
    %4 = vector.shape_cast %3 : vector<32xf32> to vector<1x32xf32>
    %5 = arith.mulf %2, %2 : vector<512x32xf32>
    %cst_4 = arith.constant dense<0.000000e+00> : vector<32xf32>
    %6 = vector.multi_reduction <add>, %5, %cst_4 [0] : vector<512x32xf32> to vector<32xf32>
    %7 = vector.shape_cast %6 : vector<32xf32> to vector<1x32xf32>
    %8 = vector.extract_strided_slice %4 {offsets = [0, 0], sizes = [1, 8], strides = [1, 1]} : vector<1x32xf32> to vector<1x8xf32>
    %9 = vector.extract_strided_slice %7 {offsets = [0, 0], sizes = [1, 8], strides = [1, 1]} : vector<1x32xf32> to vector<1x8xf32>
    %10 = vector.extract_strided_slice %4 {offsets = [0, 8], sizes = [1, 8], strides = [1, 1]} : vector<1x32xf32> to vector<1x8xf32>
    %11 = arith.addf %8, %10 : vector<1x8xf32>
    %12 = vector.extract_strided_slice %7 {offsets = [0, 8], sizes = [1, 8], strides = [1, 1]} : vector<1x32xf32> to vector<1x8xf32>
    %13 = arith.addf %9, %12 : vector<1x8xf32>
    %14 = vector.extract_strided_slice %4 {offsets = [0, 16], sizes = [1, 8], strides = [1, 1]} : vector<1x32xf32> to vector<1x8xf32>
    %15 = arith.addf %11, %14 : vector<1x8xf32>
    %16 = vector.extract_strided_slice %7 {offsets = [0, 16], sizes = [1, 8], strides = [1, 1]} : vector<1x32xf32> to vector<1x8xf32>
    %17 = arith.addf %13, %16 : vector<1x8xf32>
    %18 = vector.extract_strided_slice %4 {offsets = [0, 24], sizes = [1, 8], strides = [1, 1]} : vector<1x32xf32> to vector<1x8xf32>
    %19 = arith.addf %15, %18 : vector<1x8xf32>
    %20 = vector.extract_strided_slice %7 {offsets = [0, 24], sizes = [1, 8], strides = [1, 1]} : vector<1x32xf32> to vector<1x8xf32>
    %21 = arith.addf %17, %20 : vector<1x8xf32>
    %cst_5 = arith.constant 2.048000e+03 : f32
    %22 = vector.broadcast %cst_5 : f32 to vector<1x8xf32>
    %23 = arith.divf %19, %22 : vector<1x8xf32>
    %cst_6 = arith.constant 2.048000e+03 : f32
    %24 = vector.broadcast %cst_6 : f32 to vector<1x8xf32>
    %25 = arith.divf %21, %24 : vector<1x8xf32>
    %26 = arith.mulf %23, %23 : vector<1x8xf32>
    %27 = arith.subf %25, %26 : vector<1x8xf32>
    %c0_7 = arith.constant 0 : index
    %c0_8 = arith.constant 0 : index
    %28 = vector.load %arg2[%c0_7, %c0_8] : memref<1x8xf32, #tpu.memory_space<vmem>>, vector<1x8xf32>
    %cst_9 = arith.constant 9.99999974E-6 : f32
    %29 = vector.broadcast %cst_9 : f32 to vector<1x8xf32>
    %30 = arith.addf %27, %29 : vector<1x8xf32>
    %31 = math.rsqrt %30 : vector<1x8xf32>
    %32 = arith.mulf %28, %31 : vector<1x8xf32>
    %c0_10 = arith.constant 0 : index
    %c0_11 = arith.constant 0 : index
    %33 = vector.load %arg3[%c0_10, %c0_11] : memref<1x8xf32, #tpu.memory_space<vmem>>, vector<1x8xf32>
    %34 = arith.mulf %23, %32 : vector<1x8xf32>
    %35 = arith.subf %33, %34 : vector<1x8xf32>
    %36 = tpu.concatenate %32, %32, %32, %32 in 1 : vector<1x8xf32>, vector<1x8xf32>, vector<1x8xf32>, vector<1x8xf32> -> vector<1x32xf32>
    %37 = tpu.concatenate %35, %35, %35, %35 in 1 : vector<1x8xf32>, vector<1x8xf32>, vector<1x8xf32>, vector<1x8xf32> -> vector<1x32xf32>
    %38 = vector.broadcast %36 : vector<1x32xf32> to vector<512x32xf32>
    %39 = arith.mulf %2, %38 : vector<512x32xf32>
    %40 = vector.broadcast %37 : vector<1x32xf32> to vector<512x32xf32>
    %41 = arith.addf %39, %40 : vector<512x32xf32>
    %cst_12 = arith.constant 0.000000e+00 : f32
    %42 = vector.broadcast %cst_12 : f32 to vector<512x32xf32>
    %43 = arith.maximumf %41, %42 : vector<512x32xf32>
    %44 = arith.truncf %43 : vector<512x32xf32> to vector<512x32xbf16>
    %c0_13 = arith.constant 0 : index
    %c0_14 = arith.constant 0 : index
    %45 = vector.load %arg4[%c0_13, %c0_14] : memref<512x32xbf16, #tpu.memory_space<vmem>>, vector<512x32xbf16>
    tpu.vector_store %arg4[%c0_13, %c0_14], %44 {strides = array<i32>} : memref<512x32xbf16, #tpu.memory_space<vmem>>, vector<512x32xbf16>,
    return
  }
}

module attributes {stable_mosaic.version = 11 : i64} {
  func.func @_mm_t_tanh_kernel(%arg0: i32, %arg1: memref<12x72xbf16, #tpu.memory_space<vmem>>, %arg2: memref<72x1024xbf16, #tpu.memory_space<vmem>>, %arg3: memref<12x1024xbf16, #tpu.memory_space<vmem>>) attributes {dimension_semantics = [#tpu.dimension_semantics<parallel>], iteration_bounds = array<i64: 2>, scalar_prefetch = 0 : i64, scratch_operands = 0 : i64, tpu.core_type = #tpu.core_type<tc>, window_params = [{pipeline_mode = #tpu.pipeline_mode<synchronous>, transform_indices = @transform_0, window_bounds = array<i64: 12, 72>}, {transform_indices = @transform_1, window_bounds = array<i64: 72, 1024>}, {transform_indices = @transform_2, window_bounds = array<i64: 12, 1024>}]} {
    %c0 = arith.constant 0 : index
    %c0_0 = arith.constant 0 : index
    %0 = vector.load %arg1[%c0, %c0_0] : memref<12x72xbf16, #tpu.memory_space<vmem>>, vector<12x72xbf16>
    %c0_1 = arith.constant 0 : index
    %c0_2 = arith.constant 0 : index
    %1 = vector.load %arg2[%c0_1, %c0_2] : memref<72x1024xbf16, #tpu.memory_space<vmem>>, vector<72x1024xbf16>
    %cst = arith.constant dense<0.000000e+00> : vector<12x1024xf32>
    %2 = tpu.matmul %0, %1, %cst {dimension_numbers = #tpu.dot_dimension_numbers<[1], [0], [0], [1], [0, 0, 1, 1], [], []>} : vector<12x72xbf16>, vector<72x1024xbf16>, vector<12x1024xf32> -> vector<12x1024xf32>
    %3 = math.tanh %2 : vector<12x1024xf32>
    %4 = arith.truncf %3 : vector<12x1024xf32> to vector<12x1024xbf16>
    %c0_3 = arith.constant 0 : index
    %c0_4 = arith.constant 0 : index
    %5 = vector.load %arg3[%c0_3, %c0_4] : memref<12x1024xbf16, #tpu.memory_space<vmem>>, vector<12x1024xbf16>
    tpu.vector_store %arg3[%c0_3, %c0_4], %4 {strides = array<i32>} : memref<12x1024xbf16, #tpu.memory_space<vmem>>, vector<12x1024xbf16>,
    return
  }
  func.func @transform_0(%arg0: i32) -> (i32, i32) {
    %c0_i32 = arith.constant 0 : i32
    %c0_i32_0 = arith.constant 0 : i32
    %c0_i32_1 = arith.constant 0 : i32
    return %c0_i32, %c0_i32_0 : i32, i32
  }
  func.func @transform_1(%arg0: i32) -> (i32, i32) {
    %c0_i32 = arith.constant 0 : i32
    %c0_i32_0 = arith.constant 0 : i32
    return %c0_i32, %arg0 : i32, i32
  }
  func.func @transform_2(%arg0: i32) -> (i32, i32) {
    %c0_i32 = arith.constant 0 : i32
    %c0_i32_0 = arith.constant 0 : i32
    return %c0_i32, %arg0 : i32, i32
  }
}

</mosaic_0001>

<bundles_post_ra>
// kernel: generator_forward.5
= control target key start
LH: loop header
LB: loop body
LE: loop exit
PB: predicated region body
PF: predicated region fallthrough
CT: control target
= control target key end

     0   :  { %9 = vsyncpa [#allocation3], 0  ;;  %s862_s0 = inlined_call_operand.vmem [shape: bf16[8,8], index: 0, kind: input, shape index: {}]   ;;  %s863_s1 = inlined_call_operand.hbm [shape: bf16[8,1024], index: 1, kind: input, shape index: {}]   ;;  %s864_s2 = inlined_call_operand.hbm [shape: f32[1,64], index: 2, kind: input, shape index: {}]   ;;  %s865_s3 = inlined_call_operand.hbm [shape: f32[1,64], index: 3, kind: input, shape index: {}]   ;;  %s866_s4 = inlined_call_operand.vmem [shape: bf16[8,1024], index: 4, kind: output, shape index: {}]  }
   0x1   :  { %10 = vsyncpa [#allocation5], 0  ;;  %s683_s15 = smov [#allocation4]   ;;  %s684_s17 = smov [#allocation2]  }
   0x2   :  { %s29_s16 = sshll.u32 %s683_s15, 4  ;;  %s19_s18 = sshll.u32 %s684_s17, 4  ;;  %s30_s16 = int_to_ptr.vmem [resolvable:$true] %s29_s16  ;;  %s20_s18 = int_to_ptr.vmem [resolvable:$true] %s19_s18 }
   0x3   :  { %s613_s21 = scalar_lea.hbm %s864_s2, 16 }
   0x4   :  { %p614_p0 = scmp.ne.s32.totalorder %s864_s2, %s613_s21  ;;  %p617_p1 = scmp.lt.u32.totalorder %s613_s21, %s864_s2 }
   0x6   :  { %p619_p2 = pnand %p617_p1, %p614_p0 }
   0x8   :  { %622 = shalt.err (!%p619_p2)
}
   0x9   :  { %s623_s26 = scalar_lea.vmem %s30_s16, 16  ;;  %s627_s27 = scalar_lea.vmem %s30_s16, 32 }
   0xa   :  { %p624_p3 = scmp.ne.s32.totalorder %s30_s16, %s623_s26  ;;  %p628_p4 = scmp.lt.s32.totalorder %s30_s16, %s30_s16 }
   0xb   :  { %p629_p5 = scmp.lt.s32.totalorder %s627_s27, %s623_s26 }
   0xd   :  { %p630_p6 = por %p629_p5, %p628_p4 }
   0xf   :  { %p631_p7 = pnand %p630_p6, %p624_p3 }
  0x11   :  { %634 = shalt.err (!%p631_p7)
}
  0x12   :  { %32 = dma.hbm_to_vmem [thread:$0]  %s864_s2, 16, %s30_s16, [#allocation5]  }
  0x13   :  { %s635_s6 = scalar_lea.hbm %s863_s1, 512 }
  0x14   :  { %p636_p8 = scmp.ne.s32.totalorder %s863_s1, %s635_s6  ;;  %p639_p9 = scmp.lt.u32.totalorder %s635_s6, %s863_s1 }
  0x16   :  { %p641_p10 = pnand %p639_p9, %p636_p8 }
  0x18   :  { %644 = shalt.err (!%p641_p10)
}
  0x19   :  { %s645_s11 = scalar_lea.vmem %s20_s18, 512  ;;  %p650_p12 = scmp.lt.s32.totalorder %s20_s18, %s20_s18 }
  0x1a   :  { %p646_p11 = scmp.ne.s32.totalorder %s20_s18, %s645_s11  ;;  %p651_p13 = scmp.lt.s32.totalorder %s645_s11, %s645_s11 }
  0x1c   :  { %p652_p0 = por %p651_p13, %p650_p12 }
  0x1e   :  { %p653_p1 = pnand %p652_p0, %p646_p11 }
  0x20   :  { %656 = shalt.err (!%p653_p1)
}
  0x21   :  { %22 = dma.hbm_to_vmem [thread:$0]  %s863_s1, 512, %s20_s18, [#allocation3]  }
  0x22   :  { %s685_s13 = smov [#allocation6]   ;;  %s657_s17 = scalar_lea.hbm %s865_s3, 16 }
  0x23   :  { %s39_s14 = sshll.u32 %s685_s13, 4  ;;  %p658_p2 = scmp.ne.s32.totalorder %s865_s3, %s657_s17  ;;  %s40_s14 = int_to_ptr.vmem [resolvable:$true] %s39_s14 }
  0x24   :  { %p661_p3 = scmp.lt.u32.totalorder %s657_s17, %s865_s3 }
  0x26   :  { %p663_p4 = pnand %p661_p3, %p658_p2 }
  0x28   :  { %666 = shalt.err (!%p663_p4)
}
  0x29   :  { %s667_s23 = scalar_lea.vmem %s40_s14, 16  ;;  %s671_s1 = scalar_lea.vmem %s40_s14, 32 }
  0x2a   :  { %p668_p5 = scmp.ne.s32.totalorder %s40_s14, %s667_s23  ;;  %p672_p6 = scmp.lt.s32.totalorder %s40_s14, %s40_s14 }
  0x2b   :  { %p673_p7 = scmp.lt.s32.totalorder %s671_s1, %s667_s23 }
  0x2d   :  { %p674_p8 = por %p673_p7, %p672_p6 }
  0x2f   :  { %p675_p9 = pnand %p674_p8, %p668_p5 }
  0x31   :  { %678 = shalt.err (!%p675_p9)
}
  0x32   :  { %42 = dma.hbm_to_vmem [thread:$0]  %s865_s3, 16, %s40_s14, [#allocation5]  }
  0x33   :  { %679 = dma.done.wait [#allocation3], 512  }
  0x34   :  { %680 = vsyncadd [#allocation3], 4294966784 }
  0x35   :  { %681 = dma.done.wait [#allocation5], 32  }
  0x36   :  { %682 = vsyncadd [#allocation5], 4294967264  ;;  %v686_v0 = vmov 0   ;;  %v54_v1 = vld [vmem:[#allocation2] sm:$0xff]  ;;  %vm82_vm0 = vcmask 1043456   ;;  %v55_v2 = vld [vmem:[#allocation2 + $0x8] sm:$0xff] }
  0x37   :  { %139 = vmatprep.mubr.bf16.mxu0 %v686_v0  ;;  %180 = vmatprep.mubr.bf16.mxu1 %v686_v0  ;;  %v575_v3 = vcombine.high %v54_v1, %v54_v1  ;;  %v574_v4 = vcombine.low %v54_v1, %v54_v1  ;;  %v577_v5 = vcombine.high %v55_v2, %v55_v2  ;;  %v56_v7 = vld [vmem:[#allocation2 + $0x10] sm:$0xff]  ;;  %v57_v8 = vld [vmem:[#allocation2 + $0x18] sm:$0xff]  ;;  %v53_v15 = vld [vmem:[%s862_s0] sm:$0xf]  ;;  %vm78_vm1 = vcmask 64512   ;;  %s687_s0 = smov 64  }
  0x38   :  { %v576_v6 = vcombine.low %v55_v2, %v55_v2  ;;  %v579_v9 = vcombine.high %v56_v7, %v56_v7  ;;  %v578_v10 = vcombine.low %v56_v7, %v56_v7  ;;  %v581_v11 = vcombine.high %v57_v8, %v57_v8 }
  0x39   :  { %v580_v12 = vcombine.low %v57_v8, %v57_v8  ;;  %582 = vmatprep.subr.msk.bf16.mxu0 %vm82_vm0, %v575_v3  ;;  %v84_v13 = vsel %vm82_vm0, %v574_v4, 0  ;;  %584 = vmatprep.subr.msk.bf16.mxu1 %vm82_vm0, %v577_v5  ;;  %vm489_vm2 = vcmask 523264  }
  0x3a   :  { %v90_v14 = vsel %vm82_vm0, %v576_v6, 0  ;;  %108 = vmatpush1.bf16.msra.mxu0 %v84_v13  ;;  %v96_v16 = vsel %vm82_vm0, %v578_v10, 0 }
  0x3b   :  { %149 = vmatpush1.bf16.msra.mxu1 %v90_v14  ;;  %586 = vmatprep.subr.msk.bf16.mxu0 %vm82_vm0, %v579_v9  ;;  %v102_v17 = vsel %vm82_vm0, %v580_v12, 0 }
  0x3c   :  { %588 = vmatprep.subr.msk.bf16.mxu1 %vm82_vm0, %v581_v11 }
  0x3d   :  { %583 = vmatmul.mubr.msk.bf16.vlgmr.msra.gmra.mrb[0].mxu0 %vm78_vm1, %v53_v15 }
  0x3e   :  { %585 = vmatmul.mubr.msk.bf16.vlgmr.msra.gmra.mrb[0].mxu1 %vm78_vm1, %v53_v15  ;;  %190 = vmatpush1.bf16.msra.mxu0 %v96_v16 }
  0x3f   :  { %221 = vmatprep.mubr.bf16.mxu0 %v686_v0  ;;  %231 = vmatpush1.bf16.msra.mxu1 %v102_v17 }
  0x40   :  { %262 = vmatprep.mubr.bf16.mxu1 %v686_v0 }
  0x45   :  { %587 = vmatmul.mubr.msk.bf16.vlgmr.msra.gmra.mrb[4].mxu0 %vm78_vm1, %v53_v15 }
  0x46   :  { %589 = vmatmul.mubr.msk.bf16.vlgmr.msra.gmra.mrb[4].mxu1 %vm78_vm1, %v53_v15 }
 0x110   :  { %v760_v18 = vpop.f32.mrb[0].mxu0 }
 0x111   :  { %v762_v19 = vpop.f32.mrb[0].mxu1  ;;  %v271_v20 = vrot.slane %v760_v18, 4  ;;  %v319_v21 = vmul.f32 %v760_v18, %v760_v18  ;;  %v767_v22 = vpop.f32.mrb[1].mxu0 }
 0x112   :  { %v283_v23 = vrot.slane %v762_v19, 4  ;;  %v321_v24 = vmul.f32 %v762_v19, %v762_v19  ;;  %v772_v25 = vpop.f32.mrb[1].mxu1  ;;  %v277_v26 = vrot.slane %v767_v22, 4  ;;  %v320_v27 = vmul.f32 %v767_v22, %v767_v22  ;;  %v145_v28 = vpop.f32.mrb[2].mxu0 }
 0x113   :  { %v289_v29 = vrot.slane %v772_v25, 4  ;;  %v322_v30 = vmul.f32 %v772_v25, %v772_v25  ;;  %v186_v31 = vpop.f32.mrb[2].mxu1  ;;  %v327_v32 = vrot.slane %v319_v21, 4  ;;  %v146_v33 = vpop.f32.mrb[3].mxu0  ;;  %v272_v37 = vadd.f32 %v271_v20, %v760_v18 }
 0x114   :  { %v284_v34 = vadd.f32 %v283_v23, %v762_v19  ;;  %v339_v35 = vrot.slane %v321_v24, 4  ;;  %v187_v36 = vpop.f32.mrb[3].mxu1  ;;  %v333_v38 = vrot.slane %v320_v27, 4  ;;  %v278_v41 = vadd.f32 %v277_v26, %v767_v22 }
 0x115   :  { %v290_v39 = vadd.f32 %v289_v29, %v772_v25  ;;  %v345_v40 = vrot.slane %v322_v30, 4  ;;  %v328_v42 = vadd.f32 %v327_v32, %v319_v21  ;;  %v273_v45 = vrot.slane %v272_v37, 2 }
 0x116   :  { %v285_v43 = vrot.slane %v284_v34, 2  ;;  %v340_v44 = vadd.f32 %v339_v35, %v321_v24  ;;  %v334_v46 = vadd.f32 %v333_v38, %v320_v27  ;;  %v279_v47 = vrot.slane %v278_v41, 2 }
 0x117   :  { %v291_v48 = vrot.slane %v290_v39, 2  ;;  %v346_v49 = vadd.f32 %v345_v40, %v322_v30  ;;  %v274_v50 = vadd.f32 %v273_v45, %v272_v37  ;;  %v329_v51 = vrot.slane %v328_v42, 2 }
 0x118   :  { %v784_v52 = vpop.f32.mrb[4].mxu0  ;;  %v280_v53 = vadd.f32 %v279_v47, %v278_v41  ;;  %v335_v54 = vrot.slane %v334_v46, 2  ;;  %v286_v56 = vadd.f32 %v285_v43, %v284_v34  ;;  %v341_v57 = vrot.slane %v340_v44, 2 }
 0x119   :  { %v786_v55 = vpop.f32.mrb[4].mxu1  ;;  %v295_v58 = vrot.slane %v784_v52, 4  ;;  %v323_v59 = vmul.f32 %v784_v52, %v784_v52  ;;  %v791_v60 = vpop.f32.mrb[5].mxu0  ;;  %v275_v61 = vrot.slane %v274_v50, 1  ;;  %v330_v62 = vadd.f32 %v329_v51, %v328_v42 }
 0x11a   :  { %v793_v63 = vpop.f32.mrb[5].mxu1  ;;  %v301_v0 = vrot.slane %v791_v60, 4  ;;  %v324_v1 = vmul.f32 %v791_v60, %v791_v60  ;;  %v281_v2 = vrot.slane %v280_v53, 1  ;;  %v227_v3 = vpop.f32.mrb[6].mxu0  ;;  %v336_v4 = vadd.f32 %v335_v54, %v334_v46 }
 0x11b   :  { %v268_v5 = vpop.f32.mrb[6].mxu1  ;;  %v296_v6 = vadd.f32 %v295_v58, %v784_v52  ;;  %v351_v7 = vrot.slane %v323_v59, 4  ;;  %v799_v8 = vadd.f32 %v275_v61, %v274_v50  ;;  %v331_v9 = vrot.slane %v330_v62, 1  ;;  %v228_v10 = vpop.f32.mrb[7].mxu0 }
 0x11c   :  { %v269_v11 = vpop.f32.mrb[7].mxu1  ;;  %v357_v12 = vrot.slane %v324_v1, 4  ;;  %v801_v13 = vadd.f32 %v281_v2, %v280_v53  ;;  %v337_v14 = vrot.slane %v336_v4, 1  ;;  %v347_v15 = vrot.slane %v346_v49, 2 }
 0x11d   :  { %v302_v16 = vadd.f32 %v301_v0, %v791_v60  ;;  %376 = vrot.lane.b32.xlu0 %v799_v8, %s687_s0  ;;  %v292_v17 = vadd.f32 %v291_v48, %v290_v39  ;;  %v297_v20 = vrot.slane %v296_v6, 2  ;;  %v352_v21 = vadd.f32 %v351_v7, %v323_v59 }
 0x11e   :  { %388 = vrot.lane.b32.xlu1 %v801_v13, %s687_s0  ;;  %v307_v23 = vrot.slane %v786_v55, 4  ;;  %v325_v24 = vmul.f32 %v786_v55, %v786_v55  ;;  %v358_v26 = vadd.f32 %v357_v12, %v324_v1  ;;  %v811_v27 = vadd.f32 %v331_v9, %v330_v62 }
 0x11f   :  { %v326_v28 = vmul.f32 %v793_v63, %v793_v63  ;;  %v287_v29 = vrot.slane %v286_v56, 1  ;;  %v815_v30 = vadd.f32 %v337_v14, %v336_v4  ;;  %v342_v32 = vadd.f32 %v341_v57, %v340_v44 }
 0x120   :  { %v363_v31 = vrot.slane %v325_v24, 4  ;;  %v348_v33 = vadd.f32 %v347_v15, %v346_v49  ;;  %v303_v34 = vrot.slane %v302_v16, 2  ;;  %v308_v35 = vadd.f32 %v307_v23, %v786_v55 }
 0x121   :  { %381 = vrot.lane.b32.xlu0 %v811_v27, %s687_s0  ;;  %v313_v36 = vrot.slane %v793_v63, 4  ;;  %v343_v37 = vrot.slane %v342_v32, 1  ;;  %v293_v38 = vrot.slane %v292_v17, 1  ;;  %v369_v39 = vrot.slane %v326_v28, 4 }
 0x122   :  { %393 = vrot.lane.b32.xlu1 %v815_v30, %s687_s0  ;;  %v288_v40 = vadd.f32 %v287_v29, %v286_v56  ;;  %v298_v41 = vadd.f32 %v297_v20, %v296_v6  ;;  %v353_v42 = vrot.slane %v352_v21, 2  ;;  %v364_v43 = vadd.f32 %v363_v31, %v325_v24 }
 0x123   :  { %v344_v44 = vadd.f32 %v343_v37, %v342_v32  ;;  %v349_v45 = vrot.slane %v348_v33, 1  ;;  %v359_v46 = vrot.slane %v358_v26, 2  ;;  %v309_v48 = vrot.slane %v308_v35, 2 }
 0x124   :  { %v354_v47 = vadd.f32 %v353_v42, %v352_v21  ;;  %v314_v49 = vadd.f32 %v313_v36, %v793_v63  ;;  %v370_v50 = vadd.f32 %v369_v39, %v326_v28  ;;  %v294_v51 = vadd.f32 %v293_v38, %v292_v17 }
 0x125   :  { %400 = vrot.lane.b32.xlu0 %v288_v40, %s687_s0  ;;  %v299_v53 = vrot.slane %v298_v41, 1  ;;  %v304_v54 = vadd.f32 %v303_v34, %v302_v16  ;;  %v350_v57 = vadd.f32 %v349_v45, %v348_v33  ;;  %v360_v58 = vadd.f32 %v359_v46, %v358_v26 }
 0x126   :  { %405 = vrot.lane.b32.xlu1 %v344_v44, %s687_s0  ;;  %v355_v56 = vrot.slane %v354_v47, 1  ;;  %v365_v59 = vrot.slane %v364_v43, 2  ;;  %v315_v61 = vrot.slane %v314_v49, 2  ;;  %v310_v1 = vadd.f32 %v309_v48, %v308_v35 }
 0x127   :  { %v300_v62 = vadd.f32 %v299_v53, %v298_v41  ;;  %v305_v0 = vrot.slane %v304_v54, 1  ;;  %v361_v3 = vrot.slane %v360_v58, 1  ;;  %v371_v5 = vrot.slane %v370_v50, 2 }
 0x128   :  { %v356_v2 = vadd.f32 %v355_v56, %v354_v47  ;;  %v366_v4 = vadd.f32 %v365_v59, %v364_v43  ;;  %v311_v7 = vrot.slane %v310_v1, 1  ;;  %v316_v9 = vadd.f32 %v315_v61, %v314_v49 }
 0x129   :  { %412 = vrot.lane.b32.xlu0 %v294_v51, %s687_s0  ;;  %v306_v6 = vadd.f32 %v305_v0, %v304_v54  ;;  %v362_v10 = vadd.f32 %v361_v3, %v360_v58  ;;  %v372_v12 = vadd.f32 %v371_v5, %v370_v50 }
 0x12a   :  { %417 = vrot.lane.b32.xlu1 %v350_v57, %s687_s0  ;;  %v367_v11 = vrot.slane %v366_v4, 1  ;;  %v312_v14 = vadd.f32 %v311_v7, %v310_v1  ;;  %v317_v15 = vrot.slane %v316_v9, 1 }
 0x12b   :  { %v373_v17 = vrot.slane %v372_v12, 1 }
 0x12c   :  { %v368_v16 = vadd.f32 %v367_v11, %v366_v4  ;;  %v318_v20 = vadd.f32 %v317_v15, %v316_v9 }
 0x12d   :  { %424 = vrot.lane.b32.xlu0 %v300_v62, %s687_s0  ;;  %v374_v21 = vadd.f32 %v373_v17, %v372_v12 }
 0x12e   :  { %429 = vrot.lane.b32.xlu1 %v356_v2, %s687_s0 }
 0x131   :  { %436 = vrot.lane.b32.xlu0 %v306_v6, %s687_s0 }
 0x132   :  { %441 = vrot.lane.b32.xlu1 %v362_v10, %s687_s0 }
 0x135   :  { %448 = vrot.lane.b32.xlu0 %v312_v14, %s687_s0 }
 0x136   :  { %453 = vrot.lane.b32.xlu1 %v368_v16, %s687_s0 }
 0x139   :  { %460 = vrot.lane.b32.xlu0 %v318_v20, %s687_s0 }
 0x13a   :  { %465 = vrot.lane.b32.xlu1 %v374_v21, %s687_s0 }
 0x18f   :  { %v377_v23 = vpop.permute.xlu0 %376 }
 0x190   :  { %v379_v24 = vadd.f32 %v377_v23, %v799_v8  ;;  %v389_v26 = vpop.permute.xlu1 %388  ;;  %v474_v23 = vld [vmem:[#allocation4] sm:$0x1] }
 0x192   :  { %v385_v28 = vadd.f32 %v379_v24, %v801_v13 }
 0x193   :  { %v382_v29 = vpop.permute.xlu0 %381 }
 0x194   :  { %v391_v31 = vadd.f32 %v389_v26, %v385_v28  ;;  %v384_v32 = vadd.f32 %v382_v29, %v811_v27  ;;  %v394_v33 = vpop.permute.xlu1 %393 }
 0x196   :  { %v386_v34 = vadd.f32 %v384_v32, %v815_v30  ;;  %v397_v35 = vadd.f32 %v391_v31, %v288_v40 }
 0x197   :  { %v401_v36 = vpop.permute.xlu0 %400 }
 0x198   :  { %v396_v37 = vadd.f32 %v394_v33, %v386_v34  ;;  %v403_v38 = vadd.f32 %v401_v36, %v397_v35  ;;  %v406_v39 = vpop.permute.xlu1 %405 }
 0x19a   :  { %v398_v41 = vadd.f32 %v396_v37, %v344_v44  ;;  %v409_v42 = vadd.f32 %v403_v38, %v294_v51 }
 0x19b   :  { %v413_v43 = vpop.permute.xlu0 %412 }
 0x19c   :  { %v408_v45 = vadd.f32 %v406_v39, %v398_v41  ;;  %v415_v8 = vadd.f32 %v413_v43, %v409_v42  ;;  %v418_v46 = vpop.permute.xlu1 %417 }
 0x19e   :  { %v410_v47 = vadd.f32 %v408_v45, %v350_v57  ;;  %v421_v13 = vadd.f32 %v415_v8, %v300_v62 }
 0x19f   :  { %v425_v48 = vpop.permute.xlu0 %424 }
 0x1a0   :  { %v420_v49 = vadd.f32 %v418_v46, %v410_v47  ;;  %v427_v50 = vadd.f32 %v425_v48, %v421_v13  ;;  %v430_v27 = vpop.permute.xlu1 %429 }
 0x1a2   :  { %v422_v53 = vadd.f32 %v420_v49, %v356_v2  ;;  %v433_v54 = vadd.f32 %v427_v50, %v306_v6 }
 0x1a3   :  { %v437_v30 = vpop.permute.xlu0 %436 }
 0x1a4   :  { %v432_v40 = vadd.f32 %v430_v27, %v422_v53  ;;  %v439_v56 = vadd.f32 %v437_v30, %v433_v54  ;;  %v442_v58 = vpop.permute.xlu1 %441 }
 0x1a6   :  { %v434_v59 = vadd.f32 %v432_v40, %v362_v10  ;;  %v445_v61 = vadd.f32 %v439_v56, %v312_v14  ;;  %v482_v10 = vlaneseq }
 0x1a7   :  { %v449_v44 = vpop.permute.xlu0 %448 }
 0x1a8   :  { %v444_v51 = vadd.f32 %v442_v58, %v434_v59  ;;  %v451_v0 = vadd.f32 %v449_v44, %v445_v61  ;;  %v454_v1 = vpop.permute.xlu1 %453  ;;  %v483_v14 = vshrl.u32 %v482_v10, 7 }
 0x1aa   :  { %v446_v3 = vadd.f32 %v444_v51, %v368_v16  ;;  %v457_v4 = vadd.f32 %v451_v0, %v318_v20  ;;  %v484_v24 = vsub.s32 0, %v483_v14  ;;  %v478_v16 = vld [vmem:[#allocation6] sm:$0x1] }
 0x1ab   :  { %v461_v57 = vpop.permute.xlu0 %460 }
 0x1ac   :  { %v456_v62 = vadd.f32 %v454_v1, %v446_v3  ;;  %v463_v5 = vadd.f32 %v461_v57, %v457_v4  ;;  %v466_v11 = vpop.permute.xlu1 %465 }
 0x1ae   :  { %v470_v7 = vmul.f32 0.03125, %v463_v5  ;;  %v458_v9 = vadd.f32 %v456_v62, %v374_v21 }
 0x1b0   :  { %v468_v2 = vadd.f32 %v466_v11, %v458_v9  ;;  %v472_v6 = vmul.f32 %v470_v7, %v470_v7 }
 0x1b2   :  { %v471_v12 = vmul.f32 0.03125, %v468_v2 }
 0x1b4   :  { %v473_v15 = vsub.f32 %v471_v12, %v472_v6 }
 0x1b6   :  { %v475_v17 = vadd.f32 1e-05, %v473_v15 }
 0x1b8   :  { %611 = vrsqrt.f32 %v475_v17 }
 0x1c2   :  { %v612_v26 = vpop.eup %611 }
 0x1c3   :  { %v477_v28 = vmul.f32 %v612_v26, %v474_v23 }
 0x1c5   :  { %v485_v20 = vrot.slane %v477_v28, %v484_v24  ;;  %v479_v29 = vmul.f32 %v477_v28, %v470_v7 }
 0x1c7   :  { %486 = vrot.lane.b32.xlu0 %v485_v20, %s687_s0  ;;  %v480_v31 = vsub.f32 %v478_v16, %v479_v29 }
 0x1c9   :  { %v495_v21 = vrot.slane %v480_v31, %v484_v24 }
 0x1cb   :  { %496 = vrot.lane.b32.xlu1 %v495_v21, %s687_s0 }
 0x239   :  { %v487_v32 = vpop.permute.xlu0 %486 }
 0x23a   :  { %v490_v33 = vsel %vm489_vm2, %v477_v28, %v487_v32 }
 0x23b   :  { %v503_v34 = vrot.slane %v490_v33, %v484_v24 }
 0x23d   :  { %v497_v35 = vpop.permute.xlu1 %496  ;;  %v504_v36 = vmul.f32 %v503_v34, %v760_v18  ;;  %v505_v38 = vmul.f32 %v503_v34, %v767_v22  ;;  %v506_v39 = vmul.f32 %v503_v34, %v762_v19  ;;  %v507_v41 = vmul.f32 %v503_v34, %v772_v25 }
 0x23e   :  { %v499_v37 = vsel %vm489_vm2, %v480_v31, %v497_v35  ;;  %v508_v43 = vmul.f32 %v503_v34, %v784_v52  ;;  %v509_v45 = vmul.f32 %v503_v34, %v791_v60  ;;  %v510_v8 = vmul.f32 %v503_v34, %v786_v55 }
 0x23f   :  { %v515_v42 = vrot.slane %v499_v37, %v484_v24  ;;  %v511_v46 = vmul.f32 %v503_v34, %v793_v63 }
 0x241   :  { %v516_v47 = vadd.f32 %v515_v42, %v504_v36  ;;  %v517_v13 = vadd.f32 %v515_v42, %v505_v38  ;;  %v518_v48 = vadd.f32 %v515_v42, %v506_v39  ;;  %v519_v18 = vadd.f32 %v515_v42, %v507_v41 }
 0x242   :  { %v520_v49 = vadd.f32 %v515_v42, %v508_v43  ;;  %v521_v50 = vadd.f32 %v515_v42, %v509_v45  ;;  %v522_v22 = vadd.f32 %v515_v42, %v510_v8  ;;  %v523_v27 = vadd.f32 %v515_v42, %v511_v46 }
 0x243   :  { %v524_v19 = vmax.f32 %v516_v47, 0.0  ;;  %v525_v53 = vmax.f32 %v517_v13, 0.0  ;;  %v526_v25 = vmax.f32 %v518_v48, 0.0  ;;  %v527_v54 = vmax.f32 %v519_v18, 0.0 }
 0x244   :  { %v528_v30 = vmax.f32 %v520_v49, 0.0  ;;  %v529_v52 = vmax.f32 %v521_v50, 0.0  ;;  %v530_v40 = vmax.f32 %v522_v22, 0.0  ;;  %v531_v60 = vmax.f32 %v523_v27, 0.0 }
 0x245   :  { %v594_v56 = vpack.c.bf16 %v525_v53, %v524_v19  ;;  %v595_v55 = vpack.c.bf16 %v527_v54, %v526_v25 }
 0x246   :  { %v596_v58 = vpack.c.bf16 %v529_v52, %v528_v30  ;;  %v597_v63 = vpack.c.bf16 %v531_v60, %v530_v40 }
 0x247   :  { %564 = vst [vmem:[%s866_s4] sm:$0xff] %v594_v56  ;;  %565 = vst [vmem:[%s866_s4 + $0x8] sm:$0xff] %v595_v55 }
 0x248   :  { %566 = vst [vmem:[%s866_s4 + $0x10] sm:$0xff] %v596_v58  ;;  %567 = vst [vmem:[%s866_s4 + $0x18] sm:$0xff] %v597_v63 }
 0x249   :  { %572 = vsyncpa [#allocation3], 1 }
 0x24a   :  { %573 = vsyncpa [#allocation5], 1 }

// kernel: generator_forward.6
= control target key start
LH: loop header
LB: loop body
LE: loop exit
PB: predicated region body
PF: predicated region fallthrough
CT: control target
= control target key end

     0   :  { %9 = vsyncpa [#allocation3], 0  ;;  %s1124_s0 = inlined_call_operand.vmem [shape: bf16[32,576], index: 0, kind: input, shape index: {}]   ;;  %s1125_s1 = inlined_call_operand.hbm [shape: bf16[576,128], index: 1, kind: input, shape index: {}]   ;;  %s1126_s2 = inlined_call_operand.hbm [shape: f32[1,32], index: 2, kind: input, shape index: {}]   ;;  %s1127_s3 = inlined_call_operand.hbm [shape: f32[1,32], index: 3, kind: input, shape index: {}]   ;;  %s1128_s4 = inlined_call_operand.vmem [shape: bf16[32,128], index: 4, kind: output, shape index: {}]  }
   0x1   :  { %10 = vsyncpa [#allocation5], 0  ;;  %s971_s15 = smov [#allocation4]   ;;  %s972_s17 = smov [#allocation2]  }
   0x2   :  { %s31_s16 = sshll.u32 %s971_s15, 4  ;;  %s18_s18 = sshll.u32 %s972_s17, 4  ;;  %s32_s16 = int_to_ptr.vmem [resolvable:$true] %s31_s16  ;;  %s1003_s18 = int_to_ptr.vmem [resolvable:$true] %s18_s18 }
   0x3   :  { %s901_s21 = scalar_lea.hbm %s1126_s2, 16 }
   0x4   :  { %p902_p0 = scmp.ne.s32.totalorder %s1126_s2, %s901_s21  ;;  %p905_p1 = scmp.lt.u32.totalorder %s901_s21, %s1126_s2 }
   0x6   :  { %p907_p2 = pnand %p905_p1, %p902_p0 }
   0x8   :  { %910 = shalt.err (!%p907_p2)
}
   0x9   :  { %s911_s26 = scalar_lea.vmem %s32_s16, 16  ;;  %s915_s27 = scalar_lea.vmem %s32_s16, 32 }
   0xa   :  { %p912_p3 = scmp.ne.s32.totalorder %s32_s16, %s911_s26  ;;  %p916_p4 = scmp.lt.s32.totalorder %s32_s16, %s32_s16 }
   0xb   :  { %p917_p5 = scmp.lt.s32.totalorder %s915_s27, %s911_s26 }
   0xd   :  { %p918_p6 = por %p917_p5, %p916_p4 }
   0xf   :  { %p919_p7 = pnand %p918_p6, %p912_p3 }
  0x11   :  { %922 = shalt.err (!%p919_p7)
}
  0x12   :  { %34 = dma.hbm_to_vmem [thread:$0]  %s1126_s2, 16, %s32_s16, [#allocation5]  }
  0x13   :  { %s923_s6 = scalar_lea.hbm %s1125_s1, 4608 }
  0x14   :  { %p924_p8 = scmp.ne.s32.totalorder %s1125_s1, %s923_s6  ;;  %p927_p9 = scmp.lt.u32.totalorder %s923_s6, %s1125_s1 }
  0x16   :  { %p929_p10 = pnand %p927_p9, %p924_p8 }
  0x18   :  { %932 = shalt.err (!%p929_p10)
}
  0x19   :  { %s933_s11 = scalar_lea.vmem %s1003_s18, 4608  ;;  %p938_p12 = scmp.lt.s32.totalorder %s1003_s18, %s1003_s18 }
  0x1a   :  { %p934_p11 = scmp.ne.s32.totalorder %s1003_s18, %s933_s11  ;;  %p939_p13 = scmp.lt.s32.totalorder %s933_s11, %s933_s11 }
  0x1c   :  { %p940_p0 = por %p939_p13, %p938_p12 }
  0x1e   :  { %p941_p1 = pnand %p940_p0, %p934_p11 }
  0x20   :  { %944 = shalt.err (!%p941_p1)
}
  0x21   :  { %s973_s2 = smov 64   ;;  %s974_s12 = smov 4  }
  0x22   :  { %24 = dma.hbm_to_vmem [thread:$0]  %s1125_s1, 4608, %s1003_s18, [#allocation3], %s973_s2, %s973_s2, %s974_s12  }
  0x23   :  { %s975_s15 = smov [#allocation6]   ;;  %s945_s20 = scalar_lea.hbm %s1127_s3, 16 }
  0x24   :  { %s41_s16 = sshll.u32 %s975_s15, 4  ;;  %p946_p2 = scmp.ne.s32.totalorder %s1127_s3, %s945_s20  ;;  %s42_s16 = int_to_ptr.vmem [resolvable:$true] %s41_s16 }
  0x25   :  { %p949_p3 = scmp.lt.u32.totalorder %s945_s20, %s1127_s3 }
  0x27   :  { %p951_p4 = pnand %p949_p3, %p946_p2 }
  0x29   :  { %954 = shalt.err (!%p951_p4)
}
  0x2a   :  { %s955_s25 = scalar_lea.vmem %s42_s16, 16  ;;  %s959_s1 = scalar_lea.vmem %s42_s16, 32 }
  0x2b   :  { %p956_p5 = scmp.ne.s32.totalorder %s42_s16, %s955_s25  ;;  %p960_p6 = scmp.lt.s32.totalorder %s42_s16, %s42_s16 }
  0x2c   :  { %p961_p7 = scmp.lt.s32.totalorder %s959_s1, %s955_s25 }
  0x2e   :  { %p962_p8 = por %p961_p7, %p960_p6 }
  0x30   :  { %p963_p9 = pnand %p962_p8, %p956_p5 }
  0x32   :  { %966 = shalt.err (!%p963_p9)
}
  0x33   :  { %44 = dma.hbm_to_vmem [thread:$0]  %s1127_s3, 16, %s42_s16, [#allocation5]  }
  0x34   :  { %967 = dma.done.wait [#allocation3], 4608  }
  0x35   :  { %968 = vsyncadd [#allocation3], 4294962688 }
  0x36   :  { %969 = dma.done.wait [#allocation5], 32  }
  0x37   :  { %970 = vsyncadd [#allocation5], 4294967264  ;;  %v849_v0 = vld [vmem:[#allocation2 + $0x40] sm:$0xff]   ;;  %v853_v4 = vld [vmem:[#allocation2 + $0x48] sm:$0xff]   ;;  %vm405_vm0 = vcmask 523264   ;;  %s977_s21 = smov 32  }
  0x38   :  { %v850_v1 = vld [vmem:[#allocation2 + $0xc0] sm:$0xff]   ;;  %768 = vmatprep.subr.bf16.mxu0 %v849_v0  ;;  %v854_v5 = vld [vmem:[#allocation2 + $0xc8] sm:$0xff]   ;;  %v857_v8 = vld [vmem:[#allocation2 + $0x50] sm:$0xff]   ;;  %vm633_vm1 = vcmask 261120   ;;  %vm636_vm2 = vcmask 785408  }
  0x39   :  { %v851_v2 = vld [vmem:[#allocation2] sm:$0xff]   ;;  %796 = vmatprep.subr.bf16.mxu1 %v850_v1  ;;  %v855_v6 = vld [vmem:[#allocation2 + $0x8] sm:$0xff]   ;;  %v858_v9 = vld [vmem:[#allocation2 + $0xd0] sm:$0xff]  }
  0x3a   :  { %v852_v3 = vld [vmem:[#allocation2 + $0x80] sm:$0xff]   ;;  %769 = vmatpush3.bf16.msra.mxu0 %v851_v2  ;;  %v856_v7 = vld [vmem:[#allocation2 + $0x88] sm:$0xff]   ;;  %v859_v10 = vld [vmem:[#allocation2 + $0x10] sm:$0xff]  }
  0x3b   :  { %797 = vmatpush3.bf16.msra.mxu1 %v852_v3  ;;  %770 = vmatprep.subr.bf16.mxu0 %v853_v4  ;;  %v860_v11 = vld [vmem:[#allocation2 + $0x90] sm:$0xff]   ;;  %v861_v12 = vld [vmem:[#allocation2 + $0x58] sm:$0xff]   ;;  %v865_v16 = vld [vmem:[#allocation2 + $0x60] sm:$0xff]  }
  0x3c   :  { %798 = vmatprep.subr.bf16.mxu1 %v854_v5  ;;  %v862_v13 = vld [vmem:[#allocation2 + $0xd8] sm:$0xff]   ;;  %v866_v17 = vld [vmem:[#allocation2 + $0xe0] sm:$0xff]   ;;  %v869_v20 = vld [vmem:[#allocation2 + $0x68] sm:$0xff]  }
  0x3d   :  { %v863_v14 = vld [vmem:[#allocation2 + $0x18] sm:$0xff]   ;;  %v867_v18 = vld [vmem:[#allocation2 + $0x20] sm:$0xff]   ;;  %v870_v21 = vld [vmem:[#allocation2 + $0xe8] sm:$0xff]  }
  0x3e   :  { %771 = vmatpush3.bf16.msra.mxu0 %v855_v6  ;;  %v864_v15 = vld [vmem:[#allocation2 + $0x98] sm:$0xff]   ;;  %v868_v19 = vld [vmem:[#allocation2 + $0xa0] sm:$0xff]   ;;  %v871_v22 = vld [vmem:[#allocation2 + $0x28] sm:$0xff]  }
  0x3f   :  { %799 = vmatpush3.bf16.msra.mxu1 %v856_v7  ;;  %772 = vmatprep.subr.bf16.mxu0 %v857_v8  ;;  %v872_v23 = vld [vmem:[#allocation2 + $0xa8] sm:$0xff]   ;;  %v873_v24 = vld [vmem:[#allocation2 + $0x70] sm:$0xff]   ;;  %v877_v28 = vld [vmem:[#allocation2 + $0x78] sm:$0xff]  }
  0x40   :  { %800 = vmatprep.subr.bf16.mxu1 %v858_v9  ;;  %v874_v25 = vld [vmem:[#allocation2 + $0xf0] sm:$0xff]   ;;  %v878_v29 = vld [vmem:[#allocation2 + $0xf8] sm:$0xff]   ;;  %v886_v35 = vld [vmem:[%s1124_s0 + $0xc] ss:$20 sps:$4 sm:$0xff]  }
  0x41   :  { %v875_v26 = vld [vmem:[#allocation2 + $0x30] sm:$0xff]   ;;  %v879_v30 = vld [vmem:[#allocation2 + $0x38] sm:$0xff]   ;;  %v887_v36 = vld [vmem:[#allocation2 + $0x100] sm:$0xff]   ;;  %493 = vmatprep.mubr.bf16.mxu1 %v886_v35 }
  0x42   :  { %773 = vmatpush3.bf16.msra.mxu0 %v859_v10  ;;  %v876_v27 = vld [vmem:[#allocation2 + $0xb0] sm:$0xff]   ;;  %v880_v31 = vld [vmem:[#allocation2 + $0xb8] sm:$0xff]   ;;  %v888_v37 = vld [vmem:[#allocation2 + $0x108] sm:$0xff]  }
  0x43   :  { %801 = vmatpush3.bf16.msra.mxu1 %v860_v11  ;;  %774 = vmatprep.subr.bf16.mxu0 %v861_v12  ;;  %v881_v32 = vld [vmem:[%s1124_s0] ss:$20 sps:$4 sm:$0xff]   ;;  %v883_v33 = vld [vmem:[%s1124_s0 + $0x4] ss:$20 sps:$4 sm:$0xff]   ;;  %v884_v34 = vld [vmem:[%s1124_s0 + $0x8] ss:$20 sps:$4 sm:$0xff]  }
  0x44   :  { %802 = vmatprep.subr.bf16.mxu1 %v862_v13  ;;  %444 = vmatprep.mubr.bf16.mxu0 %v883_v33  ;;  %v889_v38 = vld [vmem:[%s1124_s0 + $0x2c] ss:$20 sps:$4 sm:$0xff]   ;;  %v891_v39 = vld [vmem:[%s1124_s0 + $0x34] ss:$20 sps:$4 sm:$0xff]   ;;  %v894_v42 = vld [vmem:[%s1124_s0 + $0x30] ss:$20 sps:$4 sm:$0xff]  }
  0x45   :  { %v893_v40 = vld [vmem:[%s1124_s0 + $0x28] ss:$20 sps:$4 sm:$0xff]   ;;  %v895_v41 = vld [vmem:[#allocation2 + $0x110] sm:$0xff]   ;;  %v898_v45 = vld [vmem:[%s1124_s0 + $0x38] ss:$20 sps:$4 sm:$0xff]  }
  0x46   :  { %775 = vmatpush3.bf16.msra.mxu0 %v863_v14  ;;  %v897_v43 = vld [vmem:[%s1124_s0 + $0x10] ss:$20 sps:$4 sm:$0xff]   ;;  %v896_v44 = vld [vmem:[#allocation2 + $0x118] sm:$0xff]   ;;  %s976_s0 = smov 96  }
  0x47   :  { %803 = vmatpush3.bf16.msra.mxu1 %v864_v15  ;;  %776 = vmatprep.subr.bf16.mxu0 %v865_v16 }
  0x48   :  { %804 = vmatprep.subr.bf16.mxu1 %v866_v17 }
  0x4a   :  { %777 = vmatpush3.bf16.msra.mxu0 %v867_v18 }
  0x4b   :  { %805 = vmatpush3.bf16.msra.mxu1 %v868_v19  ;;  %778 = vmatprep.subr.bf16.mxu0 %v869_v20 }
  0x4c   :  { %806 = vmatprep.subr.bf16.mxu1 %v870_v21 }
  0x4e   :  { %779 = vmatpush3.bf16.msra.mxu0 %v871_v22 }
  0x4f   :  { %807 = vmatpush3.bf16.msra.mxu1 %v872_v23  ;;  %780 = vmatprep.subr.bf16.mxu0 %v873_v24 }
  0x50   :  { %808 = vmatprep.subr.bf16.mxu1 %v874_v25 }
  0x52   :  { %781 = vmatpush3.bf16.msra.mxu0 %v875_v26 }
  0x53   :  { %809 = vmatpush3.bf16.msra.mxu1 %v876_v27  ;;  %782 = vmatprep.subr.bf16.mxu0 %v877_v28 }
  0x54   :  { %810 = vmatprep.subr.bf16.mxu1 %v878_v29 }
  0x56   :  { %783 = vmatpush3.bf16.msra.mxu0 %v879_v30 }
  0x57   :  { %811 = vmatpush3.bf16.msra.mxu1 %v880_v31  ;;  %830 = vmatprep.subr.bf16.mxu0 %v887_v36 }
  0x59   :  { %445 = vmatmul.mubr.bf16.vlgmr.msra.gmra.mrb[0].mxu0 %v881_v32 }
  0x5a   :  { %494 = vmatmul.mubr.bf16.vlgmr.msra.gmra.mrb[0].mxu1 %v884_v34  ;;  %831 = vmatpush3.bf16.msra.mxu0 %v887_v36 }
  0x5b   :  { %832 = vmatprep.subr.bf16.mxu0 %v888_v37  ;;  %452 = vmatprep.mubr.bf16.mxu0 %v889_v38 }
  0x5c   :  { %501 = vmatprep.mubr.bf16.mxu1 %v891_v39 }
  0x5e   :  { %833 = vmatpush3.bf16.msra.mxu0 %v888_v37 }
  0x5f   :  { %834 = vmatprep.subr.bf16.mxu0 %v895_v41 }
  0x61   :  { %453 = vmatmul.mubr.bf16.gmra.mrb[4].mxu0 %v893_v40 }
  0x62   :  { %502 = vmatmul.mubr.bf16.gmra.mrb[4].mxu1 %v894_v42  ;;  %838 = vmatprep.mubr.msk.bf16.mxu0 %vm405_vm0, %v897_v43 }
  0x63   :  { %835 = vmatpush3.bf16.msra.mxu0 %v895_v41 }
  0x64   :  { %836 = vmatprep.subr.bf16.mxu0 %v896_v44 }
  0x67   :  { %837 = vmatpush3.bf16.msra.mxu0 %v896_v44 }
  0x6a   :  { %839 = vmatmul.mubr.msk.bf16.vlgmr.msra.gmra.mrb[8].mxu0 %vm405_vm0, %v898_v45 }
 0x12c   :  { %v784_v46 = vpop.f32.mrb[0].mxu0 }
 0x12d   :  { %v812_v47 = vpop.f32.mrb[0].mxu1  ;;  %v785_v48 = vpop.f32.mrb[1].mxu0 }
 0x12e   :  { %v786_v49 = vadd.f32 %v785_v48, %v784_v46  ;;  %v813_v50 = vpop.f32.mrb[1].mxu1  ;;  %v787_v51 = vpop.f32.mrb[2].mxu0 }
 0x12f   :  { %v814_v52 = vadd.f32 %v813_v50, %v812_v47  ;;  %v815_v53 = vpop.f32.mrb[2].mxu1  ;;  %v788_v54 = vpop.f32.mrb[3].mxu0 }
 0x130   :  { %v789_v55 = vadd.f32 %v788_v54, %v787_v51  ;;  %v816_v56 = vpop.f32.mrb[3].mxu1 }
 0x131   :  { %v817_v57 = vadd.f32 %v816_v56, %v815_v53  ;;  %v496_v58 = vadd.f32 %v814_v52, %v786_v49 }
 0x133   :  { %v499_v59 = vadd.f32 %v817_v57, %v789_v55  ;;  %v620_v57 = vlaneseq }
 0x134   :  { %v790_v60 = vpop.f32.mrb[4].mxu0 }
 0x135   :  { %v818_v61 = vpop.f32.mrb[4].mxu1  ;;  %v791_v62 = vpop.f32.mrb[5].mxu0 }
 0x136   :  { %v792_v63 = vadd.f32 %v791_v62, %v790_v60  ;;  %v819_v0 = vpop.f32.mrb[5].mxu1  ;;  %v793_v1 = vpop.f32.mrb[6].mxu0 }
 0x137   :  { %v820_v2 = vadd.f32 %v819_v0, %v818_v61  ;;  %v821_v3 = vpop.f32.mrb[6].mxu1  ;;  %v794_v4 = vpop.f32.mrb[7].mxu0 }
 0x138   :  { %v795_v5 = vadd.f32 %v794_v4, %v793_v1  ;;  %v822_v6 = vpop.f32.mrb[7].mxu1 }
 0x139   :  { %v823_v7 = vadd.f32 %v822_v6, %v821_v3  ;;  %v504_v8 = vadd.f32 %v820_v2, %v792_v63  ;;  %v616_v63 = vld [vmem:[#allocation6] sm:$0x1] }
 0x13b   :  { %v507_v9 = vadd.f32 %v823_v7, %v795_v5 }
 0x13d   :  { %v840_v10 = vpop.f32.mrb[8].mxu0 }
 0x13e   :  { %v1080_v11 = vadd.f32 %v840_v10, %v504_v8  ;;  %v544_v12 = vpop.f32.mrb[9].mxu0 }
 0x13f   :  { %v1082_v13 = vadd.f32 %v544_v12, %v496_v58  ;;  %v841_v14 = vpop.f32.mrb[10].mxu0  ;;  %v621_v58 = vshrl.u32 %v620_v57, 7 }
 0x140   :  { %v1084_v15 = vadd.f32 %v841_v14, %v507_v9  ;;  %v547_v16 = vpop.f32.mrb[11].mxu0  ;;  %v570_v21 = vmul.f32 %v1080_v11, %v1080_v11 }
 0x141   :  { %v1086_v17 = vadd.f32 %v547_v16, %v499_v59  ;;  %v568_v18 = vmul.f32 %v1082_v13, %v1082_v13  ;;  %v612_v59 = vld [vmem:[#allocation4] sm:$0x1]  ;;  %v622_v60 = vsub.s32 0, %v621_v58 }
 0x142   :  { %v571_v24 = vmul.f32 %v1084_v15, %v1084_v15 }
 0x143   :  { %v559_v19 = vadd.f32 %v1086_v17, %v1082_v13  ;;  %v569_v20 = vmul.f32 %v1086_v17, %v1086_v17 }
 0x145   :  { %v560_v22 = vadd.f32 %v559_v19, %v1080_v11  ;;  %v572_v23 = vadd.f32 %v569_v20, %v568_v18 }
 0x147   :  { %v561_v25 = vadd.f32 %v560_v22, %v1084_v15  ;;  %v573_v26 = vadd.f32 %v572_v23, %v570_v21 }
 0x149   :  { %v562_v27 = vrot.slane %v561_v25, 4  ;;  %v574_v28 = vadd.f32 %v573_v26, %v571_v24 }
 0x14b   :  { %v563_v29 = vadd.f32 %v562_v27, %v561_v25  ;;  %v575_v30 = vrot.slane %v574_v28, 4 }
 0x14d   :  { %v564_v31 = vrot.slane %v563_v29, 2  ;;  %v576_v32 = vadd.f32 %v575_v30, %v574_v28 }
 0x14f   :  { %v565_v33 = vadd.f32 %v564_v31, %v563_v29  ;;  %v577_v34 = vrot.slane %v576_v32, 2 }
 0x151   :  { %v566_v35 = vrot.slane %v565_v33, 1  ;;  %v578_v36 = vadd.f32 %v577_v34, %v576_v32 }
 0x153   :  { %v567_v37 = vadd.f32 %v566_v35, %v565_v33  ;;  %v579_v38 = vrot.slane %v578_v36, 1 }
 0x155   :  { %591 = vrot.lane.b32.xlu1 %v567_v37, %s973_s2  ;;  %582 = vrot.lane.b32.xlu0 %v567_v37, %s976_s0  ;;  %v580_v39 = vadd.f32 %v579_v38, %v578_v36 }
 0x159   :  { %595 = vrot.lane.b32.xlu1 %v580_v39, %s973_s2  ;;  %587 = vrot.lane.b32.xlu0 %v580_v39, %s976_s0 }
 0x15d   :  { %603 = vrot.lane.b32.xlu1 %v580_v39, %s977_s21  ;;  %599 = vrot.lane.b32.xlu0 %v567_v37, %s977_s21 }
 0x1c7   :  { %v592_v40 = vpop.permute.xlu1 %591  ;;  %v583_v41 = vpop.permute.xlu0 %582 }
 0x1c8   :  { %v585_v42 = vadd.f32 %v583_v41, %v567_v37 }
 0x1ca   :  { %v594_v47 = vadd.f32 %v592_v40, %v585_v42 }
 0x1cb   :  { %v596_v43 = vpop.permute.xlu1 %595  ;;  %v588_v44 = vpop.permute.xlu0 %587 }
 0x1cc   :  { %v590_v45 = vadd.f32 %v588_v44, %v580_v39 }
 0x1ce   :  { %v598_v46 = vadd.f32 %v596_v43, %v590_v45 }
 0x1cf   :  { %v604_v48 = vpop.permute.xlu1 %603  ;;  %v600_v49 = vpop.permute.xlu0 %599 }
 0x1d0   :  { %v606_v50 = vadd.f32 %v604_v48, %v598_v46  ;;  %v602_v51 = vadd.f32 %v600_v49, %v594_v47 }
 0x1d2   :  { %v608_v52 = vmul.f32 0.0078125, %v602_v51  ;;  %v609_v53 = vmul.f32 0.0078125, %v606_v50 }
 0x1d4   :  { %v610_v54 = vmul.f32 %v608_v52, %v608_v52 }
 0x1d6   :  { %v611_v55 = vsub.f32 %v609_v53, %v610_v54 }
 0x1d8   :  { %v613_v56 = vadd.f32 1e-05, %v611_v55 }
 0x1da   :  { %899 = vrsqrt.f32 %v613_v56 }
 0x1e4   :  { %v900_v61 = vpop.eup %899 }
 0x1e5   :  { %v615_v62 = vmul.f32 %v900_v61, %v612_v59 }
 0x1e7   :  { %v617_v0 = vmul.f32 %v615_v62, %v608_v52  ;;  %v623_v1 = vrot.slane %v615_v62, %v622_v60 }
 0x1e9   :  { %v618_v2 = vsub.f32 %v616_v63, %v617_v0  ;;  %627 = vrot.lane.b32.xlu1 %v623_v1, %s973_s2  ;;  %624 = vrot.lane.b32.xlu0 %v623_v1, %s977_s21 }
 0x1eb   :  { %v642_v3 = vrot.slane %v618_v2, %v622_v60 }
 0x1ed   :  { %630 = vrot.lane.b32.xlu0 %v623_v1, %s976_s0  ;;  %643 = vrot.lane.b32.xlu1 %v642_v3, %s977_s21 }
 0x1f1   :  { %646 = vrot.lane.b32.xlu0 %v642_v3, %s973_s2  ;;  %649 = vrot.lane.b32.xlu1 %v642_v3, %s976_s0 }
 0x25b   :  { %v628_v4 = vpop.permute.xlu1 %627  ;;  %v625_v5 = vpop.permute.xlu0 %624 }
 0x25c   :  { %v634_v6 = vsel %vm633_vm1, %v615_v62, %v625_v5 }
 0x25d   :  { %v635_v7 = vsel %vm405_vm0, %v634_v6, %v628_v4 }
 0x25f   :  { %v631_v8 = vpop.permute.xlu0 %630  ;;  %v644_v9 = vpop.permute.xlu1 %643 }
 0x260   :  { %v637_v10 = vsel %vm636_vm2, %v635_v7, %v631_v8  ;;  %v652_v14 = vsel %vm633_vm1, %v618_v2, %v644_v9 }
 0x261   :  { %v658_v12 = vrot.slane %v637_v10, %v622_v60 }
 0x263   :  { %v647_v16 = vpop.permute.xlu0 %646  ;;  %v650_v18 = vpop.permute.xlu1 %649  ;;  %v659_v20 = vmul.f32 %v658_v12, %v1082_v13  ;;  %v660_v22 = vmul.f32 %v658_v12, %v1086_v17  ;;  %v661_v23 = vmul.f32 %v658_v12, %v1080_v11  ;;  %v662_v24 = vmul.f32 %v658_v12, %v1084_v15 }
 0x264   :  { %v653_v19 = vsel %vm405_vm0, %v652_v14, %v647_v16 }
 0x265   :  { %v654_v21 = vsel %vm636_vm2, %v653_v19, %v650_v18 }
 0x266   :  { %v666_v25 = vrot.slane %v654_v21, %v622_v60 }
 0x268   :  { %v667_v26 = vadd.f32 %v666_v25, %v659_v20  ;;  %v668_v27 = vadd.f32 %v666_v25, %v660_v22  ;;  %v669_v28 = vadd.f32 %v666_v25, %v661_v23  ;;  %v670_v29 = vadd.f32 %v666_v25, %v662_v24 }
 0x26a   :  { %v671_v30 = vmax.f32 %v667_v26, 0.0  ;;  %v672_v31 = vmax.f32 %v668_v27, 0.0  ;;  %v673_v32 = vmax.f32 %v669_v28, 0.0  ;;  %v674_v33 = vmax.f32 %v670_v29, 0.0 }
 0x26c   :  { %v760_v34 = vpack.c.bf16 %v672_v31, %v671_v30  ;;  %v765_v35 = vpack.c.bf16 %v674_v33, %v673_v32 }
 0x26e   :  { %761 = vst [vmem:[%s1128_s4] sm:$0xff] %v760_v34   ;;  %767 = vst [vmem:[%s1128_s4 + $0x8] sm:$0xff] %v765_v35  }
 0x26f   :  { %699 = vsyncpa [#allocation3], 1 }
 0x270   :  { %700 = vsyncpa [#allocation5], 1 }

// kernel: generator_forward.7
= control target key start
LH: loop header
LB: loop body
LE: loop exit
PB: predicated region body
PF: predicated region fallthrough
CT: control target
= control target key end

     0   :  { %vm314_vm0 = vcmask 261120   ;;  %vm533_vm1 = vcmask 523264   ;;  %s1090_s19 = smov 112   ;;  %s1091_s20 = smov 80   ;;  %vm676_vm2 = vcmask 130048   ;;  %vm679_vm3 = vcmask 392192   ;;  %s1468_s1 = inlined_call_operand.vmem [shape: bf16[288,64], index: 1, kind: input, shape index: {}]   ;;  %s1469_s0 = inlined_call_operand.vmem [shape: bf16[128,288], index: 0, kind: input, shape index: {}]   ;;  %s1470_s2 = inlined_call_operand.vmem [shape: f32[1,16], index: 2, kind: input, shape index: {}]   ;;  %s1471_s3 = inlined_call_operand.vmem [shape: f32[1,16], index: 3, kind: input, shape index: {}]   ;;  %s1472_s4 = inlined_call_operand.vmem [shape: bf16[128,64], index: 4, kind: output, shape index: {}]  }
   0x1   :  { %v1037_v0 = vld [vmem:[%s1468_s1 + $0x40] sm:$0xff]   ;;  %v1039_v2 = vld [vmem:[%s1468_s1 + $0x48] sm:$0xff]   ;;  %v1041_v4 = vld [vmem:[%s1468_s1 + $0x50] sm:$0xff]   ;;  %s1092_s25 = smov 32   ;;  %s1093_s26 = smov 16   ;;  %vm818_vm4 = vcmask 519168  }
   0x2   :  { %v1038_v1 = vld [vmem:[%s1468_s1] sm:$0xff]   ;;  %921 = vmatprep.subr.bf16.mxu0 %v1037_v0  ;;  %1015 = vmatprep.subr.bf16.mxu1 %v1037_v0  ;;  %v1040_v3 = vld [vmem:[%s1468_s1 + $0x8] sm:$0xff]   ;;  %v1042_v5 = vld [vmem:[%s1468_s1 + $0x10] sm:$0xff]   ;;  %s1094_s27 = smov 48  }
   0x3   :  { %922 = vmatpush3.bf16.msra.mxu0 %v1038_v1  ;;  %1023 = vmatpush3.bf16.msra.mxu1 %v1038_v1  ;;  %v1043_v6 = vld [vmem:[%s1468_s1 + $0x58] sm:$0xff]   ;;  %v1045_v8 = vld [vmem:[%s1468_s1 + $0x60] sm:$0xff]   ;;  %v1047_v10 = vld [vmem:[%s1468_s1 + $0x68] sm:$0xff]  }
   0x4   :  { %923 = vmatprep.subr.bf16.mxu0 %v1039_v2  ;;  %1016 = vmatprep.subr.bf16.mxu1 %v1039_v2  ;;  %v1044_v7 = vld [vmem:[%s1468_s1 + $0x18] sm:$0xff]   ;;  %v1046_v9 = vld [vmem:[%s1468_s1 + $0x20] sm:$0xff]   ;;  %v1048_v13 = vld [vmem:[%s1468_s1 + $0x28] sm:$0xff]  }
   0x5   :  { %v1055_v11 = vld [vmem:[%s1469_s0 + $0x4] ss:$12 sps:$4 sm:$0xff]   ;;  %v1058_v12 = vld [vmem:[%s1469_s0 + $0x94] ss:$12 sps:$4 sm:$0xff]   ;;  %v1051_v16 = vld [vmem:[%s1468_s1 + $0x78] sm:$0xff]  }
   0x6   :  { %v1049_v14 = vld [vmem:[%s1468_s1 + $0x70] sm:$0xff]   ;;  %371 = vmatprep.mubr.bf16.mxu0 %v1055_v11  ;;  %419 = vmatprep.mubr.bf16.mxu1 %v1058_v12  ;;  %v1052_v17 = vld [vmem:[%s1468_s1 + $0x38] sm:$0xff]   ;;  %v1053_v18 = vld [vmem:[%s1469_s0] ss:$12 sps:$4 sm:$0xff]  }
   0x7   :  { %924 = vmatpush3.bf16.msra.mxu0 %v1040_v3  ;;  %1024 = vmatpush3.bf16.msra.mxu1 %v1040_v3  ;;  %v1050_v15 = vld [vmem:[%s1468_s1 + $0x30] sm:$0xff]   ;;  %v1059_v19 = vld [vmem:[%s1468_s1 + $0x80] sm:$0xff]   ;;  %v1060_v21 = vld [vmem:[%s1469_s0 + $0x1c] ss:$12 sps:$4 sm:$0xff]  }
   0x8   :  { %925 = vmatprep.subr.bf16.mxu0 %v1041_v4  ;;  %1017 = vmatprep.subr.bf16.mxu1 %v1041_v4  ;;  %v1056_v20 = vld [vmem:[%s1469_s0 + $0x90] ss:$12 sps:$4 sm:$0xff]   ;;  %v1062_v22 = vld [vmem:[%s1469_s0 + $0xac] ss:$12 sps:$4 sm:$0xff]   ;;  %v1065_v25 = vld [vmem:[%s1469_s0 + $0xa8] ss:$12 sps:$4 sm:$0xff]  }
   0x9   :  { %v1066_v23 = vld [vmem:[%s1468_s1 + $0x88] sm:$0xff]   ;;  %v1064_v24 = vld [vmem:[%s1469_s0 + $0x18] ss:$12 sps:$4 sm:$0xff]   ;;  %v1067_v26 = vld [vmem:[%s1469_s0 + $0x34] ss:$12 sps:$4 sm:$0xff]  }
   0xa   :  { %v1069_v27 = vld [vmem:[%s1469_s0 + $0x8] ss:$12 sps:$4 sm:$0xff]   ;;  %v1070_v28 = vld [vmem:[%s1469_s0 + $0x30] ss:$12 sps:$4 sm:$0xff]   ;;  %v1071_v29 = vld [vmem:[%s1469_s0 + $0x20] ss:$12 sps:$4 sm:$0xff]  }
   0xb   :  { %926 = vmatpush3.bf16.msra.mxu0 %v1042_v5  ;;  %1025 = vmatpush3.bf16.msra.mxu1 %v1042_v5  ;;  %v1072_v30 = vld [vmem:[%s1469_s0 + $0x4c] ss:$12 sps:$4 sm:$0xff]   ;;  %v1075_v32 = vld [vmem:[%s1469_s0 + $0x48] ss:$12 sps:$4 sm:$0xff]   ;;  %v1076_v33 = vld [vmem:[%s1469_s0 + $0x50] ss:$12 sps:$4 sm:$0xff]  }
   0xc   :  { %927 = vmatprep.subr.bf16.mxu0 %v1043_v6  ;;  %1018 = vmatprep.subr.bf16.mxu1 %v1043_v6  ;;  %v1074_v31 = vld [vmem:[%s1469_s0 + $0x38] ss:$12 sps:$4 sm:$0xff]   ;;  %v1079_v35 = vld [vmem:[%s1469_s0 + $0x68] ss:$12 sps:$4 sm:$0xff]   ;;  %v1080_v36 = vld [vmem:[%s1469_s0 + $0x60] ss:$12 sps:$4 sm:$0xff]  }
   0xd   :  { %v1077_v34 = vld [vmem:[%s1469_s0 + $0x64] ss:$12 sps:$4 sm:$0xff]   ;;  %v1081_v37 = vld [vmem:[%s1469_s0 + $0x80] ss:$12 sps:$4 sm:$0xff]   ;;  %v1082_v38 = vld [vmem:[%s1469_s0 + $0x7c] ss:$12 sps:$4 sm:$0xff]  }
   0xe   :  { %v1084_v39 = vld [vmem:[%s1469_s0 + $0x98] ss:$12 sps:$4 sm:$0xff]   ;;  %v1086_v41 = vld [vmem:[%s1469_s0 + $0xb0] ss:$12 sps:$4 sm:$0xff]  }
   0xf   :  { %928 = vmatpush3.bf16.msra.mxu0 %v1044_v7  ;;  %1026 = vmatpush3.bf16.msra.mxu1 %v1044_v7  ;;  %v1085_v40 = vld [vmem:[%s1469_s0 + $0x78] ss:$12 sps:$4 sm:$0xff]   ;;  %s1089_s0 = smov 96  }
  0x10   :  { %929 = vmatprep.subr.bf16.mxu0 %v1045_v8  ;;  %1019 = vmatprep.subr.bf16.mxu1 %v1045_v8 }
  0x13   :  { %930 = vmatpush3.bf16.msra.mxu0 %v1046_v9  ;;  %1027 = vmatpush3.bf16.msra.mxu1 %v1046_v9 }
  0x14   :  { %931 = vmatprep.subr.bf16.mxu0 %v1047_v10  ;;  %1020 = vmatprep.subr.bf16.mxu1 %v1047_v10 }
  0x17   :  { %932 = vmatpush3.bf16.msra.mxu0 %v1048_v13  ;;  %1028 = vmatpush3.bf16.msra.mxu1 %v1048_v13 }
  0x18   :  { %933 = vmatprep.subr.bf16.mxu0 %v1049_v14  ;;  %1021 = vmatprep.subr.bf16.mxu1 %v1049_v14 }
  0x1b   :  { %934 = vmatpush3.bf16.msra.mxu0 %v1050_v15  ;;  %1029 = vmatpush3.bf16.msra.mxu1 %v1050_v15 }
  0x1c   :  { %935 = vmatprep.subr.bf16.mxu0 %v1051_v16  ;;  %1022 = vmatprep.subr.bf16.mxu1 %v1051_v16 }
  0x1f   :  { %936 = vmatpush3.bf16.msra.mxu0 %v1052_v17  ;;  %1030 = vmatpush3.bf16.msra.mxu1 %v1052_v17 }
  0x20   :  { %995 = vmatprep.subr.bf16.mxu1 %v1059_v19 }
  0x22   :  { %372 = vmatmul.mubr.bf16.vlgmr.msra.gmra.mrb[0].mxu0 %v1053_v18  ;;  %420 = vmatmul.mubr.bf16.vlgmr.msra.gmra.mrb[0].mxu1 %v1056_v20 }
  0x23   :  { %996 = vmatpush3.bf16.msra.mxu1 %v1059_v19  ;;  %379 = vmatprep.mubr.bf16.mxu0 %v1060_v21 }
  0x24   :  { %427 = vmatprep.mubr.bf16.mxu1 %v1062_v22  ;;  %997 = vmatprep.subr.bf16.mxu1 %v1066_v23 }
  0x27   :  { %998 = vmatpush3.bf16.msra.mxu1 %v1066_v23 }
  0x2a   :  { %380 = vmatmul.mubr.bf16.gmra.mrb[4].mxu0 %v1064_v24  ;;  %428 = vmatmul.mubr.bf16.gmra.mrb[4].mxu1 %v1065_v25 }
  0x2b   :  { %387 = vmatprep.mubr.bf16.mxu0 %v1067_v26  ;;  %999 = vmatprep.mubr.msk.bf16.mxu1 %vm314_vm0, %v1069_v27 }
  0x32   :  { %388 = vmatmul.mubr.bf16.gmra.mrb[8].mxu0 %v1070_v28  ;;  %1000 = vmatmul.mubr.msk.bf16.vlgmr.msra.gmra.mrb[8].mxu1 %vm314_vm0, %v1071_v29 }
  0x33   :  { %395 = vmatprep.mubr.bf16.mxu0 %v1072_v30  ;;  %1003 = vmatprep.mubr.msk.bf16.mxu1 %vm314_vm0, %v1074_v31 }
  0x3a   :  { %396 = vmatmul.mubr.bf16.gmra.mrb[12].mxu0 %v1075_v32  ;;  %1004 = vmatmul.mubr.msk.bf16.gmra.mrb[12].mxu1 %vm314_vm0, %v1076_v33 }
  0x3b   :  { %403 = vmatprep.mubr.bf16.mxu0 %v1077_v34  ;;  %1007 = vmatprep.mubr.msk.bf16.mxu1 %vm314_vm0, %v1079_v35 }
  0x42   :  { %404 = vmatmul.mubr.bf16.gmra.mrb[16].mxu0 %v1080_v36  ;;  %1008 = vmatmul.mubr.msk.bf16.gmra.mrb[16].mxu1 %vm314_vm0, %v1081_v37 }
  0x43   :  { %411 = vmatprep.mubr.bf16.mxu0 %v1082_v38  ;;  %1011 = vmatprep.mubr.msk.bf16.mxu1 %vm314_vm0, %v1084_v39 }
  0x4a   :  { %412 = vmatmul.mubr.bf16.gmra.mrb[20].mxu0 %v1085_v40  ;;  %1012 = vmatmul.mubr.msk.bf16.gmra.mrb[20].mxu1 %vm314_vm0, %v1086_v41 }
  0xf5   :  { %v937_v42 = vpop.f32.mrb[0].mxu0  ;;  %v973_v43 = vpop.f32.mrb[0].mxu1 }
  0xf6   :  { %v938_v44 = vpop.f32.mrb[1].mxu0  ;;  %v974_v45 = vpop.f32.mrb[1].mxu1 }
  0xf7   :  { %v939_v46 = vadd.f32 %v938_v44, %v937_v42  ;;  %v940_v47 = vpop.f32.mrb[2].mxu0  ;;  %v1254_v48 = vadd.f32 %v974_v45, %v973_v43  ;;  %v976_v49 = vpop.f32.mrb[2].mxu1 }
  0xf8   :  { %v941_v50 = vpop.f32.mrb[3].mxu0  ;;  %v977_v51 = vpop.f32.mrb[3].mxu1 }
  0xf9   :  { %v942_v52 = vadd.f32 %v941_v50, %v940_v47  ;;  %v1256_v53 = vadd.f32 %v977_v51, %v976_v49 }
  0xfd   :  { %v943_v54 = vpop.f32.mrb[4].mxu0  ;;  %v979_v55 = vpop.f32.mrb[4].mxu1 }
  0xfe   :  { %v944_v56 = vpop.f32.mrb[5].mxu0  ;;  %v980_v57 = vpop.f32.mrb[5].mxu1 }
  0xff   :  { %v945_v58 = vadd.f32 %v944_v56, %v943_v54  ;;  %v946_v59 = vpop.f32.mrb[6].mxu0  ;;  %v1258_v60 = vadd.f32 %v980_v57, %v979_v55  ;;  %v982_v61 = vpop.f32.mrb[6].mxu1 }
 0x100   :  { %v947_v62 = vpop.f32.mrb[7].mxu0  ;;  %v983_v63 = vpop.f32.mrb[7].mxu1 }
 0x101   :  { %v948_v0 = vadd.f32 %v947_v62, %v946_v59  ;;  %v1260_v1 = vadd.f32 %v983_v63, %v982_v61 }
 0x105   :  { %v949_v2 = vpop.f32.mrb[8].mxu0  ;;  %v1001_v3 = vpop.f32.mrb[8].mxu1 }
 0x106   :  { %v1262_v4 = vadd.f32 %v1001_v3, %v945_v58  ;;  %v950_v5 = vpop.f32.mrb[9].mxu0  ;;  %v470_v6 = vpop.f32.mrb[9].mxu1 }
 0x107   :  { %v951_v7 = vadd.f32 %v950_v5, %v949_v2  ;;  %v1264_v8 = vadd.f32 %v939_v46, %v470_v6  ;;  %v952_v9 = vpop.f32.mrb[10].mxu0  ;;  %v1002_v10 = vpop.f32.mrb[10].mxu1 }
 0x108   :  { %v1266_v11 = vadd.f32 %v1002_v10, %v948_v0  ;;  %v953_v12 = vpop.f32.mrb[11].mxu0  ;;  %v473_v13 = vpop.f32.mrb[11].mxu1  ;;  %v573_v17 = vmul.f32 %v1262_v4, %v1262_v4  ;;  %v537_v23 = vsel %vm533_vm1, %v1262_v4, 0.0 }
 0x109   :  { %v571_v14 = vmul.f32 %v1264_v8, %v1264_v8  ;;  %v954_v15 = vadd.f32 %v953_v12, %v952_v9  ;;  %v1270_v16 = vadd.f32 %v942_v52, %v473_v13  ;;  %v534_v18 = vsel %vm533_vm1, %v1264_v8, 0.0 }
 0x10a   :  { %v574_v21 = vmul.f32 %v1266_v11, %v1266_v11  ;;  %v590_v32 = vsel %vm533_vm1, %v573_v17, 0.0  ;;  %v539_v33 = vsel %vm533_vm1, %v1266_v11, 0.0 }
 0x10b   :  { %v535_v19 = vsel %vm533_vm1, %v1270_v16, 0.0  ;;  %v572_v20 = vmul.f32 %v1270_v16, %v1270_v16  ;;  %v587_v24 = vsel %vm533_vm1, %v571_v14, 0.0 }
 0x10c   :  { %v536_v22 = vadd.f32 %v535_v19, %v534_v18  ;;  %v592_v38 = vsel %vm533_vm1, %v574_v21, 0.0 }
 0x10d   :  { %v588_v25 = vsel %vm533_vm1, %v572_v20, 0.0  ;;  %v955_v26 = vpop.f32.mrb[12].mxu0  ;;  %v1005_v27 = vpop.f32.mrb[12].mxu1 }
 0x10e   :  { %v538_v28 = vadd.f32 %v537_v23, %v536_v22  ;;  %v589_v29 = vadd.f32 %v588_v25, %v587_v24  ;;  %v956_v30 = vpop.f32.mrb[13].mxu0  ;;  %v486_v31 = vpop.f32.mrb[13].mxu1 }
 0x10f   :  { %v957_v34 = vadd.f32 %v956_v30, %v955_v26  ;;  %v1289_v35 = vadd.f32 %v951_v7, %v486_v31  ;;  %v958_v36 = vpop.f32.mrb[14].mxu0  ;;  %v1006_v37 = vpop.f32.mrb[14].mxu1 }
 0x110   :  { %v591_v39 = vadd.f32 %v590_v32, %v589_v29  ;;  %v540_v40 = vadd.f32 %v539_v33, %v538_v28  ;;  %v959_v41 = vpop.f32.mrb[15].mxu0  ;;  %v489_v42 = vpop.f32.mrb[15].mxu1 }
 0x111   :  { %v1292_v43 = vadd.f32 %v1005_v27, %v957_v34  ;;  %v541_v44 = vsel %vm533_vm1, %v1289_v35, 0.0  ;;  %v575_v45 = vmul.f32 %v1289_v35, %v1289_v35  ;;  %v960_v46 = vadd.f32 %v959_v41, %v958_v36 }
 0x112   :  { %v542_v47 = vadd.f32 %v541_v44, %v540_v40  ;;  %v593_v49 = vadd.f32 %v592_v38, %v591_v39  ;;  %v1298_v50 = vadd.f32 %v954_v15, %v489_v42 }
 0x113   :  { %v594_v51 = vsel %vm533_vm1, %v575_v45, 0.0  ;;  %v1301_v52 = vadd.f32 %v1006_v37, %v960_v46  ;;  %v577_v57 = vmul.f32 %v1292_v43, %v1292_v43  ;;  %v545_v2 = vsel %vm533_vm1, %v1292_v43, 0.0 }
 0x114   :  { %v595_v54 = vadd.f32 %v594_v51, %v593_v49  ;;  %v543_v55 = vsel %vm533_vm1, %v1298_v50, 0.0  ;;  %v576_v56 = vmul.f32 %v1298_v50, %v1298_v50 }
 0x115   :  { %v544_v58 = vadd.f32 %v543_v55, %v542_v47  ;;  %v961_v59 = vpop.f32.mrb[16].mxu0  ;;  %v1009_v61 = vpop.f32.mrb[16].mxu1  ;;  %v598_v13 = vsel %vm533_vm1, %v577_v57, 0.0  ;;  %v578_v14 = vmul.f32 %v1301_v52, %v1301_v52  ;;  %v547_v19 = vsel %vm533_vm1, %v1301_v52, 0.0 }
 0x116   :  { %v596_v62 = vsel %vm533_vm1, %v576_v56, 0.0  ;;  %v962_v63 = vpop.f32.mrb[17].mxu0  ;;  %v502_v0 = vpop.f32.mrb[17].mxu1 }
 0x117   :  { %v597_v3 = vadd.f32 %v596_v62, %v595_v54  ;;  %v963_v5 = vadd.f32 %v962_v63, %v961_v59  ;;  %v964_v6 = vpop.f32.mrb[18].mxu0  ;;  %v1010_v7 = vpop.f32.mrb[18].mxu1  ;;  %v546_v9 = vadd.f32 %v545_v2, %v544_v58  ;;  %v600_v24 = vsel %vm533_vm1, %v578_v14, 0.0 }
 0x118   :  { %v965_v10 = vpop.f32.mrb[19].mxu0  ;;  %v505_v12 = vpop.f32.mrb[19].mxu1 }
 0x119   :  { %v966_v15 = vadd.f32 %v965_v10, %v964_v6  ;;  %v1315_v17 = vadd.f32 %v963_v5, %v502_v0  ;;  %v599_v18 = vadd.f32 %v598_v13, %v597_v3  ;;  %v548_v23 = vadd.f32 %v547_v19, %v546_v9 }
 0x11b   :  { %v549_v20 = vsel %vm533_vm1, %v1315_v17, 0.0  ;;  %v579_v21 = vmul.f32 %v1315_v17, %v1315_v17  ;;  %v1323_v22 = vadd.f32 %v966_v15, %v505_v12  ;;  %v601_v30 = vadd.f32 %v600_v24, %v599_v18 }
 0x11c   :  { %v550_v29 = vadd.f32 %v549_v20, %v548_v23 }
 0x11d   :  { %v602_v25 = vsel %vm533_vm1, %v579_v21, 0.0  ;;  %v580_v26 = vmul.f32 %v1323_v22, %v1323_v22  ;;  %v967_v27 = vpop.f32.mrb[20].mxu0  ;;  %v1013_v28 = vpop.f32.mrb[20].mxu1  ;;  %v551_v34 = vsel %vm533_vm1, %v1323_v22, 0.0 }
 0x11e   :  { %v1330_v31 = vadd.f32 %v1013_v28, %v1258_v60  ;;  %v968_v32 = vpop.f32.mrb[21].mxu0  ;;  %v518_v33 = vpop.f32.mrb[21].mxu1  ;;  %v603_v40 = vadd.f32 %v602_v25, %v601_v30  ;;  %v552_v47 = vadd.f32 %v551_v34, %v550_v29 }
 0x11f   :  { %v969_v36 = vadd.f32 %v968_v32, %v967_v27  ;;  %v1335_v37 = vadd.f32 %v1254_v48, %v518_v33  ;;  %v970_v38 = vpop.f32.mrb[22].mxu0  ;;  %v1014_v39 = vpop.f32.mrb[22].mxu1  ;;  %v604_v60 = vsel %vm533_vm1, %v580_v26, 0.0 }
 0x120   :  { %v1338_v41 = vadd.f32 %v1014_v39, %v1260_v1  ;;  %v971_v42 = vpop.f32.mrb[23].mxu0  ;;  %v521_v44 = vpop.f32.mrb[23].mxu1  ;;  %v605_v1 = vadd.f32 %v604_v60, %v603_v40  ;;  %v585_v5 = vmul.f32 %v1330_v31, %v1330_v31  ;;  %v561_v12 = vsel %vm533_vm1, %v1330_v31, 0.0 }
 0x121   :  { %v1341_v45 = vadd.f32 %v1009_v61, %v969_v36  ;;  %v972_v46 = vadd.f32 %v971_v42, %v970_v38  ;;  %v1344_v49 = vadd.f32 %v1256_v53, %v521_v44  ;;  %v583_v57 = vmul.f32 %v1335_v37, %v1335_v37 }
 0x122   :  { %v557_v62 = vsel %vm533_vm1, %v1335_v37, 0.0  ;;  %v586_v13 = vmul.f32 %v1338_v41, %v1338_v41  ;;  %v614_v19 = vsel %vm533_vm1, %v585_v5, 0.0  ;;  %v563_v20 = vsel %vm533_vm1, %v1338_v41, 0.0 }
 0x123   :  { %v553_v48 = vsel %vm533_vm1, %v1341_v45, 0.0  ;;  %v581_v51 = vmul.f32 %v1341_v45, %v1341_v45  ;;  %v1350_v54 = vadd.f32 %v1010_v7, %v972_v46  ;;  %v584_v0 = vmul.f32 %v1344_v49, %v1344_v49 }
 0x124   :  { %v554_v55 = vadd.f32 %v553_v48, %v552_v47  ;;  %v610_v6 = vsel %vm533_vm1, %v583_v57, 0.0  ;;  %v559_v7 = vsel %vm533_vm1, %v1344_v49, 0.0  ;;  %v616_v24 = vsel %vm533_vm1, %v586_v13, 0.0 }
 0x125   :  { %v606_v56 = vsel %vm533_vm1, %v581_v51, 0.0  ;;  %v555_v58 = vsel %vm533_vm1, %v1350_v54, 0.0  ;;  %v582_v53 = vmul.f32 %v1350_v54, %v1350_v54  ;;  %v612_v14 = vsel %vm533_vm1, %v584_v0, 0.0 }
 0x126   :  { %v607_v59 = vadd.f32 %v606_v56, %v605_v1  ;;  %v556_v61 = vadd.f32 %v555_v58, %v554_v55  ;;  %v663_v0 = vlaneseq }
 0x127   :  { %v608_v63 = vsel %vm533_vm1, %v582_v53, 0.0 }
 0x128   :  { %v609_v2 = vadd.f32 %v608_v63, %v607_v59  ;;  %v558_v3 = vadd.f32 %v557_v62, %v556_v61 }
 0x12a   :  { %v560_v9 = vadd.f32 %v559_v7, %v558_v3  ;;  %v611_v10 = vadd.f32 %v610_v6, %v609_v2  ;;  %v664_v2 = vshrl.u32 %v663_v0, 7  ;;  %v655_v3 = vld [vmem:[%s1470_s2] sm:$0x1] }
 0x12c   :  { %v562_v15 = vadd.f32 %v561_v12, %v560_v9  ;;  %v613_v18 = vadd.f32 %v612_v14, %v611_v10  ;;  %v665_v5 = vsub.s32 0, %v664_v2  ;;  %v659_v9 = vld [vmem:[%s1471_s3] sm:$0x1] }
 0x12e   :  { %v564_v21 = vadd.f32 %v563_v20, %v562_v15  ;;  %v615_v23 = vadd.f32 %v614_v19, %v613_v18 }
 0x130   :  { %v565_v25 = vrot.slane %v564_v21, 4  ;;  %v617_v26 = vadd.f32 %v616_v24, %v615_v23 }
 0x132   :  { %v566_v27 = vadd.f32 %v565_v25, %v564_v21  ;;  %v618_v28 = vrot.slane %v617_v26, 4 }
 0x134   :  { %v567_v29 = vrot.slane %v566_v27, 2  ;;  %v619_v30 = vadd.f32 %v618_v28, %v617_v26 }
 0x136   :  { %v568_v32 = vadd.f32 %v567_v29, %v566_v27  ;;  %v620_v33 = vrot.slane %v619_v30, 2 }
 0x138   :  { %v569_v34 = vrot.slane %v568_v32, 1  ;;  %v621_v36 = vadd.f32 %v620_v33, %v619_v30 }
 0x13a   :  { %v570_v38 = vadd.f32 %v569_v34, %v568_v32  ;;  %v622_v39 = vrot.slane %v621_v36, 1 }
 0x13c   :  { %634 = vrot.lane.b32.xlu1 %v570_v38, %s1089_s0  ;;  %625 = vrot.lane.b32.xlu0 %v570_v38, %s1090_s19  ;;  %v623_v40 = vadd.f32 %v622_v39, %v621_v36 }
 0x140   :  { %638 = vrot.lane.b32.xlu1 %v623_v40, %s1089_s0  ;;  %630 = vrot.lane.b32.xlu0 %v623_v40, %s1090_s19 }
 0x144   :  { %646 = vrot.lane.b32.xlu1 %v623_v40, %s1091_s20  ;;  %642 = vrot.lane.b32.xlu0 %v570_v38, %s1091_s20 }
 0x1ae   :  { %v635_v42 = vpop.permute.xlu1 %634  ;;  %v626_v44 = vpop.permute.xlu0 %625 }
 0x1af   :  { %v628_v60 = vadd.f32 %v626_v44, %v570_v38 }
 0x1b1   :  { %v637_v1 = vadd.f32 %v635_v42, %v628_v60 }
 0x1b2   :  { %v639_v46 = vpop.permute.xlu1 %638  ;;  %v631_v47 = vpop.permute.xlu0 %630 }
 0x1b3   :  { %v633_v48 = vadd.f32 %v631_v47, %v623_v40 }
 0x1b5   :  { %v641_v51 = vadd.f32 %v639_v46, %v633_v48 }
 0x1b6   :  { %v647_v55 = vpop.permute.xlu1 %646  ;;  %v643_v56 = vpop.permute.xlu0 %642 }
 0x1b7   :  { %v649_v57 = vadd.f32 %v647_v55, %v641_v51  ;;  %v645_v58 = vadd.f32 %v643_v56, %v637_v1 }
 0x1b9   :  { %v651_v53 = vmul.f32 0.001953125, %v645_v58  ;;  %v652_v59 = vmul.f32 0.001953125, %v649_v57 }
 0x1bb   :  { %v653_v61 = vmul.f32 %v651_v53, %v651_v53 }
 0x1bd   :  { %v654_v62 = vsub.f32 %v652_v59, %v653_v61 }
 0x1bf   :  { %v656_v63 = vadd.f32 1e-05, %v654_v62 }
 0x1c1   :  { %1087 = vrsqrt.f32 %v656_v63 }
 0x1cb   :  { %v1088_v6 = vpop.eup %1087 }
 0x1cc   :  { %v658_v7 = vmul.f32 %v1088_v6, %v655_v3 }
 0x1ce   :  { %v660_v10 = vmul.f32 %v658_v7, %v651_v53  ;;  %v666_v12 = vrot.slane %v658_v7, %v665_v5 }
 0x1d0   :  { %v661_v13 = vsub.f32 %v659_v9, %v660_v10  ;;  %670 = vrot.lane.b32.xlu1 %v666_v12, %s1092_s25  ;;  %667 = vrot.lane.b32.xlu0 %v666_v12, %s1093_s26 }
 0x1d2   :  { %v685_v14 = vrot.slane %v661_v13, %v665_v5 }
 0x1d4   :  { %673 = vrot.lane.b32.xlu0 %v666_v12, %s1094_s27  ;;  %686 = vrot.lane.b32.xlu1 %v685_v14, %s1093_s26 }
 0x1d8   :  { %689 = vrot.lane.b32.xlu0 %v685_v14, %s1092_s25  ;;  %692 = vrot.lane.b32.xlu1 %v685_v14, %s1094_s27 }
 0x242   :  { %v671_v15 = vpop.permute.xlu1 %670  ;;  %v668_v18 = vpop.permute.xlu0 %667 }
 0x243   :  { %v677_v19 = vsel %vm676_vm2, %v658_v7, %v668_v18 }
 0x244   :  { %v678_v20 = vsel %vm314_vm0, %v677_v19, %v671_v15 }
 0x246   :  { %v674_v21 = vpop.permute.xlu0 %673  ;;  %v687_v23 = vpop.permute.xlu1 %686 }
 0x247   :  { %v680_v24 = vsel %vm679_vm3, %v678_v20, %v674_v21  ;;  %v695_v32 = vsel %vm676_vm2, %v661_v13, %v687_v23 }
 0x248   :  { %v701_v25 = vrot.slane %v680_v24, %v665_v5 }
 0x24a   :  { %v690_v26 = vpop.permute.xlu0 %689  ;;  %v693_v27 = vpop.permute.xlu1 %692  ;;  %v702_v28 = vmul.f32 %v701_v25, %v1264_v8  ;;  %v703_v29 = vmul.f32 %v701_v25, %v1270_v16  ;;  %v704_v30 = vmul.f32 %v701_v25, %v1262_v4  ;;  %v705_v33 = vmul.f32 %v701_v25, %v1266_v11 }
 0x24b   :  { %v706_v34 = vmul.f32 %v701_v25, %v1289_v35  ;;  %v707_v36 = vmul.f32 %v701_v25, %v1298_v50  ;;  %v696_v38 = vsel %vm314_vm0, %v695_v32, %v690_v26  ;;  %v708_v39 = vmul.f32 %v701_v25, %v1292_v43 }
 0x24c   :  { %v709_v40 = vmul.f32 %v701_v25, %v1301_v52  ;;  %v710_v42 = vmul.f32 %v701_v25, %v1315_v17  ;;  %v697_v8 = vsel %vm679_vm3, %v696_v38, %v693_v27  ;;  %v711_v16 = vmul.f32 %v701_v25, %v1323_v22 }
 0x24d   :  { %v712_v4 = vmul.f32 %v701_v25, %v1341_v45  ;;  %v713_v11 = vmul.f32 %v701_v25, %v1350_v54  ;;  %v721_v44 = vrot.slane %v697_v8, %v665_v5  ;;  %v714_v35 = vmul.f32 %v701_v25, %v1335_v37 }
 0x24e   :  { %v715_v50 = vmul.f32 %v701_v25, %v1344_v49  ;;  %v716_v60 = vmul.f32 %v701_v25, %v1330_v31  ;;  %v717_v43 = vmul.f32 %v701_v25, %v1338_v41 }
 0x24f   :  { %v722_v52 = vadd.f32 %v721_v44, %v702_v28  ;;  %v723_v17 = vadd.f32 %v721_v44, %v703_v29  ;;  %v724_v46 = vadd.f32 %v721_v44, %v704_v30  ;;  %v725_v47 = vadd.f32 %v721_v44, %v705_v33 }
 0x250   :  { %v726_v48 = vadd.f32 %v721_v44, %v706_v34  ;;  %v727_v22 = vadd.f32 %v721_v44, %v707_v36  ;;  %v728_v51 = vadd.f32 %v721_v44, %v708_v39  ;;  %v729_v45 = vadd.f32 %v721_v44, %v709_v40 }
 0x251   :  { %v730_v1 = vadd.f32 %v721_v44, %v710_v42  ;;  %v731_v54 = vadd.f32 %v721_v44, %v711_v16  ;;  %v732_v55 = vadd.f32 %v721_v44, %v712_v4  ;;  %v733_v56 = vadd.f32 %v721_v44, %v713_v11 }
 0x252   :  { %v734_v37 = vadd.f32 %v721_v44, %v714_v35  ;;  %v735_v57 = vadd.f32 %v721_v44, %v715_v50  ;;  %v736_v49 = vadd.f32 %v721_v44, %v716_v60  ;;  %v737_v58 = vadd.f32 %v721_v44, %v717_v43 }
 0x253   :  { %v738_v31 = vmax.f32 %v722_v52, 0.0  ;;  %v739_v53 = vmax.f32 %v723_v17, 0.0  ;;  %v740_v41 = vmax.f32 %v724_v46, 0.0  ;;  %v741_v59 = vmax.f32 %v725_v47, 0.0 }
 0x254   :  { %v742_v61 = vmax.f32 %v726_v48, 0.0  ;;  %v743_v62 = vmax.f32 %v727_v22, 0.0  ;;  %v744_v63 = vmax.f32 %v728_v51, 0.0  ;;  %v745_v0 = vmax.f32 %v729_v45, 0.0 }
 0x255   :  { %v746_v2 = vmax.f32 %v730_v1, 0.0  ;;  %v747_v3 = vmax.f32 %v731_v54, 0.0  ;;  %v748_v5 = vmax.f32 %v732_v55, 0.0  ;;  %v749_v6 = vmax.f32 %v733_v56, 0.0 }
 0x256   :  { %v750_v7 = vmax.f32 %v734_v37, 0.0  ;;  %v751_v9 = vmax.f32 %v735_v57, 0.0  ;;  %v752_v10 = vmax.f32 %v736_v49, 0.0  ;;  %v753_v12 = vmax.f32 %v737_v58, 0.0 }
 0x257   :  { %v905_v13 = vpack.c.bf16 %v738_v31, %v738_v31  ;;  %v906_v14 = vpack.c.bf16 %v739_v53, %v739_v53  ;;  %v907_v15 = vpack.c.bf16 %v740_v41, %v740_v41  ;;  %v908_v18 = vpack.c.bf16 %v741_v59, %v741_v59 }
 0x258   :  { %v909_v19 = vpack.c.bf16 %v742_v61, %v742_v61  ;;  %v910_v20 = vpack.c.bf16 %v743_v62, %v743_v62  ;;  %v911_v21 = vpack.c.bf16 %v744_v63, %v744_v63  ;;  %v912_v23 = vpack.c.bf16 %v745_v0, %v745_v0 }
 0x259   :  { %v913_v24 = vpack.c.bf16 %v746_v2, %v746_v2  ;;  %v914_v25 = vpack.c.bf16 %v747_v3, %v747_v3  ;;  %v915_v26 = vpack.c.bf16 %v748_v5, %v748_v5  ;;  %v916_v27 = vpack.c.bf16 %v749_v6, %v749_v6  ;;  %819 = vst.msk [vmem:[%s1472_s4] sm:$0xf] %vm818_vm4, %v905_v13 }
 0x25a   :  { %820 = vst.msk [vmem:[%s1472_s4 + $0x4] sm:$0xf] %vm818_vm4, %v906_v14  ;;  %821 = vst.msk [vmem:[%s1472_s4 + $0x8] sm:$0xf] %vm818_vm4, %v907_v15  ;;  %v917_v28 = vpack.c.bf16 %v750_v7, %v750_v7  ;;  %v918_v29 = vpack.c.bf16 %v751_v9, %v751_v9  ;;  %v919_v30 = vpack.c.bf16 %v752_v10, %v752_v10 }
 0x25b   :  { %822 = vst.msk [vmem:[%s1472_s4 + $0xc] sm:$0xf] %vm818_vm4, %v908_v18  ;;  %v920_v32 = vpack.c.bf16 %v753_v12, %v753_v12  ;;  %823 = vst.msk [vmem:[%s1472_s4 + $0x10] sm:$0xf] %vm818_vm4, %v909_v19 }
 0x25c   :  { %824 = vst.msk [vmem:[%s1472_s4 + $0x14] sm:$0xf] %vm818_vm4, %v910_v20  ;;  %825 = vst.msk [vmem:[%s1472_s4 + $0x18] sm:$0xf] %vm818_vm4, %v911_v21 }
 0x25d   :  { %826 = vst.msk [vmem:[%s1472_s4 + $0x1c] sm:$0xf] %vm818_vm4, %v912_v23  ;;  %827 = vst.msk [vmem:[%s1472_s4 + $0x20] sm:$0xf] %vm818_vm4, %v913_v24 }
 0x25e   :  { %828 = vst.msk [vmem:[%s1472_s4 + $0x24] sm:$0xf] %vm818_vm4, %v914_v25  ;;  %829 = vst.msk [vmem:[%s1472_s4 + $0x28] sm:$0xf] %vm818_vm4, %v915_v26 }
 0x25f   :  { %830 = vst.msk [vmem:[%s1472_s4 + $0x2c] sm:$0xf] %vm818_vm4, %v916_v27  ;;  %831 = vst.msk [vmem:[%s1472_s4 + $0x30] sm:$0xf] %vm818_vm4, %v917_v28 }
 0x260   :  { %832 = vst.msk [vmem:[%s1472_s4 + $0x34] sm:$0xf] %vm818_vm4, %v918_v29  ;;  %833 = vst.msk [vmem:[%s1472_s4 + $0x38] sm:$0xf] %vm818_vm4, %v919_v30 }
 0x261   :  { %834 = vst.msk [vmem:[%s1472_s4 + $0x3c] sm:$0xf] %vm818_vm4, %v920_v32 }

// kernel: generator_forward.8
= control target key start
LH: loop header
LB: loop body
LE: loop exit
PB: predicated region body
PF: predicated region fallthrough
CT: control target
= control target key end

     0   :  { %v2123_v0 = vmov 0   ;;  %vm442_vm0 = vcmask 130048   ;;  %vm828_vm1 = vcmask 261120   ;;  %s2125_s26 = smov 120   ;;  %s2126_s27 = smov 104   ;;  %vm1211_vm2 = vcmask 64512   ;;  %s3898_s1 = inlined_call_operand.vmem [shape: bf16[144,32], index: 1, kind: input, shape index: {}]   ;;  %s3899_s0 = inlined_call_operand.vmem [shape: bf16[512,144], index: 0, kind: input, shape index: {}]   ;;  %s3900_s2 = inlined_call_operand.vmem [shape: f32[1,8], index: 2, kind: input, shape index: {}]   ;;  %s3901_s3 = inlined_call_operand.vmem [shape: f32[1,8], index: 3, kind: input, shape index: {}]   ;;  %s3902_s4 = inlined_call_operand.vmem [shape: bf16[512,32], index: 4, kind: output, shape index: {}]  }
   0x1   :  { %539 = vmatprep.subr.bf16.mxu0 %v2123_v0  ;;  %v2016_v1 = vld [vmem:[%s3898_s1] sm:$0xff]   ;;  %1991 = vmatprep.subr.bf16.mxu1 %v2123_v0  ;;  %v2017_v2 = vld [vmem:[%s3898_s1 + $0x8] sm:$0xff]   ;;  %v2018_v3 = vld [vmem:[%s3898_s1 + $0x10] sm:$0xff]   ;;  %s2127_s6 = smov 16   ;;  %s2128_s7 = smov 8   ;;  %vm1214_vm3 = vcmask 195584  }
   0x2   :  { %540 = vmatpush1.bf16.msra.mxu0 %v2016_v1  ;;  %2000 = vmatpush1.bf16.msra.mxu1 %v2016_v1  ;;  %v2019_v4 = vld [vmem:[%s3898_s1 + $0x18] sm:$0xff]   ;;  %v2027_v5 = vld [vmem:[%s3899_s0 + $0x4] ss:$8 sps:$4 sm:$0xff]   ;;  %v2022_v9 = vld [vmem:[%s3898_s1 + $0x30] sm:$0xff]   ;;  %s2129_s8 = smov 24   ;;  %vm1689_vm4 = vcmask 257024  }
   0x3   :  { %541 = vmatprep.subr.bf16.mxu0 %v2123_v0  ;;  %1992 = vmatprep.subr.bf16.mxu1 %v2123_v0  ;;  %v2020_v6 = vld [vmem:[%s3898_s1 + $0x20] sm:$0xff]   ;;  %v2021_v7 = vld [vmem:[%s3898_s1 + $0x28] sm:$0xff]   ;;  %v2023_v10 = vld [vmem:[%s3898_s1 + $0x38] sm:$0xff]  }
   0x4   :  { %1831 = vmatprep.mubr.msk.bf16.mxu0 %vm442_vm0, %v2027_v5  ;;  %v2051_v8 = vld [vmem:[%s3899_s0 + $0x104] ss:$8 sps:$4 sm:$0xff]   ;;  %v2025_v12 = vld [vmem:[%s3899_s0] ss:$8 sps:$4 sm:$0xff]   ;;  %v2028_v13 = vld [vmem:[%s3899_s0 + $0x14] ss:$8 sps:$4 sm:$0xff]  }
   0x5   :  { %1847 = vmatprep.mubr.msk.bf16.mxu1 %vm442_vm0, %v2051_v8  ;;  %v2024_v11 = vld [vmem:[%s3898_s1 + $0x40] sm:$0xff]   ;;  %v2055_v15 = vld [vmem:[%s3899_s0 + $0x114] ss:$8 sps:$4 sm:$0xff]   ;;  %v2030_v16 = vld [vmem:[%s3899_s0 + $0x10] ss:$8 sps:$4 sm:$0xff]  }
   0x6   :  { %542 = vmatpush1.bf16.msra.mxu0 %v2017_v2  ;;  %2001 = vmatpush1.bf16.msra.mxu1 %v2017_v2  ;;  %v2049_v14 = vld [vmem:[%s3899_s0 + $0x100] ss:$8 sps:$4 sm:$0xff]   ;;  %v2031_v17 = vld [vmem:[%s3899_s0 + $0x24] ss:$8 sps:$4 sm:$0xff]   ;;  %v2057_v18 = vld [vmem:[%s3899_s0 + $0x110] ss:$8 sps:$4 sm:$0xff]  }
   0x7   :  { %543 = vmatprep.subr.bf16.mxu0 %v2123_v0  ;;  %1993 = vmatprep.subr.bf16.mxu1 %v2123_v0  ;;  %v2061_v19 = vld [vmem:[%s3899_s0 + $0x124] ss:$8 sps:$4 sm:$0xff]   ;;  %v2033_v20 = vld [vmem:[%s3899_s0 + $0x20] ss:$8 sps:$4 sm:$0xff]   ;;  %v2034_v21 = vld [vmem:[%s3899_s0 + $0x34] ss:$8 sps:$4 sm:$0xff]  }
   0x8   :  { %v2063_v22 = vld [vmem:[%s3899_s0 + $0x120] ss:$8 sps:$4 sm:$0xff]   ;;  %v2067_v23 = vld [vmem:[%s3899_s0 + $0x134] ss:$8 sps:$4 sm:$0xff]   ;;  %v2036_v24 = vld [vmem:[%s3899_s0 + $0x30] ss:$8 sps:$4 sm:$0xff]  }
   0x9   :  { %v2069_v25 = vld [vmem:[%s3899_s0 + $0x130] ss:$8 sps:$4 sm:$0xff]   ;;  %v2037_v26 = vld [vmem:[%s3899_s0 + $0x44] ss:$8 sps:$4 sm:$0xff]   ;;  %v2039_v28 = vld [vmem:[%s3899_s0 + $0x40] ss:$8 sps:$4 sm:$0xff]  }
   0xa   :  { %544 = vmatpush1.bf16.msra.mxu0 %v2018_v3  ;;  %2002 = vmatpush1.bf16.msra.mxu1 %v2018_v3  ;;  %v2073_v27 = vld [vmem:[%s3899_s0 + $0x144] ss:$8 sps:$4 sm:$0xff]   ;;  %v2075_v29 = vld [vmem:[%s3899_s0 + $0x140] ss:$8 sps:$4 sm:$0xff]   ;;  %v2040_v30 = vld [vmem:[%s3899_s0 + $0x54] ss:$8 sps:$4 sm:$0xff]  }
   0xb   :  { %545 = vmatprep.subr.bf16.mxu0 %v2123_v0  ;;  %1994 = vmatprep.subr.bf16.mxu1 %v2123_v0  ;;  %v2079_v31 = vld [vmem:[%s3899_s0 + $0x154] ss:$8 sps:$4 sm:$0xff]   ;;  %v2042_v32 = vld [vmem:[%s3899_s0 + $0x50] ss:$8 sps:$4 sm:$0xff]   ;;  %v2043_v34 = vld [vmem:[%s3899_s0 + $0x64] ss:$8 sps:$4 sm:$0xff]  }
   0xc   :  { %v2081_v33 = vld [vmem:[%s3899_s0 + $0x150] ss:$8 sps:$4 sm:$0xff]   ;;  %v2085_v35 = vld [vmem:[%s3899_s0 + $0x164] ss:$8 sps:$4 sm:$0xff]   ;;  %v2045_v36 = vld [vmem:[%s3899_s0 + $0x60] ss:$8 sps:$4 sm:$0xff]  }
   0xd   :  { %v2087_v37 = vld [vmem:[%s3899_s0 + $0x160] ss:$8 sps:$4 sm:$0xff]   ;;  %v2046_v38 = vld [vmem:[%s3899_s0 + $0x74] ss:$8 sps:$4 sm:$0xff]   ;;  %v2048_v40 = vld [vmem:[%s3899_s0 + $0x70] ss:$8 sps:$4 sm:$0xff]  }
   0xe   :  { %546 = vmatpush1.bf16.msra.mxu0 %v2019_v4  ;;  %2003 = vmatpush1.bf16.msra.mxu1 %v2019_v4  ;;  %v2091_v39 = vld [vmem:[%s3899_s0 + $0x174] ss:$8 sps:$4 sm:$0xff]   ;;  %v2093_v41 = vld [vmem:[%s3899_s0 + $0x170] ss:$8 sps:$4 sm:$0xff]   ;;  %v2052_v42 = vld [vmem:[%s3899_s0 + $0x84] ss:$8 sps:$4 sm:$0xff]  }
   0xf   :  { %547 = vmatprep.subr.bf16.mxu0 %v2123_v0  ;;  %1995 = vmatprep.subr.bf16.mxu1 %v2123_v0  ;;  %v2097_v43 = vld [vmem:[%s3899_s0 + $0x184] ss:$8 sps:$4 sm:$0xff]   ;;  %v2054_v44 = vld [vmem:[%s3899_s0 + $0x80] ss:$8 sps:$4 sm:$0xff]   ;;  %v2058_v46 = vld [vmem:[%s3899_s0 + $0x94] ss:$8 sps:$4 sm:$0xff]  }
  0x10   :  { %v2099_v45 = vld [vmem:[%s3899_s0 + $0x180] ss:$8 sps:$4 sm:$0xff]   ;;  %v2100_v47 = vld [vmem:[%s3899_s0 + $0x194] ss:$8 sps:$4 sm:$0xff]   ;;  %v2060_v48 = vld [vmem:[%s3899_s0 + $0x90] ss:$8 sps:$4 sm:$0xff]  }
  0x11   :  { %v2102_v49 = vld [vmem:[%s3899_s0 + $0x190] ss:$8 sps:$4 sm:$0xff]   ;;  %v2064_v50 = vld [vmem:[%s3899_s0 + $0xa4] ss:$8 sps:$4 sm:$0xff]   ;;  %v2066_v52 = vld [vmem:[%s3899_s0 + $0xa0] ss:$8 sps:$4 sm:$0xff]  }
  0x12   :  { %548 = vmatpush1.bf16.msra.mxu0 %v2020_v6  ;;  %2004 = vmatpush1.bf16.msra.mxu1 %v2020_v6  ;;  %v2103_v51 = vld [vmem:[%s3899_s0 + $0x1a4] ss:$8 sps:$4 sm:$0xff]   ;;  %v2105_v53 = vld [vmem:[%s3899_s0 + $0x1a0] ss:$8 sps:$4 sm:$0xff]   ;;  %v2070_v54 = vld [vmem:[%s3899_s0 + $0xb4] ss:$8 sps:$4 sm:$0xff]  }
  0x13   :  { %549 = vmatprep.subr.bf16.mxu0 %v2123_v0  ;;  %1996 = vmatprep.subr.bf16.mxu1 %v2123_v0  ;;  %v2106_v55 = vld [vmem:[%s3899_s0 + $0x1b4] ss:$8 sps:$4 sm:$0xff]   ;;  %v2072_v56 = vld [vmem:[%s3899_s0 + $0xb0] ss:$8 sps:$4 sm:$0xff]   ;;  %v2076_v58 = vld [vmem:[%s3899_s0 + $0xc4] ss:$8 sps:$4 sm:$0xff]  }
  0x14   :  { %v2108_v57 = vld [vmem:[%s3899_s0 + $0x1b0] ss:$8 sps:$4 sm:$0xff]   ;;  %v2109_v59 = vld [vmem:[%s3899_s0 + $0x1c4] ss:$8 sps:$4 sm:$0xff]   ;;  %v2078_v60 = vld [vmem:[%s3899_s0 + $0xc0] ss:$8 sps:$4 sm:$0xff]  }
  0x15   :  { %v2111_v61 = vld [vmem:[%s3899_s0 + $0x1c0] ss:$8 sps:$4 sm:$0xff]   ;;  %v2082_v62 = vld [vmem:[%s3899_s0 + $0xd4] ss:$8 sps:$4 sm:$0xff]   ;;  %v2114_v1 = vld [vmem:[%s3899_s0 + $0x1d0] ss:$8 sps:$4 sm:$0xff]  }
  0x16   :  { %550 = vmatpush1.bf16.msra.mxu0 %v2021_v7  ;;  %2005 = vmatpush1.bf16.msra.mxu1 %v2021_v7  ;;  %v2112_v63 = vld [vmem:[%s3899_s0 + $0x1d4] ss:$8 sps:$4 sm:$0xff]   ;;  %v2088_v2 = vld [vmem:[%s3899_s0 + $0xe4] ss:$8 sps:$4 sm:$0xff]   ;;  %v2090_v4 = vld [vmem:[%s3899_s0 + $0xe0] ss:$8 sps:$4 sm:$0xff]  }
  0x17   :  { %551 = vmatprep.subr.bf16.mxu0 %v2123_v0  ;;  %1997 = vmatprep.subr.bf16.mxu1 %v2123_v0  ;;  %v2115_v3 = vld [vmem:[%s3899_s0 + $0x1e4] ss:$8 sps:$4 sm:$0xff]   ;;  %v2117_v5 = vld [vmem:[%s3899_s0 + $0x1e0] ss:$8 sps:$4 sm:$0xff]   ;;  %v2094_v6 = vld [vmem:[%s3899_s0 + $0xf4] ss:$8 sps:$4 sm:$0xff]  }
  0x18   :  { %v2118_v7 = vld [vmem:[%s3899_s0 + $0x1f4] ss:$8 sps:$4 sm:$0xff]   ;;  %v2096_v8 = vld [vmem:[%s3899_s0 + $0xf0] ss:$8 sps:$4 sm:$0xff]  }
  0x1a   :  { %552 = vmatpush1.bf16.msra.mxu0 %v2022_v9  ;;  %2006 = vmatpush1.bf16.msra.mxu1 %v2022_v9  ;;  %v2120_v9 = vld [vmem:[%s3899_s0 + $0x1f0] ss:$8 sps:$4 sm:$0xff]  }
  0x1b   :  { %553 = vmatprep.subr.bf16.mxu0 %v2123_v0  ;;  %1998 = vmatprep.subr.bf16.mxu1 %v2123_v0 }
  0x1e   :  { %554 = vmatpush1.bf16.msra.mxu0 %v2023_v10  ;;  %2007 = vmatpush1.bf16.msra.mxu1 %v2023_v10 }
  0x1f   :  { %555 = vmatprep.subr.bf16.mxu0 %v2123_v0  ;;  %1999 = vmatprep.subr.bf16.mxu1 %v2123_v0  ;;  %v2084_v0 = vld [vmem:[%s3899_s0 + $0xd0] ss:$8 sps:$4 sm:$0xff]   ;;  %s2124_s0 = smov 112  }
  0x22   :  { %556 = vmatpush1.bf16.msra.mxu0 %v2024_v11  ;;  %2008 = vmatpush1.bf16.msra.mxu1 %v2024_v11 }
  0x25   :  { %572 = vmatmul.mubr.bf16.vlgmr.msra.gmra.mrb[0].mxu0 %v2025_v12  ;;  %700 = vmatmul.mubr.bf16.vlgmr.msra.gmra.mrb[0].mxu1 %v2049_v14 }
  0x26   :  { %1832 = vmatprep.mubr.msk.bf16.mxu0 %vm442_vm0, %v2028_v13  ;;  %1848 = vmatprep.mubr.msk.bf16.mxu1 %vm442_vm0, %v2055_v15 }
  0x2d   :  { %580 = vmatmul.mubr.bf16.gmra.mrb[4].mxu0 %v2030_v16  ;;  %708 = vmatmul.mubr.bf16.gmra.mrb[4].mxu1 %v2057_v18 }
  0x2e   :  { %1833 = vmatprep.mubr.msk.bf16.mxu0 %vm442_vm0, %v2031_v17  ;;  %1849 = vmatprep.mubr.msk.bf16.mxu1 %vm442_vm0, %v2061_v19 }
  0x35   :  { %588 = vmatmul.mubr.bf16.gmra.mrb[8].mxu0 %v2033_v20  ;;  %716 = vmatmul.mubr.bf16.gmra.mrb[8].mxu1 %v2063_v22 }
  0x36   :  { %1834 = vmatprep.mubr.msk.bf16.mxu0 %vm442_vm0, %v2034_v21  ;;  %1850 = vmatprep.mubr.msk.bf16.mxu1 %vm442_vm0, %v2067_v23 }
  0x3d   :  { %596 = vmatmul.mubr.bf16.gmra.mrb[12].mxu0 %v2036_v24  ;;  %724 = vmatmul.mubr.bf16.gmra.mrb[12].mxu1 %v2069_v25 }
  0x3e   :  { %1835 = vmatprep.mubr.msk.bf16.mxu0 %vm442_vm0, %v2037_v26  ;;  %1851 = vmatprep.mubr.msk.bf16.mxu1 %vm442_vm0, %v2073_v27 }
  0x45   :  { %604 = vmatmul.mubr.bf16.gmra.mrb[16].mxu0 %v2039_v28  ;;  %732 = vmatmul.mubr.bf16.gmra.mrb[16].mxu1 %v2075_v29 }
  0x46   :  { %1836 = vmatprep.mubr.msk.bf16.mxu0 %vm442_vm0, %v2040_v30  ;;  %1852 = vmatprep.mubr.msk.bf16.mxu1 %vm442_vm0, %v2079_v31 }
  0x4d   :  { %612 = vmatmul.mubr.bf16.gmra.mrb[20].mxu0 %v2042_v32  ;;  %740 = vmatmul.mubr.bf16.gmra.mrb[20].mxu1 %v2081_v33 }
  0x4e   :  { %1837 = vmatprep.mubr.msk.bf16.mxu0 %vm442_vm0, %v2043_v34  ;;  %1853 = vmatprep.mubr.msk.bf16.mxu1 %vm442_vm0, %v2085_v35 }
  0x55   :  { %620 = vmatmul.mubr.bf16.gmra.mrb[24].mxu0 %v2045_v36  ;;  %748 = vmatmul.mubr.bf16.gmra.mrb[24].mxu1 %v2087_v37 }
  0x56   :  { %1838 = vmatprep.mubr.msk.bf16.mxu0 %vm442_vm0, %v2046_v38  ;;  %1854 = vmatprep.mubr.msk.bf16.mxu1 %vm442_vm0, %v2091_v39 }
  0x5d   :  { %628 = vmatmul.mubr.bf16.gmra.mrb[28].mxu0 %v2048_v40  ;;  %756 = vmatmul.mubr.bf16.gmra.mrb[28].mxu1 %v2093_v41 }
  0x5e   :  { %1839 = vmatprep.mubr.msk.bf16.mxu0 %vm442_vm0, %v2052_v42  ;;  %1855 = vmatprep.mubr.msk.bf16.mxu1 %vm442_vm0, %v2097_v43 }
  0x65   :  { %636 = vmatmul.mubr.bf16.gmra.mrb[32].mxu0 %v2054_v44  ;;  %764 = vmatmul.mubr.bf16.gmra.mrb[32].mxu1 %v2099_v45 }
  0x66   :  { %1840 = vmatprep.mubr.msk.bf16.mxu0 %vm442_vm0, %v2058_v46  ;;  %1856 = vmatprep.mubr.msk.bf16.mxu1 %vm442_vm0, %v2100_v47 }
  0x6d   :  { %644 = vmatmul.mubr.bf16.gmra.mrb[36].mxu0 %v2060_v48  ;;  %772 = vmatmul.mubr.bf16.gmra.mrb[36].mxu1 %v2102_v49 }
  0x6e   :  { %1841 = vmatprep.mubr.msk.bf16.mxu0 %vm442_vm0, %v2064_v50  ;;  %1857 = vmatprep.mubr.msk.bf16.mxu1 %vm442_vm0, %v2103_v51 }
  0x75   :  { %652 = vmatmul.mubr.bf16.gmra.mrb[40].mxu0 %v2066_v52  ;;  %780 = vmatmul.mubr.bf16.gmra.mrb[40].mxu1 %v2105_v53 }
  0x76   :  { %1842 = vmatprep.mubr.msk.bf16.mxu0 %vm442_vm0, %v2070_v54  ;;  %1858 = vmatprep.mubr.msk.bf16.mxu1 %vm442_vm0, %v2106_v55 }
  0x7d   :  { %660 = vmatmul.mubr.bf16.gmra.mrb[44].mxu0 %v2072_v56  ;;  %788 = vmatmul.mubr.bf16.gmra.mrb[44].mxu1 %v2108_v57 }
  0x7e   :  { %1843 = vmatprep.mubr.msk.bf16.mxu0 %vm442_vm0, %v2076_v58  ;;  %1859 = vmatprep.mubr.msk.bf16.mxu1 %vm442_vm0, %v2109_v59 }
  0x85   :  { %668 = vmatmul.mubr.bf16.gmra.mrb[48].mxu0 %v2078_v60  ;;  %796 = vmatmul.mubr.bf16.gmra.mrb[48].mxu1 %v2111_v61 }
  0x86   :  { %1844 = vmatprep.mubr.msk.bf16.mxu0 %vm442_vm0, %v2082_v62  ;;  %1860 = vmatprep.mubr.msk.bf16.mxu1 %vm442_vm0, %v2112_v63 }
  0x8d   :  { %676 = vmatmul.mubr.bf16.gmra.mrb[52].mxu0 %v2084_v0  ;;  %804 = vmatmul.mubr.bf16.gmra.mrb[52].mxu1 %v2114_v1 }
  0x8e   :  { %1845 = vmatprep.mubr.msk.bf16.mxu0 %vm442_vm0, %v2088_v2  ;;  %1861 = vmatprep.mubr.msk.bf16.mxu1 %vm442_vm0, %v2115_v3 }
  0x95   :  { %684 = vmatmul.mubr.bf16.gmra.mrb[56].mxu0 %v2090_v4  ;;  %812 = vmatmul.mubr.bf16.gmra.mrb[56].mxu1 %v2117_v5 }
  0x96   :  { %1846 = vmatprep.mubr.msk.bf16.mxu0 %vm442_vm0, %v2094_v6  ;;  %1862 = vmatprep.mubr.msk.bf16.mxu1 %vm442_vm0, %v2118_v7 }
  0x9d   :  { %692 = vmatmul.mubr.bf16.gmra.mrb[60].mxu0 %v2096_v8  ;;  %820 = vmatmul.mubr.bf16.gmra.mrb[60].mxu1 %v2120_v9 }
  0xf8   :  { %v2406_v10 = vpop.f32.mrb[0].mxu0  ;;  %v2408_v11 = vpop.f32.mrb[0].mxu1 }
  0xf9   :  { %v962_v12 = vmul.f32 %v2406_v10, %v2406_v10  ;;  %v575_v13 = vpop.f32.mrb[1].mxu0  ;;  %v703_v14 = vpop.f32.mrb[1].mxu1  ;;  %v829_v17 = vsel %vm828_vm1, %v2406_v10, 0.0 }
  0xfa   :  { %v2412_v15 = vpop.f32.mrb[2].mxu0  ;;  %v2414_v16 = vpop.f32.mrb[2].mxu1 }
  0xfb   :  { %v830_v18 = vsel %vm828_vm1, %v2412_v15, 0.0  ;;  %v963_v19 = vmul.f32 %v2412_v15, %v2412_v15  ;;  %v578_v20 = vpop.f32.mrb[3].mxu0  ;;  %v706_v21 = vpop.f32.mrb[3].mxu1  ;;  %v1026_v23 = vsel %vm828_vm1, %v962_v12, 0.0 }
  0xfc   :  { %v831_v22 = vadd.f32 %v830_v18, %v829_v17 }
  0xfd   :  { %v1027_v24 = vsel %vm828_vm1, %v963_v19, 0.0 }
  0xfe   :  { %v1028_v25 = vadd.f32 %v1027_v24, %v1026_v23 }
 0x100   :  { %v2424_v26 = vpop.f32.mrb[4].mxu0  ;;  %v2426_v27 = vpop.f32.mrb[4].mxu1 }
 0x101   :  { %v832_v28 = vsel %vm828_vm1, %v2424_v26, 0.0  ;;  %v964_v29 = vmul.f32 %v2424_v26, %v2424_v26  ;;  %v583_v30 = vpop.f32.mrb[5].mxu0  ;;  %v711_v31 = vpop.f32.mrb[5].mxu1 }
 0x102   :  { %v833_v32 = vadd.f32 %v832_v28, %v831_v22  ;;  %v2432_v33 = vpop.f32.mrb[6].mxu0  ;;  %v2434_v34 = vpop.f32.mrb[6].mxu1 }
 0x103   :  { %v1029_v35 = vsel %vm828_vm1, %v964_v29, 0.0  ;;  %v834_v36 = vsel %vm828_vm1, %v2432_v33, 0.0  ;;  %v965_v37 = vmul.f32 %v2432_v33, %v2432_v33  ;;  %v586_v38 = vpop.f32.mrb[7].mxu0  ;;  %v714_v39 = vpop.f32.mrb[7].mxu1 }
 0x104   :  { %v1030_v40 = vadd.f32 %v1029_v35, %v1028_v25  ;;  %v835_v41 = vadd.f32 %v834_v36, %v833_v32 }
 0x105   :  { %v1031_v42 = vsel %vm828_vm1, %v965_v37, 0.0 }
 0x106   :  { %v1032_v43 = vadd.f32 %v1031_v42, %v1030_v40 }
 0x108   :  { %v2442_v44 = vpop.f32.mrb[8].mxu0  ;;  %v2444_v45 = vpop.f32.mrb[8].mxu1 }
 0x109   :  { %v836_v46 = vsel %vm828_vm1, %v2442_v44, 0.0  ;;  %v966_v47 = vmul.f32 %v2442_v44, %v2442_v44  ;;  %v591_v48 = vpop.f32.mrb[9].mxu0  ;;  %v719_v49 = vpop.f32.mrb[9].mxu1 }
 0x10a   :  { %v837_v50 = vadd.f32 %v836_v46, %v835_v41  ;;  %v2450_v51 = vpop.f32.mrb[10].mxu0  ;;  %v2452_v52 = vpop.f32.mrb[10].mxu1 }
 0x10b   :  { %v1033_v53 = vsel %vm828_vm1, %v966_v47, 0.0  ;;  %v838_v54 = vsel %vm828_vm1, %v2450_v51, 0.0  ;;  %v967_v55 = vmul.f32 %v2450_v51, %v2450_v51  ;;  %v594_v56 = vpop.f32.mrb[11].mxu0  ;;  %v722_v57 = vpop.f32.mrb[11].mxu1 }
 0x10c   :  { %v1034_v58 = vadd.f32 %v1033_v53, %v1032_v43  ;;  %v839_v59 = vadd.f32 %v838_v54, %v837_v50 }
 0x10d   :  { %v1035_v60 = vsel %vm828_vm1, %v967_v55, 0.0 }
 0x10e   :  { %v1036_v61 = vadd.f32 %v1035_v60, %v1034_v58 }
 0x110   :  { %v2460_v62 = vpop.f32.mrb[12].mxu0  ;;  %v2462_v63 = vpop.f32.mrb[12].mxu1 }
 0x111   :  { %v840_v0 = vsel %vm828_vm1, %v2460_v62, 0.0  ;;  %v968_v1 = vmul.f32 %v2460_v62, %v2460_v62  ;;  %v599_v2 = vpop.f32.mrb[13].mxu0  ;;  %v727_v3 = vpop.f32.mrb[13].mxu1 }
 0x112   :  { %v841_v4 = vadd.f32 %v840_v0, %v839_v59  ;;  %v2468_v5 = vpop.f32.mrb[14].mxu0  ;;  %v2470_v6 = vpop.f32.mrb[14].mxu1 }
 0x113   :  { %v1037_v7 = vsel %vm828_vm1, %v968_v1, 0.0  ;;  %v842_v8 = vsel %vm828_vm1, %v2468_v5, 0.0  ;;  %v969_v9 = vmul.f32 %v2468_v5, %v2468_v5  ;;  %v602_v12 = vpop.f32.mrb[15].mxu0  ;;  %v730_v13 = vpop.f32.mrb[15].mxu1 }
 0x114   :  { %v1038_v14 = vadd.f32 %v1037_v7, %v1036_v61  ;;  %v843_v17 = vadd.f32 %v842_v8, %v841_v4 }
 0x115   :  { %v1039_v18 = vsel %vm828_vm1, %v969_v9, 0.0 }
 0x116   :  { %v1040_v19 = vadd.f32 %v1039_v18, %v1038_v14 }
 0x118   :  { %v2478_v20 = vpop.f32.mrb[16].mxu0  ;;  %v2480_v21 = vpop.f32.mrb[16].mxu1 }
 0x119   :  { %v844_v22 = vsel %vm828_vm1, %v2478_v20, 0.0  ;;  %v970_v23 = vmul.f32 %v2478_v20, %v2478_v20  ;;  %v607_v24 = vpop.f32.mrb[17].mxu0  ;;  %v735_v25 = vpop.f32.mrb[17].mxu1 }
 0x11a   :  { %v845_v28 = vadd.f32 %v844_v22, %v843_v17  ;;  %v2486_v29 = vpop.f32.mrb[18].mxu0  ;;  %v2488_v30 = vpop.f32.mrb[18].mxu1 }
 0x11b   :  { %v1041_v31 = vsel %vm828_vm1, %v970_v23, 0.0  ;;  %v846_v32 = vsel %vm828_vm1, %v2486_v29, 0.0  ;;  %v971_v35 = vmul.f32 %v2486_v29, %v2486_v29  ;;  %v610_v36 = vpop.f32.mrb[19].mxu0  ;;  %v738_v37 = vpop.f32.mrb[19].mxu1 }
 0x11c   :  { %v1042_v38 = vadd.f32 %v1041_v31, %v1040_v19  ;;  %v847_v39 = vadd.f32 %v846_v32, %v845_v28 }
 0x11d   :  { %v1043_v40 = vsel %vm828_vm1, %v971_v35, 0.0 }
 0x11e   :  { %v1044_v41 = vadd.f32 %v1043_v40, %v1042_v38 }
 0x120   :  { %v2496_v42 = vpop.f32.mrb[20].mxu0  ;;  %v2498_v43 = vpop.f32.mrb[20].mxu1 }
 0x121   :  { %v848_v46 = vsel %vm828_vm1, %v2496_v42, 0.0  ;;  %v972_v47 = vmul.f32 %v2496_v42, %v2496_v42  ;;  %v615_v48 = vpop.f32.mrb[21].mxu0  ;;  %v743_v49 = vpop.f32.mrb[21].mxu1 }
 0x122   :  { %v849_v50 = vadd.f32 %v848_v46, %v847_v39  ;;  %v2504_v53 = vpop.f32.mrb[22].mxu0  ;;  %v2506_v54 = vpop.f32.mrb[22].mxu1 }
 0x123   :  { %v1045_v55 = vsel %vm828_vm1, %v972_v47, 0.0  ;;  %v850_v56 = vsel %vm828_vm1, %v2504_v53, 0.0  ;;  %v973_v57 = vmul.f32 %v2504_v53, %v2504_v53  ;;  %v618_v58 = vpop.f32.mrb[23].mxu0  ;;  %v746_v59 = vpop.f32.mrb[23].mxu1 }
 0x124   :  { %v1046_v60 = vadd.f32 %v1045_v55, %v1044_v41  ;;  %v851_v61 = vadd.f32 %v850_v56, %v849_v50 }
 0x125   :  { %v1047_v0 = vsel %vm828_vm1, %v973_v57, 0.0 }
 0x126   :  { %v1048_v1 = vadd.f32 %v1047_v0, %v1046_v60 }
 0x128   :  { %v2514_v2 = vpop.f32.mrb[24].mxu0  ;;  %v2516_v3 = vpop.f32.mrb[24].mxu1 }
 0x129   :  { %v852_v4 = vsel %vm828_vm1, %v2514_v2, 0.0  ;;  %v974_v7 = vmul.f32 %v2514_v2, %v2514_v2  ;;  %v623_v8 = vpop.f32.mrb[25].mxu0  ;;  %v751_v9 = vpop.f32.mrb[25].mxu1 }
 0x12a   :  { %v853_v12 = vadd.f32 %v852_v4, %v851_v61  ;;  %v2522_v13 = vpop.f32.mrb[26].mxu0  ;;  %v2524_v14 = vpop.f32.mrb[26].mxu1 }
 0x12b   :  { %v1049_v17 = vsel %vm828_vm1, %v974_v7, 0.0  ;;  %v854_v18 = vsel %vm828_vm1, %v2522_v13, 0.0  ;;  %v975_v19 = vmul.f32 %v2522_v13, %v2522_v13  ;;  %v626_v22 = vpop.f32.mrb[27].mxu0  ;;  %v754_v23 = vpop.f32.mrb[27].mxu1 }
 0x12c   :  { %v1050_v24 = vadd.f32 %v1049_v17, %v1048_v1  ;;  %v855_v25 = vadd.f32 %v854_v18, %v853_v12 }
 0x12d   :  { %v1051_v28 = vsel %vm828_vm1, %v975_v19, 0.0 }
 0x12e   :  { %v1052_v31 = vadd.f32 %v1051_v28, %v1050_v24 }
 0x130   :  { %v2532_v32 = vpop.f32.mrb[28].mxu0  ;;  %v2534_v35 = vpop.f32.mrb[28].mxu1 }
 0x131   :  { %3943 = vst [vmem:[#allocation2_spill] sm:$0xff] %v2532_v32  ;;  %v856_v36 = vsel %vm828_vm1, %v2532_v32, 0.0  ;;  %v976_v37 = vmul.f32 %v2532_v32, %v2532_v32  ;;  %v631_v38 = vpop.f32.mrb[29].mxu0  ;;  %v759_v39 = vpop.f32.mrb[29].mxu1  ;;  %v894_v32 = vsel %vm828_vm1, %v2414_v16, 0.0 }
 0x132   :  { %v857_v40 = vadd.f32 %v856_v36, %v855_v25  ;;  %v2540_v41 = vpop.f32.mrb[30].mxu0  ;;  %v2542_v46 = vpop.f32.mrb[30].mxu1 }
 0x133   :  { %3944 = vst [vmem:[#allocation3_spill] sm:$0xff] %v2540_v41  ;;  %v1053_v47 = vsel %vm828_vm1, %v976_v37, 0.0  ;;  %v858_v48 = vsel %vm828_vm1, %v2540_v41, 0.0  ;;  %v977_v49 = vmul.f32 %v2540_v41, %v2540_v41  ;;  %v634_v50 = vpop.f32.mrb[31].mxu0  ;;  %v762_v55 = vpop.f32.mrb[31].mxu1 }
 0x134   :  { %v1054_v56 = vadd.f32 %v1053_v47, %v1052_v31  ;;  %v859_v57 = vadd.f32 %v858_v48, %v857_v40 }
 0x135   :  { %v1055_v58 = vsel %vm828_vm1, %v977_v49, 0.0 }
 0x136   :  { %v1056_v59 = vadd.f32 %v1055_v58, %v1054_v56 }
 0x138   :  { %v2550_v60 = vpop.f32.mrb[32].mxu0  ;;  %v2552_v61 = vpop.f32.mrb[32].mxu1 }
 0x139   :  { %3945 = vst [vmem:[#allocation4_spill] sm:$0xff] %v2550_v60  ;;  %v860_v0 = vsel %vm828_vm1, %v2550_v60, 0.0  ;;  %v978_v1 = vmul.f32 %v2550_v60, %v2550_v60  ;;  %v639_v4 = vpop.f32.mrb[33].mxu0  ;;  %v767_v7 = vpop.f32.mrb[33].mxu1 }
 0x13a   :  { %v861_v8 = vadd.f32 %v860_v0, %v859_v57  ;;  %v2558_v9 = vpop.f32.mrb[34].mxu0  ;;  %v2560_v12 = vpop.f32.mrb[34].mxu1 }
 0x13b   :  { %3946 = vst [vmem:[#allocation5_spill] sm:$0xff] %v2558_v9  ;;  %v1057_v17 = vsel %vm828_vm1, %v978_v1, 0.0  ;;  %v862_v18 = vsel %vm828_vm1, %v2558_v9, 0.0  ;;  %v979_v19 = vmul.f32 %v2558_v9, %v2558_v9  ;;  %v642_v22 = vpop.f32.mrb[35].mxu0  ;;  %v770_v23 = vpop.f32.mrb[35].mxu1 }
 0x13c   :  { %v1058_v24 = vadd.f32 %v1057_v17, %v1056_v59  ;;  %v863_v25 = vadd.f32 %v862_v18, %v861_v8 }
 0x13d   :  { %v1059_v28 = vsel %vm828_vm1, %v979_v19, 0.0 }
 0x13e   :  { %v1060_v31 = vadd.f32 %v1059_v28, %v1058_v24 }
 0x140   :  { %v2568_v36 = vpop.f32.mrb[36].mxu0  ;;  %v2570_v37 = vpop.f32.mrb[36].mxu1 }
 0x141   :  { %3947 = vst [vmem:[#allocation6_spill] sm:$0xff] %v2568_v36  ;;  %v864_v38 = vsel %vm828_vm1, %v2568_v36, 0.0  ;;  %v980_v39 = vmul.f32 %v2568_v36, %v2568_v36  ;;  %v647_v40 = vpop.f32.mrb[37].mxu0  ;;  %v775_v47 = vpop.f32.mrb[37].mxu1 }
 0x142   :  { %v865_v48 = vadd.f32 %v864_v38, %v863_v25  ;;  %v2576_v49 = vpop.f32.mrb[38].mxu0  ;;  %v2578_v50 = vpop.f32.mrb[38].mxu1 }
 0x143   :  { %3948 = vst [vmem:[#allocation7_spill] sm:$0xff] %v2576_v49  ;;  %v1061_v55 = vsel %vm828_vm1, %v980_v39, 0.0  ;;  %v866_v56 = vsel %vm828_vm1, %v2576_v49, 0.0  ;;  %v981_v57 = vmul.f32 %v2576_v49, %v2576_v49  ;;  %v650_v58 = vpop.f32.mrb[39].mxu0  ;;  %v778_v59 = vpop.f32.mrb[39].mxu1 }
 0x144   :  { %v1062_v0 = vadd.f32 %v1061_v55, %v1060_v31  ;;  %v867_v1 = vadd.f32 %v866_v56, %v865_v48 }
 0x145   :  { %v1063_v4 = vsel %vm828_vm1, %v981_v57, 0.0 }
 0x146   :  { %v1064_v7 = vadd.f32 %v1063_v4, %v1062_v0 }
 0x148   :  { %v2586_v8 = vpop.f32.mrb[40].mxu0  ;;  %v2588_v17 = vpop.f32.mrb[40].mxu1 }
 0x149   :  { %3949 = vst [vmem:[#allocation8_spill] sm:$0xff] %v2586_v8  ;;  %v868_v18 = vsel %vm828_vm1, %v2586_v8, 0.0  ;;  %v982_v19 = vmul.f32 %v2586_v8, %v2586_v8  ;;  %v655_v22 = vpop.f32.mrb[41].mxu0  ;;  %v783_v23 = vpop.f32.mrb[41].mxu1 }
 0x14a   :  { %v869_v24 = vadd.f32 %v868_v18, %v867_v1  ;;  %v2594_v25 = vpop.f32.mrb[42].mxu0  ;;  %v2596_v28 = vpop.f32.mrb[42].mxu1 }
 0x14b   :  { %3950 = vst [vmem:[#allocation9_spill] sm:$0xff] %v2594_v25  ;;  %v1065_v31 = vsel %vm828_vm1, %v982_v19, 0.0  ;;  %v870_v38 = vsel %vm828_vm1, %v2594_v25, 0.0  ;;  %v983_v39 = vmul.f32 %v2594_v25, %v2594_v25  ;;  %v658_v40 = vpop.f32.mrb[43].mxu0  ;;  %v786_v47 = vpop.f32.mrb[43].mxu1 }
 0x14c   :  { %v1066_v48 = vadd.f32 %v1065_v31, %v1064_v7  ;;  %v871_v55 = vadd.f32 %v870_v38, %v869_v24 }
 0x14d   :  { %v1067_v56 = vsel %vm828_vm1, %v983_v39, 0.0 }
 0x14e   :  { %v1068_v57 = vadd.f32 %v1067_v56, %v1066_v48 }
 0x150   :  { %v2604_v58 = vpop.f32.mrb[44].mxu0  ;;  %v2606_v59 = vpop.f32.mrb[44].mxu1 }
 0x151   :  { %3951 = vst [vmem:[#allocation10_spill] sm:$0xff] %v2604_v58  ;;  %v872_v0 = vsel %vm828_vm1, %v2604_v58, 0.0  ;;  %v984_v1 = vmul.f32 %v2604_v58, %v2604_v58  ;;  %v663_v4 = vpop.f32.mrb[45].mxu0  ;;  %v791_v18 = vpop.f32.mrb[45].mxu1 }
 0x152   :  { %v873_v19 = vadd.f32 %v872_v0, %v871_v55  ;;  %v2612_v22 = vpop.f32.mrb[46].mxu0  ;;  %v2614_v7 = vpop.f32.mrb[46].mxu1 }
 0x153   :  { %3952 = vst [vmem:[#allocation11_spill] sm:$0xff] %v2612_v22  ;;  %v1069_v23 = vsel %vm828_vm1, %v984_v1, 0.0  ;;  %v874_v24 = vsel %vm828_vm1, %v2612_v22, 0.0  ;;  %v985_v31 = vmul.f32 %v2612_v22, %v2612_v22  ;;  %v666_v38 = vpop.f32.mrb[47].mxu0  ;;  %v794_v39 = vpop.f32.mrb[47].mxu1 }
 0x154   :  { %v1070_v40 = vadd.f32 %v1069_v23, %v1068_v57  ;;  %v875_v47 = vadd.f32 %v874_v24, %v873_v19 }
 0x155   :  { %v1071_v48 = vsel %vm828_vm1, %v985_v31, 0.0 }
 0x156   :  { %v1072_v56 = vadd.f32 %v1071_v48, %v1070_v40 }
 0x158   :  { %v2622_v55 = vpop.f32.mrb[48].mxu0  ;;  %v2624_v0 = vpop.f32.mrb[48].mxu1 }
 0x159   :  { %3953 = vst [vmem:[#allocation12_spill] sm:$0xff] %v2622_v55  ;;  %v876_v1 = vsel %vm828_vm1, %v2622_v55, 0.0  ;;  %v986_v4 = vmul.f32 %v2622_v55, %v2622_v55  ;;  %v671_v18 = vpop.f32.mrb[49].mxu0  ;;  %v799_v58 = vpop.f32.mrb[49].mxu1 }
 0x15a   :  { %v877_v22 = vadd.f32 %v876_v1, %v875_v47  ;;  %v2630_v38 = vpop.f32.mrb[50].mxu0  ;;  %v2632_v57 = vpop.f32.mrb[50].mxu1 }
 0x15b   :  { %3954 = vst [vmem:[#allocation13_spill] sm:$0xff] %v2630_v38  ;;  %3955 = vst [vmem:[#allocation14_spill] sm:$0xff] %v2632_v57  ;;  %v1073_v19 = vsel %vm828_vm1, %v986_v4, 0.0  ;;  %v878_v23 = vsel %vm828_vm1, %v2630_v38, 0.0  ;;  %v987_v24 = vmul.f32 %v2630_v38, %v2630_v38  ;;  %v674_v31 = vpop.f32.mrb[51].mxu0  ;;  %v802_v39 = vpop.f32.mrb[51].mxu1 }
 0x15c   :  { %v1074_v40 = vadd.f32 %v1073_v19, %v1072_v56  ;;  %v879_v48 = vadd.f32 %v878_v23, %v877_v22 }
 0x15d   :  { %v1075_v18 = vsel %vm828_vm1, %v987_v24, 0.0 }
 0x15e   :  { %v1076_v58 = vadd.f32 %v1075_v18, %v1074_v40 }
 0x160   :  { %v2640_v47 = vpop.f32.mrb[52].mxu0  ;;  %v2642_v1 = vpop.f32.mrb[52].mxu1 }
 0x161   :  { %3956 = vst [vmem:[#allocation15_spill] sm:$0xff] %v2640_v47  ;;  %3957 = vst [vmem:[#allocation16_spill] sm:$0xff] %v2642_v1  ;;  %v880_v4 = vsel %vm828_vm1, %v2640_v47, 0.0  ;;  %v988_v55 = vmul.f32 %v2640_v47, %v2640_v47  ;;  %v679_v25 = vpop.f32.mrb[53].mxu0  ;;  %v807_v8 = vpop.f32.mrb[53].mxu1 }
 0x162   :  { %v881_v38 = vadd.f32 %v880_v4, %v879_v48  ;;  %v2648_v31 = vpop.f32.mrb[54].mxu0  ;;  %v2650_v56 = vpop.f32.mrb[54].mxu1 }
 0x163   :  { %3958 = vst [vmem:[#allocation17_spill] sm:$0xff] %v2648_v31  ;;  %3959 = vst [vmem:[#allocation18_spill] sm:$0xff] %v2650_v56  ;;  %v1077_v22 = vsel %vm828_vm1, %v988_v55, 0.0  ;;  %v882_v19 = vsel %vm828_vm1, %v2648_v31, 0.0  ;;  %v989_v23 = vmul.f32 %v2648_v31, %v2648_v31  ;;  %v682_v24 = vpop.f32.mrb[55].mxu0  ;;  %v810_v39 = vpop.f32.mrb[55].mxu1 }
 0x164   :  { %v1078_v40 = vadd.f32 %v1077_v22, %v1076_v58  ;;  %v883_v18 = vadd.f32 %v882_v19, %v881_v38 }
 0x165   :  { %v1079_v25 = vsel %vm828_vm1, %v989_v23, 0.0 }
 0x166   :  { %v1080_v8 = vadd.f32 %v1079_v25, %v1078_v40 }
 0x168   :  { %v2658_v48 = vpop.f32.mrb[56].mxu0  ;;  %v2660_v4 = vpop.f32.mrb[56].mxu1 }
 0x169   :  { %3960 = vst [vmem:[#allocation19_spill] sm:$0xff] %v2658_v48  ;;  %3961 = vst [vmem:[#allocation20_spill] sm:$0xff] %v2660_v4  ;;  %v884_v55 = vsel %vm828_vm1, %v2658_v48, 0.0  ;;  %v990_v47 = vmul.f32 %v2658_v48, %v2658_v48  ;;  %v687_v49 = vpop.f32.mrb[57].mxu0  ;;  %v815_v36 = vpop.f32.mrb[57].mxu1 }
 0x16a   :  { %v885_v31 = vadd.f32 %v884_v55, %v883_v18  ;;  %v2666_v24 = vpop.f32.mrb[58].mxu0  ;;  %v2668_v58 = vpop.f32.mrb[58].mxu1 }
 0x16b   :  { %3962 = vst [vmem:[#allocation21_spill] sm:$0xff] %v2666_v24  ;;  %3963 = vst [vmem:[#allocation22_spill] sm:$0xff] %v2668_v58  ;;  %v1081_v38 = vsel %vm828_vm1, %v990_v47, 0.0  ;;  %v886_v22 = vsel %vm828_vm1, %v2666_v24, 0.0  ;;  %v991_v19 = vmul.f32 %v2666_v24, %v2666_v24  ;;  %v690_v23 = vpop.f32.mrb[59].mxu0  ;;  %v818_v39 = vpop.f32.mrb[59].mxu1 }
 0x16c   :  { %v1082_v40 = vadd.f32 %v1081_v38, %v1080_v8  ;;  %v887_v25 = vadd.f32 %v886_v22, %v885_v31  ;;  %v994_v31 = vmul.f32 %v2408_v11, %v2408_v11 }
 0x16d   :  { %v1083_v49 = vsel %vm828_vm1, %v991_v19, 0.0 }
 0x16e   :  { %v1084_v36 = vadd.f32 %v1083_v49, %v1082_v40  ;;  %v995_v49 = vmul.f32 %v2414_v16, %v2414_v16  ;;  %v1089_v41 = vsel %vm828_vm1, %v994_v31, 0.0 }
 0x170   :  { %v2676_v18 = vpop.f32.mrb[60].mxu0  ;;  %v2678_v55 = vpop.f32.mrb[60].mxu1 }
 0x171   :  { %3964 = vst [vmem:[#allocation23_spill] sm:$0xff] %v2676_v18  ;;  %3965 = vst [vmem:[#allocation24_spill] sm:$0xff] %v2678_v55  ;;  %v888_v47 = vsel %vm828_vm1, %v2676_v18, 0.0  ;;  %v992_v48 = vmul.f32 %v2676_v18, %v2676_v18  ;;  %v695_v9 = vpop.f32.mrb[61].mxu0  ;;  %v823_v60 = vpop.f32.mrb[61].mxu1 }
 0x172   :  { %v889_v24 = vadd.f32 %v888_v47, %v887_v25  ;;  %v2684_v23 = vpop.f32.mrb[62].mxu0  ;;  %v2686_v8 = vpop.f32.mrb[62].mxu1  ;;  %v892_v25 = vsel %vm828_vm1, %v2408_v11, 0.0 }
 0x173   :  { %v1085_v38 = vsel %vm828_vm1, %v992_v48, 0.0  ;;  %v890_v22 = vsel %vm828_vm1, %v2684_v23, 0.0  ;;  %v993_v19 = vmul.f32 %v2684_v23, %v2684_v23  ;;  %v698_v39 = vpop.f32.mrb[63].mxu0  ;;  %v826_v40 = vpop.f32.mrb[63].mxu1 }
 0x174   :  { %v1086_v9 = vadd.f32 %v1085_v38, %v1084_v36  ;;  %v891_v60 = vadd.f32 %v890_v22, %v889_v24  ;;  %v996_v39 = vmul.f32 %v2426_v27, %v2426_v27  ;;  %v1091_v38 = vsel %vm828_vm1, %v995_v49, 0.0 }
 0x175   :  { %v1087_v47 = vsel %vm828_vm1, %v993_v19, 0.0  ;;  %v896_v22 = vsel %vm828_vm1, %v2426_v27, 0.0  ;;  %v997_v19 = vmul.f32 %v2434_v34, %v2434_v34  ;;  %v900_v49 = vsel %vm828_vm1, %v2444_v45, 0.0 }
 0x176   :  { %v893_v18 = vadd.f32 %v892_v25, %v891_v60  ;;  %v1088_v48 = vadd.f32 %v1087_v47, %v1086_v9  ;;  %v1093_v31 = vsel %vm828_vm1, %v996_v39, 0.0  ;;  %v898_v60 = vsel %vm828_vm1, %v2434_v34, 0.0 }
 0x177   :  { %v998_v25 = vmul.f32 %v2444_v45, %v2444_v45  ;;  %v999_v47 = vmul.f32 %v2452_v52, %v2452_v52 }
 0x178   :  { %v895_v36 = vadd.f32 %v894_v32, %v893_v18  ;;  %v1090_v24 = vadd.f32 %v1089_v41, %v1088_v48  ;;  %v1095_v18 = vsel %vm828_vm1, %v997_v19, 0.0 }
 0x179   :  { %v1097_v39 = vsel %vm828_vm1, %v998_v25, 0.0  ;;  %v1099_v19 = vsel %vm828_vm1, %v999_v47, 0.0 }
 0x17a   :  { %v897_v40 = vadd.f32 %v896_v22, %v895_v36  ;;  %v1092_v9 = vadd.f32 %v1091_v38, %v1090_v24  ;;  %v902_v24 = vsel %vm828_vm1, %v2452_v52, 0.0  ;;  %v1000_v38 = vmul.f32 %v2462_v63, %v2462_v63 }
 0x17c   :  { %v899_v32 = vadd.f32 %v898_v60, %v897_v40  ;;  %v1094_v41 = vadd.f32 %v1093_v31, %v1092_v9  ;;  %v904_v9 = vsel %vm828_vm1, %v2462_v63, 0.0  ;;  %v1001_v31 = vmul.f32 %v2470_v6, %v2470_v6 }
 0x17d   :  { %v1101_v25 = vsel %vm828_vm1, %v1000_v38, 0.0 }
 0x17e   :  { %v901_v48 = vadd.f32 %v900_v49, %v899_v32  ;;  %v1096_v36 = vadd.f32 %v1095_v18, %v1094_v41  ;;  %v906_v41 = vsel %vm828_vm1, %v2470_v6, 0.0  ;;  %v1002_v18 = vmul.f32 %v2480_v21, %v2480_v21 }
 0x17f   :  { %v1103_v47 = vsel %vm828_vm1, %v1001_v31, 0.0 }
 0x180   :  { %v903_v22 = vadd.f32 %v902_v24, %v901_v48  ;;  %v1098_v40 = vadd.f32 %v1097_v39, %v1096_v36  ;;  %v908_v36 = vsel %vm828_vm1, %v2480_v21, 0.0  ;;  %v1003_v39 = vmul.f32 %v2488_v30, %v2488_v30 }
 0x181   :  { %v1105_v38 = vsel %vm828_vm1, %v1002_v18, 0.0 }
 0x182   :  { %v905_v60 = vadd.f32 %v904_v9, %v903_v22  ;;  %v1100_v32 = vadd.f32 %v1099_v19, %v1098_v40  ;;  %v910_v40 = vsel %vm828_vm1, %v2488_v30, 0.0  ;;  %v1004_v19 = vmul.f32 %v2498_v43, %v2498_v43 }
 0x183   :  { %v1107_v31 = vsel %vm828_vm1, %v1003_v39, 0.0 }
 0x184   :  { %v907_v49 = vadd.f32 %v906_v41, %v905_v60  ;;  %v1102_v48 = vadd.f32 %v1101_v25, %v1100_v32  ;;  %v912_v32 = vsel %vm828_vm1, %v2498_v43, 0.0  ;;  %v1005_v25 = vmul.f32 %v2506_v54, %v2506_v54 }
 0x185   :  { %v1109_v18 = vsel %vm828_vm1, %v1004_v19, 0.0 }
 0x186   :  { %v1104_v24 = vadd.f32 %v1103_v47, %v1102_v48  ;;  %v909_v22 = vadd.f32 %v908_v36, %v907_v49  ;;  %v914_v48 = vsel %vm828_vm1, %v2506_v54, 0.0  ;;  %v1006_v47 = vmul.f32 %v2516_v3, %v2516_v3 }
 0x187   :  { %v1111_v39 = vsel %vm828_vm1, %v1005_v25, 0.0 }
 0x188   :  { %v911_v9 = vadd.f32 %v910_v40, %v909_v22  ;;  %v1106_v60 = vadd.f32 %v1105_v38, %v1104_v24  ;;  %v916_v22 = vsel %vm828_vm1, %v2516_v3, 0.0  ;;  %v1007_v38 = vmul.f32 %v2524_v14, %v2524_v14 }
 0x189   :  { %v1113_v19 = vsel %vm828_vm1, %v1006_v47, 0.0 }
 0x18a   :  { %v913_v41 = vadd.f32 %v912_v32, %v911_v9  ;;  %v1108_v49 = vadd.f32 %v1107_v31, %v1106_v60  ;;  %v918_v60 = vsel %vm828_vm1, %v2524_v14, 0.0  ;;  %v1008_v31 = vmul.f32 %v2534_v35, %v2534_v35 }
 0x18b   :  { %v1115_v25 = vsel %vm828_vm1, %v1007_v38, 0.0 }
 0x18c   :  { %v915_v36 = vadd.f32 %v914_v48, %v913_v41  ;;  %v1110_v24 = vadd.f32 %v1109_v18, %v1108_v49  ;;  %v920_v49 = vsel %vm828_vm1, %v2534_v35, 0.0  ;;  %v1009_v18 = vmul.f32 %v2542_v46, %v2542_v46 }
 0x18d   :  { %v1117_v47 = vsel %vm828_vm1, %v1008_v31, 0.0 }
 0x18e   :  { %v917_v40 = vadd.f32 %v916_v22, %v915_v36  ;;  %v1112_v9 = vadd.f32 %v1111_v39, %v1110_v24  ;;  %v922_v24 = vsel %vm828_vm1, %v2542_v46, 0.0  ;;  %v1010_v39 = vmul.f32 %v2552_v61, %v2552_v61 }
 0x18f   :  { %v1119_v38 = vsel %vm828_vm1, %v1009_v18, 0.0 }
 0x190   :  { %v919_v32 = vadd.f32 %v918_v60, %v917_v40  ;;  %v1114_v41 = vadd.f32 %v1113_v19, %v1112_v9  ;;  %v924_v9 = vsel %vm828_vm1, %v2552_v61, 0.0  ;;  %v1011_v19 = vmul.f32 %v2560_v12, %v2560_v12 }
 0x191   :  { %v1121_v31 = vsel %vm828_vm1, %v1010_v39, 0.0 }
 0x192   :  { %v921_v48 = vadd.f32 %v920_v49, %v919_v32  ;;  %v1116_v36 = vadd.f32 %v1115_v25, %v1114_v41  ;;  %v926_v41 = vsel %vm828_vm1, %v2560_v12, 0.0  ;;  %v1012_v25 = vmul.f32 %v2570_v37, %v2570_v37 }
 0x193   :  { %v1123_v18 = vsel %vm828_vm1, %v1011_v19, 0.0 }
 0x194   :  { %v923_v22 = vadd.f32 %v922_v24, %v921_v48  ;;  %v1118_v40 = vadd.f32 %v1117_v47, %v1116_v36  ;;  %v928_v36 = vsel %vm828_vm1, %v2570_v37, 0.0  ;;  %v1013_v47 = vmul.f32 %v2578_v50, %v2578_v50 }
 0x195   :  { %v1125_v39 = vsel %vm828_vm1, %v1012_v25, 0.0 }
 0x196   :  { %v925_v60 = vadd.f32 %v924_v9, %v923_v22  ;;  %v1120_v32 = vadd.f32 %v1119_v38, %v1118_v40  ;;  %v930_v40 = vsel %vm828_vm1, %v2578_v50, 0.0  ;;  %v1014_v38 = vmul.f32 %v2588_v17, %v2588_v17 }
 0x197   :  { %v1127_v19 = vsel %vm828_vm1, %v1013_v47, 0.0 }
 0x198   :  { %v1122_v49 = vadd.f32 %v1121_v31, %v1120_v32  ;;  %v927_v48 = vadd.f32 %v926_v41, %v925_v60  ;;  %v932_v32 = vsel %vm828_vm1, %v2588_v17, 0.0  ;;  %v1015_v31 = vmul.f32 %v2596_v28, %v2596_v28 }
 0x199   :  { %v1129_v25 = vsel %vm828_vm1, %v1014_v38, 0.0 }
 0x19a   :  { %v1124_v24 = vadd.f32 %v1123_v18, %v1122_v49  ;;  %v929_v22 = vadd.f32 %v928_v36, %v927_v48  ;;  %v934_v48 = vsel %vm828_vm1, %v2596_v28, 0.0  ;;  %v1016_v18 = vmul.f32 %v2606_v59, %v2606_v59 }
 0x19b   :  { %v1131_v47 = vsel %vm828_vm1, %v1015_v31, 0.0 }
 0x19c   :  { %v1126_v9 = vadd.f32 %v1125_v39, %v1124_v24  ;;  %v931_v60 = vadd.f32 %v930_v40, %v929_v22  ;;  %v936_v22 = vsel %vm828_vm1, %v2606_v59, 0.0  ;;  %v1017_v39 = vmul.f32 %v2614_v7, %v2614_v7 }
 0x19d   :  { %v1133_v38 = vsel %vm828_vm1, %v1016_v18, 0.0 }
 0x19e   :  { %v1128_v41 = vadd.f32 %v1127_v19, %v1126_v9  ;;  %v933_v49 = vadd.f32 %v932_v32, %v931_v60  ;;  %v938_v60 = vsel %vm828_vm1, %v2614_v7, 0.0  ;;  %v1018_v19 = vmul.f32 %v2624_v0, %v2624_v0 }
 0x19f   :  { %v1135_v31 = vsel %vm828_vm1, %v1017_v39, 0.0 }
 0x1a0   :  { %v1130_v36 = vadd.f32 %v1129_v25, %v1128_v41  ;;  %v935_v24 = vadd.f32 %v934_v48, %v933_v49  ;;  %v940_v49 = vsel %vm828_vm1, %v2624_v0, 0.0  ;;  %v1019_v25 = vmul.f32 %v2632_v57, %v2632_v57 }
 0x1a1   :  { %v1137_v18 = vsel %vm828_vm1, %v1018_v19, 0.0 }
 0x1a2   :  { %v1132_v40 = vadd.f32 %v1131_v47, %v1130_v36  ;;  %v937_v9 = vadd.f32 %v936_v22, %v935_v24  ;;  %v942_v24 = vsel %vm828_vm1, %v2632_v57, 0.0  ;;  %v1020_v47 = vmul.f32 %v2642_v1, %v2642_v1 }
 0x1a3   :  { %v1139_v39 = vsel %vm828_vm1, %v1019_v25, 0.0 }
 0x1a4   :  { %v1134_v32 = vadd.f32 %v1133_v38, %v1132_v40  ;;  %v939_v41 = vadd.f32 %v938_v60, %v937_v9  ;;  %v944_v9 = vsel %vm828_vm1, %v2642_v1, 0.0  ;;  %v1021_v38 = vmul.f32 %v2650_v56, %v2650_v56 }
 0x1a5   :  { %v1141_v19 = vsel %vm828_vm1, %v1020_v47, 0.0 }
 0x1a6   :  { %v1136_v48 = vadd.f32 %v1135_v31, %v1134_v32  ;;  %v941_v36 = vadd.f32 %v940_v49, %v939_v41  ;;  %v946_v41 = vsel %vm828_vm1, %v2650_v56, 0.0  ;;  %v1022_v31 = vmul.f32 %v2660_v4, %v2660_v4 }
 0x1a7   :  { %v1143_v25 = vsel %vm828_vm1, %v1021_v38, 0.0 }
 0x1a8   :  { %v1138_v22 = vadd.f32 %v1137_v18, %v1136_v48  ;;  %v943_v40 = vadd.f32 %v942_v24, %v941_v36  ;;  %v948_v36 = vsel %vm828_vm1, %v2660_v4, 0.0  ;;  %v1023_v18 = vmul.f32 %v2668_v58, %v2668_v58 }
 0x1a9   :  { %v1024_v24 = vmul.f32 %v2678_v55, %v2678_v55 }
 0x1aa   :  { %v1140_v60 = vadd.f32 %v1139_v39, %v1138_v22  ;;  %v945_v32 = vadd.f32 %v944_v9, %v943_v40  ;;  %v1145_v40 = vsel %vm828_vm1, %v1022_v31, 0.0  ;;  %v950_v39 = vsel %vm828_vm1, %v2668_v58, 0.0 }
 0x1ab   :  { %v952_v9 = vsel %vm828_vm1, %v2678_v55, 0.0  ;;  %v954_v31 = vsel %vm828_vm1, %v2686_v8, 0.0 }
 0x1ac   :  { %v1142_v49 = vadd.f32 %v1141_v19, %v1140_v60  ;;  %v947_v48 = vadd.f32 %v946_v41, %v945_v32  ;;  %v1147_v32 = vsel %vm828_vm1, %v1023_v18, 0.0  ;;  %v1149_v19 = vsel %vm828_vm1, %v1024_v24, 0.0 }
 0x1ad   :  { %v1025_v41 = vmul.f32 %v2686_v8, %v2686_v8 }
 0x1ae   :  { %v1144_v47 = vadd.f32 %v1143_v25, %v1142_v49  ;;  %v949_v22 = vadd.f32 %v948_v36, %v947_v48 }
 0x1af   :  { %v1151_v36 = vsel %vm828_vm1, %v1025_v41, 0.0 }
 0x1b0   :  { %v1146_v38 = vadd.f32 %v1145_v40, %v1144_v47  ;;  %v951_v60 = vadd.f32 %v950_v39, %v949_v22 }
 0x1b2   :  { %v1148_v4 = vadd.f32 %v1147_v32, %v1146_v38  ;;  %v953_v49 = vadd.f32 %v952_v9, %v951_v60 }
 0x1b4   :  { %v1150_v48 = vadd.f32 %v1149_v19, %v1148_v4  ;;  %v955_v25 = vadd.f32 %v954_v31, %v953_v49 }
 0x1b6   :  { %v956_v58 = vrot.slane %v955_v25, 4  ;;  %v1152_v55 = vadd.f32 %v1151_v36, %v1150_v48 }
 0x1b8   :  { %v957_v47 = vadd.f32 %v956_v58, %v955_v25  ;;  %v1153_v22 = vrot.slane %v1152_v55, 4 }
 0x1ba   :  { %v958_v40 = vrot.slane %v957_v47, 2  ;;  %v1154_v18 = vadd.f32 %v1153_v22, %v1152_v55 }
 0x1bc   :  { %v959_v39 = vadd.f32 %v958_v40, %v957_v47  ;;  %v1155_v24 = vrot.slane %v1154_v18, 2 }
 0x1be   :  { %v960_v56 = vrot.slane %v959_v39, 1  ;;  %v1156_v1 = vadd.f32 %v1155_v24, %v1154_v18  ;;  %v1198_v18 = vlaneseq }
 0x1c0   :  { %v961_v57 = vadd.f32 %v960_v56, %v959_v39  ;;  %v1157_v38 = vrot.slane %v1156_v1, 1  ;;  %v1199_v39 = vshrl.u32 %v1198_v18, 7 }
 0x1c2   :  { %1169 = vrot.lane.b32.xlu1 %v961_v57, %s2124_s0  ;;  %1160 = vrot.lane.b32.xlu0 %v961_v57, %s2125_s26  ;;  %v1158_v4 = vadd.f32 %v1157_v38, %v1156_v1  ;;  %v2857_v24 = vsub.s32 0, %v1199_v39 }
 0x1c6   :  { %1173 = vrot.lane.b32.xlu1 %v1158_v4, %s2124_s0  ;;  %1165 = vrot.lane.b32.xlu0 %v1158_v4, %s2125_s26 }
 0x1ca   :  { %1181 = vrot.lane.b32.xlu1 %v1158_v4, %s2126_s27  ;;  %1177 = vrot.lane.b32.xlu0 %v961_v57, %s2126_s27 }
 0x234   :  { %v1170_v58 = vpop.permute.xlu1 %1169  ;;  %v1161_v9 = vpop.permute.xlu0 %1160 }
 0x235   :  { %v1163_v60 = vadd.f32 %v1161_v9, %v961_v57  ;;  %v1190_v57 = vld [vmem:[%s3900_s2] sm:$0x1] }
 0x237   :  { %v1172_v49 = vadd.f32 %v1170_v58, %v1163_v60  ;;  %v1194_v58 = vld [vmem:[%s3901_s3] sm:$0x1] }
 0x238   :  { %v1174_v55 = vpop.permute.xlu1 %1173  ;;  %v1166_v32 = vpop.permute.xlu0 %1165 }
 0x239   :  { %v1168_v19 = vadd.f32 %v1166_v32, %v1158_v4 }
 0x23b   :  { %v1176_v41 = vadd.f32 %v1174_v55, %v1168_v19 }
 0x23c   :  { %v1182_v56 = vpop.permute.xlu1 %1181  ;;  %v1178_v31 = vpop.permute.xlu0 %1177 }
 0x23d   :  { %v1184_v48 = vadd.f32 %v1182_v56, %v1176_v41  ;;  %v1180_v25 = vadd.f32 %v1178_v31, %v1172_v49 }
 0x23f   :  { %v1186_v36 = vmul.f32 0.00048828125, %v1180_v25  ;;  %v1187_v47 = vmul.f32 0.00048828125, %v1184_v48 }
 0x241   :  { %v1188_v1 = vmul.f32 %v1186_v36, %v1186_v36 }
 0x243   :  { %v1189_v22 = vsub.f32 %v1187_v47, %v1188_v1 }
 0x245   :  { %v1191_v40 = vadd.f32 1e-05, %v1189_v22 }
 0x247   :  { %2121 = vrsqrt.f32 %v1191_v40 }
 0x251   :  { %v2122_v38 = vpop.eup %2121 }
 0x252   :  { %v1193_v4 = vmul.f32 %v2122_v38, %v1190_v57  ;;  %v3966_v57 = vld [vmem:[#allocation2_spill] sm:$0xff]  ;;  %v3967_v38 = vld [vmem:[#allocation3_spill] sm:$0xff] }
 0x254   :  { %v1195_v9 = vmul.f32 %v1193_v4, %v1186_v36  ;;  %v1201_v60 = vrot.slane %v1193_v4, %v2857_v24 }
 0x256   :  { %v1196_v55 = vsub.f32 %v1194_v58, %v1195_v9  ;;  %1205 = vrot.lane.b32.xlu1 %v1201_v60, %s2127_s6  ;;  %1202 = vrot.lane.b32.xlu0 %v1201_v60, %s2128_s7  ;;  %v3969_v58 = vld [vmem:[#allocation5_spill] sm:$0xff]  ;;  %v3970_v9 = vld [vmem:[#allocation6_spill] sm:$0xff] }
 0x258   :  { %v1220_v32 = vrot.slane %v1196_v55, %v2857_v24 }
 0x25a   :  { %1208 = vrot.lane.b32.xlu0 %v1201_v60, %s2129_s8  ;;  %1221 = vrot.lane.b32.xlu1 %v1220_v32, %s2128_s7  ;;  %v3971_v60 = vld [vmem:[#allocation7_spill] sm:$0xff] }
 0x25e   :  { %1224 = vrot.lane.b32.xlu0 %v1220_v32, %s2127_s6  ;;  %1227 = vrot.lane.b32.xlu1 %v1220_v32, %s2129_s8  ;;  %v3972_v32 = vld [vmem:[#allocation8_spill] sm:$0xff] }
 0x2c8   :  { %v1203_v19 = vpop.permute.xlu0 %1202  ;;  %v1206_v41 = vpop.permute.xlu1 %1205 }
 0x2c9   :  { %v1212_v49 = vsel %vm1211_vm2, %v1193_v4, %v1203_v19  ;;  %v3968_v4 = vld [vmem:[#allocation4_spill] sm:$0xff] }
 0x2ca   :  { %v1213_v56 = vsel %vm442_vm0, %v1212_v49, %v1206_v41  ;;  %v3973_v41 = vld [vmem:[#allocation9_spill] sm:$0xff] }
 0x2cc   :  { %v1209_v31 = vpop.permute.xlu0 %1208  ;;  %v1222_v36 = vpop.permute.xlu1 %1221 }
 0x2cd   :  { %v1215_v48 = vsel %vm1214_vm3, %v1213_v56, %v1209_v31  ;;  %v1230_v40 = vsel %vm1211_vm2, %v1196_v55, %v1222_v36  ;;  %v3974_v56 = vld [vmem:[#allocation10_spill] sm:$0xff] }
 0x2ce   :  { %v2867_v25 = vrot.slane %v1215_v48, %v2857_v24  ;;  %v3975_v48 = vld [vmem:[#allocation11_spill] sm:$0xff] }
 0x2d0   :  { %v2871_v47 = vmul.f32 %v2867_v25, %v2406_v10  ;;  %v2875_v1 = vmul.f32 %v2867_v25, %v2412_v15  ;;  %v2879_v22 = vmul.f32 %v2867_v25, %v2424_v26  ;;  %v2883_v18 = vmul.f32 %v2867_v25, %v2432_v33 }
 0x2d1   :  { %v2887_v39 = vmul.f32 %v2867_v25, %v2442_v44  ;;  %v2891_v10 = vmul.f32 %v2867_v25, %v2450_v51  ;;  %v2895_v15 = vmul.f32 %v2867_v25, %v2460_v62  ;;  %v2899_v26 = vmul.f32 %v2867_v25, %v2468_v5 }
 0x2d2   :  { %v2903_v33 = vmul.f32 %v2867_v25, %v2478_v20  ;;  %v2907_v44 = vmul.f32 %v2867_v25, %v2486_v29  ;;  %v2911_v51 = vmul.f32 %v2867_v25, %v2496_v42  ;;  %v2915_v62 = vmul.f32 %v2867_v25, %v2504_v53 }
 0x2d3   :  { %v2919_v5 = vmul.f32 %v2867_v25, %v2514_v2  ;;  %v2923_v20 = vmul.f32 %v2867_v25, %v2522_v13  ;;  %v2927_v29 = vmul.f32 %v2867_v25, %v3966_v57  ;;  %v2931_v42 = vmul.f32 %v2867_v25, %v3967_v38  ;;  %v3977_v57 = vld [vmem:[#allocation12_spill] sm:$0xff] }
 0x2d4   :  { %v2935_v53 = vmul.f32 %v2867_v25, %v3968_v4  ;;  %v2939_v2 = vmul.f32 %v2867_v25, %v3969_v58  ;;  %v2943_v13 = vmul.f32 %v2867_v25, %v3970_v9  ;;  %v2947_v55 = vmul.f32 %v2867_v25, %v3971_v60  ;;  %v3979_v4 = vld [vmem:[#allocation13_spill] sm:$0xff]  ;;  %v3980_v9 = vld [vmem:[#allocation15_spill] sm:$0xff] }
 0x2d5   :  { %v2951_v19 = vmul.f32 %v2867_v25, %v3972_v32  ;;  %v2955_v49 = vmul.f32 %v2867_v25, %v3973_v41  ;;  %v2959_v31 = vmul.f32 %v2867_v25, %v3974_v56  ;;  %v2963_v36 = vmul.f32 %v2867_v25, %v3975_v48  ;;  %v3981_v32 = vld [vmem:[#allocation17_spill] sm:$0xff]  ;;  %v3982_v56 = vld [vmem:[#allocation19_spill] sm:$0xff] }
 0x2d6   :  { %v2967_v38 = vmul.f32 %v2867_v25, %v3977_v57  ;;  %v2971_v58 = vmul.f32 %v2867_v25, %v3979_v4  ;;  %v2975_v60 = vmul.f32 %v2867_v25, %v3980_v9  ;;  %v2979_v41 = vmul.f32 %v2867_v25, %v3981_v32 }
 0x2d7   :  { %3976 = vst [vmem:[#allocation2_spill] sm:$0xff] %v2963_v36  ;;  %v2983_v48 = vmul.f32 %v2867_v25, %v3982_v56  ;;  %v3983_v36 = vld [vmem:[#allocation21_spill] sm:$0xff]  ;;  %v2995_v9 = vmul.f32 %v2867_v25, %v2684_v23  ;;  %v2999_v32 = vmul.f32 %v2867_v25, %v2408_v11  ;;  %v3003_v56 = vmul.f32 %v2867_v25, %v2414_v16 }
 0x2d8   :  { %3978 = vst [vmem:[#allocation3_spill] sm:$0xff] %v2967_v38  ;;  %v2987_v57 = vmul.f32 %v2867_v25, %v3983_v36  ;;  %v3984_v38 = vld [vmem:[#allocation23_spill] sm:$0xff]  ;;  %v3007_v36 = vmul.f32 %v2867_v25, %v2426_v27  ;;  %v3015_v23 = vmul.f32 %v2867_v25, %v2444_v45  ;;  %v3019_v11 = vmul.f32 %v2867_v25, %v2452_v52 }
 0x2d9   :  { %v2991_v4 = vmul.f32 %v2867_v25, %v3984_v38  ;;  %v3011_v38 = vmul.f32 %v2867_v25, %v2434_v34  ;;  %v3023_v16 = vmul.f32 %v2867_v25, %v2462_v63  ;;  %v3027_v27 = vmul.f32 %v2867_v25, %v2470_v6 }
 0x2da   :  { %3985 = vst [vmem:[#allocation4_spill] sm:$0xff] %v3019_v11  ;;  %v3031_v34 = vmul.f32 %v2867_v25, %v2480_v21  ;;  %v3035_v45 = vmul.f32 %v2867_v25, %v2488_v30  ;;  %v3039_v52 = vmul.f32 %v2867_v25, %v2498_v43  ;;  %v1225_v11 = vpop.permute.xlu0 %1224  ;;  %v3043_v63 = vmul.f32 %v2867_v25, %v2506_v54 }
 0x2db   :  { %v3047_v6 = vmul.f32 %v2867_v25, %v2516_v3  ;;  %v3051_v21 = vmul.f32 %v2867_v25, %v2524_v14  ;;  %v3055_v30 = vmul.f32 %v2867_v25, %v2534_v35  ;;  %v3059_v43 = vmul.f32 %v2867_v25, %v2542_v46 }
 0x2dc   :  { %3986 = vst [vmem:[#allocation5_spill] sm:$0xff] %v3035_v45  ;;  %v1228_v45 = vpop.permute.xlu1 %1227  ;;  %v3063_v54 = vmul.f32 %v2867_v25, %v2552_v61  ;;  %v3067_v3 = vmul.f32 %v2867_v25, %v2560_v12  ;;  %v3071_v14 = vmul.f32 %v2867_v25, %v2570_v37  ;;  %v3075_v35 = vmul.f32 %v2867_v25, %v2578_v50 }
 0x2dd   :  { %v3079_v46 = vmul.f32 %v2867_v25, %v2588_v17  ;;  %v3083_v61 = vmul.f32 %v2867_v25, %v2596_v28  ;;  %v3088_v12 = vmul.f32 %v2867_v25, %v2606_v59  ;;  %v3092_v37 = vmul.f32 %v2867_v25, %v2614_v7  ;;  %v3994_v59 = vld [vmem:[#allocation18_spill] sm:$0xff] }
 0x2de   :  { %3987 = vst [vmem:[#allocation6_spill] sm:$0xff] %v3063_v54  ;;  %v1231_v54 = vsel %vm442_vm0, %v1230_v40, %v1225_v11  ;;  %v3096_v50 = vmul.f32 %v2867_v25, %v2624_v0  ;;  %v3109_v11 = vmul.f32 %v2867_v25, %v3994_v59 }
 0x2df   :  { %3988 = vst [vmem:[#allocation7_spill] sm:$0xff] %v3079_v46  ;;  %3989 = vst [vmem:[#allocation8_spill] sm:$0xff] %v3083_v61  ;;  %v1232_v17 = vsel %vm1214_vm3, %v1231_v54, %v1228_v45  ;;  %v3991_v46 = vld [vmem:[#allocation14_spill] sm:$0xff]  ;;  %v3993_v61 = vld [vmem:[#allocation16_spill] sm:$0xff] }
 0x2e0   :  { %3990 = vst [vmem:[#allocation9_spill] sm:$0xff] %v3092_v37  ;;  %v3101_v28 = vmul.f32 %v2867_v25, %v3991_v46  ;;  %v3105_v40 = vmul.f32 %v2867_v25, %v3993_v61  ;;  %v3112_v7 = vrot.slane %v1232_v17, %v2857_v24  ;;  %v3995_v37 = vld [vmem:[#allocation20_spill] sm:$0xff]  ;;  %v3996_v45 = vld [vmem:[#allocation22_spill] sm:$0xff]  ;;  %v3128_v61 = vmul.f32 %v2867_v25, %v2686_v8 }
 0x2e1   :  { %v3116_v0 = vmul.f32 %v2867_v25, %v3995_v37  ;;  %v3120_v54 = vmul.f32 %v2867_v25, %v3996_v45  ;;  %v3997_v46 = vld [vmem:[#allocation24_spill] sm:$0xff]  ;;  %v3999_v45 = vld [vmem:[#allocation3_spill] sm:$0xff] }
 0x2e2   :  { %3992 = vst [vmem:[#allocation10_spill] sm:$0xff] %v3101_v28  ;;  %v3124_v28 = vmul.f32 %v2867_v25, %v3997_v46  ;;  %v3132_v24 = vadd.f32 %v3112_v7, %v2871_v47  ;;  %v3136_v37 = vadd.f32 %v3112_v7, %v2875_v1  ;;  %v3140_v17 = vadd.f32 %v3112_v7, %v2879_v22 }
 0x2e3   :  { %v3144_v59 = vadd.f32 %v3112_v7, %v2883_v18  ;;  %v3148_v8 = vadd.f32 %v3112_v7, %v2887_v39  ;;  %v3152_v25 = vadd.f32 %v3112_v7, %v2891_v10  ;;  %v3156_v47 = vadd.f32 %v3112_v7, %v2895_v15 }
 0x2e4   :  { %v3160_v1 = vadd.f32 %v3112_v7, %v2899_v26  ;;  %v3164_v22 = vadd.f32 %v3112_v7, %v2903_v33  ;;  %v3168_v18 = vadd.f32 %v3112_v7, %v2907_v44  ;;  %v3172_v39 = vadd.f32 %v3112_v7, %v2911_v51 }
 0x2e5   :  { %v3176_v10 = vadd.f32 %v3112_v7, %v2915_v62  ;;  %v3180_v15 = vadd.f32 %v3112_v7, %v2919_v5  ;;  %v3184_v26 = vadd.f32 %v3112_v7, %v2923_v20  ;;  %v3188_v33 = vadd.f32 %v3112_v7, %v2927_v29 }
 0x2e6   :  { %v3192_v44 = vadd.f32 %v3112_v7, %v2931_v42  ;;  %v3196_v51 = vadd.f32 %v3112_v7, %v2935_v53  ;;  %v3200_v62 = vadd.f32 %v3112_v7, %v2939_v2  ;;  %v3204_v5 = vadd.f32 %v3112_v7, %v2943_v13  ;;  %v3998_v2 = vld [vmem:[#allocation2_spill] sm:$0xff] }
 0x2e7   :  { %v3208_v20 = vadd.f32 %v3112_v7, %v2947_v55  ;;  %v3212_v29 = vadd.f32 %v3112_v7, %v2951_v19  ;;  %v3216_v42 = vadd.f32 %v3112_v7, %v2955_v49  ;;  %v3220_v53 = vadd.f32 %v3112_v7, %v2959_v31 }
 0x2e8   :  { %v3224_v13 = vadd.f32 %v3112_v7, %v3998_v2  ;;  %v3228_v55 = vadd.f32 %v3112_v7, %v3999_v45  ;;  %v3232_v19 = vadd.f32 %v3112_v7, %v2971_v58  ;;  %v3236_v49 = vadd.f32 %v3112_v7, %v2975_v60  ;;  %v4003_v45 = vld [vmem:[#allocation4_spill] sm:$0xff] }
 0x2e9   :  { %v3240_v31 = vadd.f32 %v3112_v7, %v2979_v41  ;;  %v3244_v46 = vadd.f32 %v3112_v7, %v2983_v48  ;;  %v3248_v2 = vadd.f32 %v3112_v7, %v2987_v57  ;;  %v3252_v58 = vadd.f32 %v3112_v7, %v2991_v4 }
 0x2ea   :  { %v3256_v60 = vadd.f32 %v3112_v7, %v2995_v9  ;;  %v3260_v41 = vadd.f32 %v3112_v7, %v2999_v32  ;;  %v3264_v48 = vadd.f32 %v3112_v7, %v3003_v56  ;;  %v3268_v57 = vadd.f32 %v3112_v7, %v3007_v36 }
 0x2eb   :  { %v3272_v4 = vadd.f32 %v3112_v7, %v3011_v38  ;;  %v3276_v9 = vadd.f32 %v3112_v7, %v3015_v23  ;;  %v3280_v32 = vadd.f32 %v3112_v7, %v4003_v45  ;;  %v3284_v56 = vadd.f32 %v3112_v7, %v3023_v16 }
 0x2ec   :  { %4000 = vst [vmem:[#allocation11_spill] sm:$0xff] %v3256_v60  ;;  %v3288_v36 = vadd.f32 %v3112_v7, %v3027_v27  ;;  %v3292_v38 = vadd.f32 %v3112_v7, %v3031_v34  ;;  %v3300_v45 = vadd.f32 %v3112_v7, %v3039_v52  ;;  %v3304_v16 = vadd.f32 %v3112_v7, %v3043_v63 }
 0x2ed   :  { %4001 = vst [vmem:[#allocation12_spill] sm:$0xff] %v3272_v4  ;;  %4002 = vst [vmem:[#allocation13_spill] sm:$0xff] %v3276_v9  ;;  %v4006_v4 = vld [vmem:[#allocation5_spill] sm:$0xff]  ;;  %v3308_v27 = vadd.f32 %v3112_v7, %v3047_v6  ;;  %v3312_v34 = vadd.f32 %v3112_v7, %v3051_v21  ;;  %v3320_v52 = vadd.f32 %v3112_v7, %v3059_v43 }
 0x2ee   :  { %4004 = vst [vmem:[#allocation15_spill] sm:$0xff] %v3284_v56  ;;  %4005 = vst [vmem:[#allocation17_spill] sm:$0xff] %v3292_v38  ;;  %v3296_v23 = vadd.f32 %v3112_v7, %v4006_v4  ;;  %v3316_v4 = vadd.f32 %v3112_v7, %v3055_v30  ;;  %v3328_v6 = vadd.f32 %v3112_v7, %v3067_v3 }
 0x2ef   :  { %4007 = vst [vmem:[#allocation19_spill] sm:$0xff] %v3300_v45  ;;  %4009 = vst [vmem:[#allocation23_spill] sm:$0xff] %v3320_v52  ;;  %v4010_v45 = vld [vmem:[#allocation6_spill] sm:$0xff]  ;;  %v3332_v21 = vadd.f32 %v3112_v7, %v3071_v14  ;;  %v3336_v30 = vadd.f32 %v3112_v7, %v3075_v35  ;;  %v4016_v52 = vld [vmem:[#allocation8_spill] sm:$0xff]  ;;  %v3348_v3 = vadd.f32 %v3112_v7, %v3088_v12 }
 0x2f0   :  { %4008 = vst [vmem:[#allocation21_spill] sm:$0xff] %v3316_v4  ;;  %v3324_v63 = vadd.f32 %v3112_v7, %v4010_v45  ;;  %4012 = vst [vmem:[#allocation16_spill] sm:$0xff] %v3328_v6  ;;  %v4015_v4 = vld [vmem:[#allocation7_spill] sm:$0xff]  ;;  %v3344_v45 = vadd.f32 %v3112_v7, %v4016_v52  ;;  %v4017_v6 = vld [vmem:[#allocation9_spill] sm:$0xff]  ;;  %v3356_v35 = vadd.f32 %v3112_v7, %v3096_v50 }
 0x2f1   :  { %4013 = vst [vmem:[#allocation18_spill] sm:$0xff] %v3332_v21  ;;  %4014 = vst [vmem:[#allocation20_spill] sm:$0xff] %v3336_v30  ;;  %v3340_v43 = vadd.f32 %v3112_v7, %v4015_v4  ;;  %v3352_v14 = vadd.f32 %v3112_v7, %v4017_v6  ;;  %v4018_v30 = vld [vmem:[#allocation10_spill] sm:$0xff]  ;;  %v3364_v52 = vadd.f32 %v3112_v7, %v3105_v40 }
 0x2f2   :  { %4011 = vst [vmem:[#allocation14_spill] sm:$0xff] %v3324_v63  ;;  %v3360_v4 = vadd.f32 %v3112_v7, %v4018_v30  ;;  %v3368_v12 = vadd.f32 %v3112_v7, %v3109_v11  ;;  %v3372_v6 = vadd.f32 %v3112_v7, %v3116_v0  ;;  %v3376_v50 = vadd.f32 %v3112_v7, %v3120_v54 }
 0x2f3   :  { %4019 = vst [vmem:[#allocation22_spill] sm:$0xff] %v3364_v52  ;;  %v3380_v30 = vadd.f32 %v3112_v7, %v3124_v28  ;;  %v3384_v40 = vadd.f32 %v3112_v7, %v3128_v61  ;;  %v4030_v9 = vmov %v3364_v52  ;;  %v4038_v61 = vmax.f32 %v3144_v59, 0.0 }
 0x2f4   :  { %4020 = vst [vmem:[#allocation24_spill] sm:$0xff] %v3368_v12  ;;  %4021 = vst [vmem:[#allocation2_spill] sm:$0xff] %v3372_v6  ;;  %v4031_v63 = vmov %v3368_v12  ;;  %v4032_v56 = vmov %v3372_v6  ;;  %v4033_v21 = vmov %v3376_v50  ;;  %v4035_v6 = vmax.f32 %v3132_v24, 0.0 }
 0x2f5   :  { %4022 = vst [vmem:[#allocation3_spill] sm:$0xff] %v3376_v50  ;;  %4023 = vst [vmem:[#allocation4_spill] sm:$0xff] %v3380_v30  ;;  %v4034_v38 = vmov %v3380_v30  ;;  %v4036_v50 = vmax.f32 %v3136_v37, 0.0  ;;  %v4037_v30 = vmax.f32 %v3140_v17, 0.0  ;;  %v1930_v11 = vpack.c.bf16 %v4038_v61, %v4038_v61 }
 0x2f6   :  { %v4025_v60 = vld [vmem:[#allocation19_spill] sm:$0xff]  ;;  %v1927_v52 = vpack.c.bf16 %v4035_v6, %v4035_v6  ;;  %v4039_v12 = vmax.f32 %v3148_v8, 0.0  ;;  %v4040_v24 = vmax.f32 %v3152_v25, 0.0  ;;  %v4041_v37 = vmax.f32 %v3156_v47, 0.0 }
 0x2f7   :  { %v4026_v54 = vld [vmem:[#allocation21_spill] sm:$0xff]  ;;  %v1928_v28 = vpack.c.bf16 %v4036_v50, %v4036_v50  ;;  %v1929_v7 = vpack.c.bf16 %v4037_v30, %v4037_v30  ;;  %v4042_v17 = vmax.f32 %v3160_v1, 0.0  ;;  %v4043_v59 = vmax.f32 %v3164_v22, 0.0  ;;  %1693 = vst.msk [vmem:[%s3902_s4 + $0xc] sm:$0xf] %vm1689_vm4, %v1930_v11 }
 0x2f8   :  { %v1931_v0 = vpack.c.bf16 %v4039_v12, %v4039_v12  ;;  %v1932_v6 = vpack.c.bf16 %v4040_v24, %v4040_v24  ;;  %v1933_v50 = vpack.c.bf16 %v4041_v37, %v4041_v37  ;;  %v4044_v8 = vmax.f32 %v3168_v18, 0.0  ;;  %1690 = vst.msk [vmem:[%s3902_s4] sm:$0xf] %vm1689_vm4, %v1927_v52 }
 0x2f9   :  { %v1934_v30 = vpack.c.bf16 %v4042_v17, %v4042_v17  ;;  %v1935_v61 = vpack.c.bf16 %v4043_v59, %v4043_v59  ;;  %v4045_v25 = vmax.f32 %v3172_v39, 0.0  ;;  %v4046_v47 = vmax.f32 %v3176_v10, 0.0  ;;  %1691 = vst.msk [vmem:[%s3902_s4 + $0x4] sm:$0xf] %vm1689_vm4, %v1928_v28  ;;  %1692 = vst.msk [vmem:[%s3902_s4 + $0x8] sm:$0xf] %vm1689_vm4, %v1929_v7 }
 0x2fa   :  { %v1936_v12 = vpack.c.bf16 %v4044_v8, %v4044_v8  ;;  %v4047_v1 = vmax.f32 %v3180_v15, 0.0  ;;  %v4048_v18 = vmax.f32 %v3184_v26, 0.0  ;;  %v4049_v10 = vmax.f32 %v3188_v33, 0.0  ;;  %1694 = vst.msk [vmem:[%s3902_s4 + $0x10] sm:$0xf] %vm1689_vm4, %v1931_v0 }
 0x2fb   :  { %v1937_v24 = vpack.c.bf16 %v4045_v25, %v4045_v25  ;;  %v1938_v37 = vpack.c.bf16 %v4046_v47, %v4046_v47  ;;  %v4050_v28 = vmax.f32 %v3192_v44, 0.0  ;;  %1695 = vst.msk [vmem:[%s3902_s4 + $0x14] sm:$0xf] %vm1689_vm4, %v1932_v6  ;;  %1696 = vst.msk [vmem:[%s3902_s4 + $0x18] sm:$0xf] %vm1689_vm4, %v1933_v50  ;;  %v4051_v15 = vmax.f32 %v3196_v51, 0.0 }
 0x2fc   :  { %v1939_v22 = vpack.c.bf16 %v4047_v1, %v4047_v1  ;;  %v1940_v39 = vpack.c.bf16 %v4048_v18, %v4048_v18  ;;  %v1941_v52 = vpack.c.bf16 %v4049_v10, %v4049_v10  ;;  %1697 = vst.msk [vmem:[%s3902_s4 + $0x1c] sm:$0xf] %vm1689_vm4, %v1934_v30  ;;  %v4052_v33 = vmax.f32 %v3200_v62, 0.0  ;;  %1698 = vst.msk [vmem:[%s3902_s4 + $0x20] sm:$0xf] %vm1689_vm4, %v1935_v61  ;;  %v4066_v1 = vld [vmem:[#allocation11_spill] sm:$0xff] }
 0x2fd   :  { %v1942_v7 = vpack.c.bf16 %v4050_v28, %v4050_v28  ;;  %v1943_v26 = vpack.c.bf16 %v4051_v15, %v4051_v15  ;;  %v4053_v11 = vmax.f32 %v3204_v5, 0.0  ;;  %v4054_v6 = vmax.f32 %v3208_v20, 0.0  ;;  %1699 = vst.msk [vmem:[%s3902_s4 + $0x24] sm:$0xf] %vm1689_vm4, %v1936_v12  ;;  %1700 = vst.msk [vmem:[%s3902_s4 + $0x28] sm:$0xf] %vm1689_vm4, %v1937_v24 }
 0x2fe   :  { %v1944_v44 = vpack.c.bf16 %v4052_v33, %v4052_v33  ;;  %1701 = vst.msk [vmem:[%s3902_s4 + $0x2c] sm:$0xf] %vm1689_vm4, %v1938_v37  ;;  %v4055_v51 = vmax.f32 %v3212_v29, 0.0  ;;  %v4056_v5 = vmax.f32 %v3216_v42, 0.0  ;;  %v4057_v17 = vmax.f32 %v3220_v53, 0.0  ;;  %v4071_v28 = vld [vmem:[#allocation12_spill] sm:$0xff] }
 0x2ff   :  { %v1945_v0 = vpack.c.bf16 %v4053_v11, %v4053_v11  ;;  %v1946_v50 = vpack.c.bf16 %v4054_v6, %v4054_v6  ;;  %v4058_v59 = vmax.f32 %v3224_v13, 0.0  ;;  %1702 = vst.msk [vmem:[%s3902_s4 + $0x30] sm:$0xf] %vm1689_vm4, %v1939_v22  ;;  %1703 = vst.msk [vmem:[%s3902_s4 + $0x34] sm:$0xf] %vm1689_vm4, %v1940_v39  ;;  %v4059_v29 = vmax.f32 %v3228_v55, 0.0 }
 0x300   :  { %v1947_v62 = vpack.c.bf16 %v4055_v51, %v4055_v51  ;;  %v1948_v20 = vpack.c.bf16 %v4056_v5, %v4056_v5  ;;  %v1949_v30 = vpack.c.bf16 %v4057_v17, %v4057_v17  ;;  %1704 = vst.msk [vmem:[%s3902_s4 + $0x38] sm:$0xf] %vm1689_vm4, %v1941_v52  ;;  %1705 = vst.msk [vmem:[%s3902_s4 + $0x3c] sm:$0xf] %vm1689_vm4, %v1942_v7  ;;  %v4060_v53 = vmax.f32 %v3232_v19, 0.0 }
 0x301   :  { %v1950_v61 = vpack.c.bf16 %v4058_v59, %v4058_v59  ;;  %v1951_v42 = vpack.c.bf16 %v4059_v29, %v4059_v29  ;;  %v4061_v8 = vmax.f32 %v3236_v49, 0.0  ;;  %v4062_v25 = vmax.f32 %v3240_v31, 0.0  ;;  %1706 = vst.msk [vmem:[%s3902_s4 + $0x40] sm:$0xf] %vm1689_vm4, %v1943_v26  ;;  %1707 = vst.msk [vmem:[%s3902_s4 + $0x44] sm:$0xf] %vm1689_vm4, %v1944_v44 }
 0x302   :  { %v1952_v13 = vpack.c.bf16 %v4060_v53, %v4060_v53  ;;  %1708 = vst.msk [vmem:[%s3902_s4 + $0x48] sm:$0xf] %vm1689_vm4, %v1945_v0  ;;  %1709 = vst.msk [vmem:[%s3902_s4 + $0x4c] sm:$0xf] %vm1689_vm4, %v1946_v50  ;;  %v4063_v55 = vmax.f32 %v3244_v46, 0.0  ;;  %v4064_v49 = vmax.f32 %v3248_v2, 0.0 }
 0x303   :  { %v1953_v12 = vpack.c.bf16 %v4061_v8, %v4061_v8  ;;  %v1954_v24 = vpack.c.bf16 %v4062_v25, %v4062_v25  ;;  %v4065_v47 = vmax.f32 %v3252_v58, 0.0  ;;  %v4067_v22 = vmax.f32 %v4066_v1, 0.0  ;;  %1710 = vst.msk [vmem:[%s3902_s4 + $0x50] sm:$0xf] %vm1689_vm4, %v1947_v62  ;;  %1711 = vst.msk [vmem:[%s3902_s4 + $0x54] sm:$0xf] %vm1689_vm4, %v1948_v20 }
 0x304   :  { %v1955_v19 = vpack.c.bf16 %v4063_v55, %v4063_v55  ;;  %v1956_v31 = vpack.c.bf16 %v4064_v49, %v4064_v49  ;;  %1712 = vst.msk [vmem:[%s3902_s4 + $0x58] sm:$0xf] %vm1689_vm4, %v1949_v30  ;;  %1713 = vst.msk [vmem:[%s3902_s4 + $0x5c] sm:$0xf] %vm1689_vm4, %v1950_v61  ;;  %v4068_v46 = vmax.f32 %v3260_v41, 0.0  ;;  %v4069_v58 = vmax.f32 %v3264_v48, 0.0 }
 0x305   :  { %v1957_v37 = vpack.c.bf16 %v4065_v47, %v4065_v47  ;;  %v1958_v18 = vpack.c.bf16 %v4067_v22, %v4067_v22  ;;  %v4070_v10 = vmax.f32 %v3268_v57, 0.0  ;;  %v4072_v7 = vmax.f32 %v4071_v28, 0.0  ;;  %1714 = vst.msk [vmem:[%s3902_s4 + $0x60] sm:$0xf] %vm1689_vm4, %v1951_v42  ;;  %1715 = vst.msk [vmem:[%s3902_s4 + $0x64] sm:$0xf] %vm1689_vm4, %v1952_v13 }
 0x306   :  { %v1959_v2 = vpack.c.bf16 %v4068_v46, %v4068_v46  ;;  %v1960_v39 = vpack.c.bf16 %v4069_v58, %v4069_v58  ;;  %1716 = vst.msk [vmem:[%s3902_s4 + $0x68] sm:$0xf] %vm1689_vm4, %v1953_v12  ;;  %1717 = vst.msk [vmem:[%s3902_s4 + $0x6c] sm:$0xf] %vm1689_vm4, %v1954_v24  ;;  %v4073_v41 = vld [vmem:[#allocation13_spill] sm:$0xff]  ;;  %v4075_v26 = vmax.f32 %v3280_v32, 0.0 }
 0x307   :  { %v1961_v52 = vpack.c.bf16 %v4070_v10, %v4070_v10  ;;  %v1962_v15 = vpack.c.bf16 %v4072_v7, %v4072_v7  ;;  %v4074_v48 = vmax.f32 %v4073_v41, 0.0  ;;  %v4076_v44 = vld [vmem:[#allocation15_spill] sm:$0xff]  ;;  %v4078_v6 = vmax.f32 %v3288_v36, 0.0  ;;  %1718 = vst.msk [vmem:[%s3902_s4 + $0x70] sm:$0xf] %vm1689_vm4, %v1955_v19  ;;  %v4079_v32 = vld [vmem:[#allocation17_spill] sm:$0xff] }
 0x308   :  { %v1964_v33 = vpack.c.bf16 %v4075_v26, %v4075_v26  ;;  %v4077_v11 = vmax.f32 %v4076_v44, 0.0  ;;  %1719 = vst.msk [vmem:[%s3902_s4 + $0x74] sm:$0xf] %vm1689_vm4, %v1956_v31  ;;  %1720 = vst.msk [vmem:[%s3902_s4 + $0x78] sm:$0xf] %vm1689_vm4, %v1957_v37  ;;  %v4080_v36 = vmax.f32 %v4079_v32, 0.0 }
 0x309   :  { %v1963_v57 = vpack.c.bf16 %v4074_v48, %v4074_v48  ;;  %v1966_v50 = vpack.c.bf16 %v4078_v6, %v4078_v6  ;;  %1721 = vst.msk [vmem:[%s3902_s4 + $0x7c] sm:$0xf] %vm1689_vm4, %v1958_v18  ;;  %v4081_v62 = vmax.f32 %v3296_v23, 0.0  ;;  %v4082_v20 = vmax.f32 %v4025_v60, 0.0  ;;  %1722 = vst.msk [vmem:[%s3902_s4 + $0x80] sm:$0xf] %vm1689_vm4, %v1959_v2 }
 0x30a   :  { %v1965_v0 = vpack.c.bf16 %v4077_v11, %v4077_v11  ;;  %v1967_v51 = vpack.c.bf16 %v4080_v36, %v4080_v36  ;;  %v4083_v30 = vmax.f32 %v3304_v16, 0.0  ;;  %1723 = vst.msk [vmem:[%s3902_s4 + $0x84] sm:$0xf] %vm1689_vm4, %v1960_v39  ;;  %1724 = vst.msk [vmem:[%s3902_s4 + $0x88] sm:$0xf] %vm1689_vm4, %v1961_v52  ;;  %v4084_v60 = vmax.f32 %v3308_v27, 0.0 }
 0x30b   :  { %v1968_v5 = vpack.c.bf16 %v4081_v62, %v4081_v62  ;;  %v1969_v17 = vpack.c.bf16 %v4082_v20, %v4082_v20  ;;  %1725 = vst.msk [vmem:[%s3902_s4 + $0x8c] sm:$0xf] %vm1689_vm4, %v1962_v15  ;;  %v4085_v16 = vmax.f32 %v3312_v34, 0.0  ;;  %v4086_v29 = vmax.f32 %v4026_v54, 0.0  ;;  %v4087_v53 = vld [vmem:[#allocation23_spill] sm:$0xff]  ;;  %v4089_v27 = vld [vmem:[#allocation14_spill] sm:$0xff] }
 0x30c   :  { %v1970_v59 = vpack.c.bf16 %v4083_v30, %v4083_v30  ;;  %v1971_v23 = vpack.c.bf16 %v4084_v60, %v4084_v60  ;;  %v4088_v13 = vmax.f32 %v4087_v53, 0.0  ;;  %1726 = vst.msk [vmem:[%s3902_s4 + $0x90] sm:$0xf] %vm1689_vm4, %v1963_v57  ;;  %1727 = vst.msk [vmem:[%s3902_s4 + $0x94] sm:$0xf] %vm1689_vm4, %v1964_v33  ;;  %v4090_v34 = vmax.f32 %v4089_v27, 0.0 }
 0x30d   :  { %v1972_v61 = vpack.c.bf16 %v4085_v16, %v4085_v16  ;;  %v1973_v42 = vpack.c.bf16 %v4086_v29, %v4086_v29  ;;  %1728 = vst.msk [vmem:[%s3902_s4 + $0x98] sm:$0xf] %vm1689_vm4, %v1965_v0  ;;  %1729 = vst.msk [vmem:[%s3902_s4 + $0x9c] sm:$0xf] %vm1689_vm4, %v1966_v50  ;;  %v4091_v12 = vld [vmem:[#allocation16_spill] sm:$0xff]  ;;  %v4093_v55 = vld [vmem:[#allocation18_spill] sm:$0xff] }
 0x30e   :  { %v1974_v8 = vpack.c.bf16 %v4088_v13, %v4088_v13  ;;  %v1975_v54 = vpack.c.bf16 %v4090_v34, %v4090_v34  ;;  %v4092_v25 = vmax.f32 %v4091_v12, 0.0  ;;  %v4094_v19 = vmax.f32 %v4093_v55, 0.0  ;;  %v4095_v31 = vld [vmem:[#allocation20_spill] sm:$0xff]  ;;  %1730 = vst.msk [vmem:[%s3902_s4 + $0xa0] sm:$0xf] %vm1689_vm4, %v1967_v51 }
 0x30f   :  { %v4096_v47 = vmax.f32 %v4095_v31, 0.0  ;;  %1731 = vst.msk [vmem:[%s3902_s4 + $0xa4] sm:$0xf] %vm1689_vm4, %v1968_v5  ;;  %1732 = vst.msk [vmem:[%s3902_s4 + $0xa8] sm:$0xf] %vm1689_vm4, %v1969_v17  ;;  %v4097_v1 = vmax.f32 %v3340_v43, 0.0 }
 0x310   :  { %v1976_v24 = vpack.c.bf16 %v4092_v25, %v4092_v25  ;;  %v1977_v49 = vpack.c.bf16 %v4094_v19, %v4094_v19  ;;  %1733 = vst.msk [vmem:[%s3902_s4 + $0xac] sm:$0xf] %vm1689_vm4, %v1970_v59  ;;  %v4098_v18 = vmax.f32 %v3344_v45, 0.0  ;;  %v4099_v2 = vmax.f32 %v3348_v3, 0.0  ;;  %1734 = vst.msk [vmem:[%s3902_s4 + $0xb0] sm:$0xf] %vm1689_vm4, %v1971_v23 }
 0x311   :  { %v1978_v37 = vpack.c.bf16 %v4096_v47, %v4096_v47  ;;  %v1979_v22 = vpack.c.bf16 %v4097_v1, %v4097_v1  ;;  %v4100_v39 = vmax.f32 %v3352_v14, 0.0  ;;  %1735 = vst.msk [vmem:[%s3902_s4 + $0xb4] sm:$0xf] %vm1689_vm4, %v1972_v61  ;;  %1736 = vst.msk [vmem:[%s3902_s4 + $0xb8] sm:$0xf] %vm1689_vm4, %v1973_v42  ;;  %v4101_v43 = vmax.f32 %v3356_v35, 0.0 }
 0x312   :  { %v1980_v46 = vpack.c.bf16 %v4098_v18, %v4098_v18  ;;  %v1981_v58 = vpack.c.bf16 %v4099_v2, %v4099_v2  ;;  %1737 = vst.msk [vmem:[%s3902_s4 + $0xbc] sm:$0xf] %vm1689_vm4, %v1974_v8  ;;  %v4102_v3 = vmax.f32 %v3360_v4, 0.0  ;;  %v4103_v52 = vmax.f32 %v4030_v9, 0.0  ;;  %1738 = vst.msk [vmem:[%s3902_s4 + $0xc0] sm:$0xf] %vm1689_vm4, %v1975_v54 }
 0x313   :  { %v1982_v10 = vpack.c.bf16 %v4100_v39, %v4100_v39  ;;  %v1983_v45 = vpack.c.bf16 %v4101_v43, %v4101_v43  ;;  %v4104_v7 = vmax.f32 %v4031_v63, 0.0  ;;  %1739 = vst.msk [vmem:[%s3902_s4 + $0xc4] sm:$0xf] %vm1689_vm4, %v1976_v24  ;;  %1740 = vst.msk [vmem:[%s3902_s4 + $0xc8] sm:$0xf] %vm1689_vm4, %v1977_v49  ;;  %v4105_v9 = vmax.f32 %v4032_v56, 0.0 }
 0x314   :  { %v1984_v14 = vpack.c.bf16 %v4102_v3, %v4102_v3  ;;  %v1985_v28 = vpack.c.bf16 %v4103_v52, %v4103_v52  ;;  %1741 = vst.msk [vmem:[%s3902_s4 + $0xcc] sm:$0xf] %vm1689_vm4, %v1978_v37  ;;  %v4106_v35 = vmax.f32 %v4033_v21, 0.0  ;;  %v4107_v41 = vmax.f32 %v4034_v38, 0.0  ;;  %1742 = vst.msk [vmem:[%s3902_s4 + $0xd0] sm:$0xf] %vm1689_vm4, %v1979_v22 }
 0x315   :  { %v1986_v15 = vpack.c.bf16 %v4104_v7, %v4104_v7  ;;  %v1987_v63 = vpack.c.bf16 %v4105_v9, %v4105_v9  ;;  %v4108_v57 = vmax.f32 %v3384_v40, 0.0  ;;  %1743 = vst.msk [vmem:[%s3902_s4 + $0xd4] sm:$0xf] %vm1689_vm4, %v1980_v46  ;;  %1744 = vst.msk [vmem:[%s3902_s4 + $0xd8] sm:$0xf] %vm1689_vm4, %v1981_v58 }
 0x316   :  { %v1988_v4 = vpack.c.bf16 %v4106_v35, %v4106_v35  ;;  %v1989_v48 = vpack.c.bf16 %v4107_v41, %v4107_v41  ;;  %1745 = vst.msk [vmem:[%s3902_s4 + $0xdc] sm:$0xf] %vm1689_vm4, %v1982_v10  ;;  %1746 = vst.msk [vmem:[%s3902_s4 + $0xe0] sm:$0xf] %vm1689_vm4, %v1983_v45 }
 0x317   :  { %v1990_v26 = vpack.c.bf16 %v4108_v57, %v4108_v57  ;;  %1747 = vst.msk [vmem:[%s3902_s4 + $0xe4] sm:$0xf] %vm1689_vm4, %v1984_v14  ;;  %1748 = vst.msk [vmem:[%s3902_s4 + $0xe8] sm:$0xf] %vm1689_vm4, %v1985_v28 }
 0x318   :  { %1749 = vst.msk [vmem:[%s3902_s4 + $0xec] sm:$0xf] %vm1689_vm4, %v1986_v15  ;;  %1750 = vst.msk [vmem:[%s3902_s4 + $0xf0] sm:$0xf] %vm1689_vm4, %v1987_v63 }
 0x319   :  { %1751 = vst.msk [vmem:[%s3902_s4 + $0xf4] sm:$0xf] %vm1689_vm4, %v1988_v4  ;;  %1752 = vst.msk [vmem:[%s3902_s4 + $0xf8] sm:$0xf] %vm1689_vm4, %v1989_v48 }
 0x31a   :  { %1753 = vst.msk [vmem:[%s3902_s4 + $0xfc] sm:$0xf] %vm1689_vm4, %v1990_v26 }

// kernel: generator_forward.9
= control target key start
LH: loop header
LB: loop body
LE: loop exit
PB: predicated region body
PF: predicated region fallthrough
CT: control target
= control target key end

     0   :  { %s1012_s9 = smov 0   ;;  %s1014_s10 = smov 0   ;;  %s1227_s0 = inlined_call_operand.vmem [shape: bf16[12,72], index: 0, kind: input, shape index: {}]   ;;  %s1228_s1 = inlined_call_operand.vmem [shape: bf16[72,2048], index: 1, kind: input, shape index: {}]   ;;  %s1229_s2 = inlined_call_operand.vmem [shape: bf16[12,2048], index: 2, kind: output, shape index: {}]  }
   0x1   :  { %s1016_s11 = smov 0  }
   0x2 LB: > { %s824_s12 = sadd.s32 4294967295, %s994_s11   ;;  %s1029_s13 = sadd.s32 1, %s994_s11   ;;  %s994_s11 = sphi %s1016_s11, %s1233_s11   ;;  %s990_s10 = sphi %s1014_s10, %s1232_s10   ;;  %s986_s9 = sphi %s1012_s9, %s1231_s9  }
   0x3   : > { %s37_s14 = ssub.s32 %s994_s11, %s1029_s13  ;;  %s40_s15 = sadd.s32 1, %s990_s10 }
   0x4   : > { %p38_p0 = scmp.eq.s32.totalorder %s37_s14, 0  ;;  %p47_p1 = scmp.ne.s32.totalorder %s990_s10, %s986_s9 }
   0x5   : > { %p48_p2 = scmp.eq.s32.totalorder %s994_s11, 0  ;;  %p77_p3 = scmp.eq.s32.totalorder %s824_s12, 1 }
   0x6   : > { %s1040_s16 = scalar_select %p38_p0, %s990_s10, %s40_s15  }
   0x7   : > { %p49_p4 = por %p48_p2, %p47_p1  ;;  %p1042_p5 = por %p77_p3, %p47_p1 }
   0x8   : > { %p827_p6 = scmp.ge.s32.totalorder %s994_s11, 2 }
   0xa   : > { %102 = sbr.rel (%p827_p6) target bundleno = 40 (0x28), region = 20 }
  0x11   : > { %105 = sbr.rel (!%p49_p4) target bundleno = 40 (0x28), region = 24  ;;  %s107_s18 = sand.u32 (%p49_p4), 1, %s990_s10  }
  0x12   : > { %s894_s19 = sshll.u32 (%p49_p4), %s994_s11, 5  ;;  %s904_s20 = smul.u32 (%p49_p4), 288, %s107_s18 }
  0x13   : > { %s1052_s23 = scalar_lea.vmem (%p49_p4), %s1228_s1, %s894_s19 }
  0x14   : > { %v125_v0 = vld [vmem:[%s1052_s23] sm:$0xff] (%p49_p4)  ;;  %v127_v1 = vld [vmem:[%s1052_s23 + $0x8] sm:$0xff] (%p49_p4)  ;;  %v129_v2 = vld [vmem:[%s1052_s23 + $0x10] sm:$0xff] (%p49_p4)  ;;  %s1060_s24 = scalar_lea.vmem (%p49_p4), [#allocation2], %s904_s20 }
  0x15   : > { %v131_v3 = vld [vmem:[%s1052_s23 + $0x18] sm:$0xff] (%p49_p4)  ;;  %v133_v4 = vld [vmem:[%s1052_s23 + $0x40] sm:$0xff] (%p49_p4)  ;;  %v135_v5 = vld [vmem:[%s1052_s23 + $0x48] sm:$0xff] (%p49_p4)  ;;  %126 = vst [vmem:[%s1060_s24] sm:$0xff] (%p49_p4), %v125_v0 }
  0x16   : > { %128 = vst [vmem:[%s1060_s24 + $0x8] sm:$0xff] (%p49_p4), %v127_v1  ;;  %130 = vst [vmem:[%s1060_s24 + $0x10] sm:$0xff] (%p49_p4), %v129_v2  ;;  %v137_v6 = vld [vmem:[%s1052_s23 + $0x50] sm:$0xff] (%p49_p4)  ;;  %v139_v7 = vld [vmem:[%s1052_s23 + $0x58] sm:$0xff] (%p49_p4) }
  0x17   : > { %132 = vst [vmem:[%s1060_s24 + $0x18] sm:$0xff] (%p49_p4), %v131_v3  ;;  %134 = vst [vmem:[%s1060_s24 + $0x20] sm:$0xff] (%p49_p4), %v133_v4  ;;  %v141_v8 = vld [vmem:[%s1052_s23 + $0x80] sm:$0xff] (%p49_p4)  ;;  %v143_v9 = vld [vmem:[%s1052_s23 + $0x88] sm:$0xff] (%p49_p4) }
  0x18   : > { %136 = vst [vmem:[%s1060_s24 + $0x28] sm:$0xff] %v135_v5  ;;  %138 = vst [vmem:[%s1060_s24 + $0x30] sm:$0xff] %v137_v6  ;;  %v145_v10 = vld [vmem:[%s1052_s23 + $0x90] sm:$0xff]  ;;  %v147_v11 = vld [vmem:[%s1052_s23 + $0x98] sm:$0xff] }
  0x19   : > { %140 = vst [vmem:[%s1060_s24 + $0x38] sm:$0xff] %v139_v7  ;;  %142 = vst [vmem:[%s1060_s24 + $0x40] sm:$0xff] %v141_v8  ;;  %v149_v12 = vld [vmem:[%s1052_s23 + $0xc0] sm:$0xff]  ;;  %v151_v13 = vld [vmem:[%s1052_s23 + $0xc8] sm:$0xff] }
  0x1a   : > { %144 = vst [vmem:[%s1060_s24 + $0x48] sm:$0xff] %v143_v9  ;;  %146 = vst [vmem:[%s1060_s24 + $0x50] sm:$0xff] %v145_v10  ;;  %v153_v14 = vld [vmem:[%s1052_s23 + $0xd0] sm:$0xff]  ;;  %v155_v15 = vld [vmem:[%s1052_s23 + $0xd8] sm:$0xff] }
  0x1b   : > { %148 = vst [vmem:[%s1060_s24 + $0x58] sm:$0xff] %v147_v11  ;;  %150 = vst [vmem:[%s1060_s24 + $0x60] sm:$0xff] %v149_v12  ;;  %v157_v16 = vld [vmem:[%s1052_s23 + $0x100] sm:$0xff]  ;;  %v159_v17 = vld [vmem:[%s1052_s23 + $0x108] sm:$0xff] }
  0x1c   : > { %152 = vst [vmem:[%s1060_s24 + $0x68] sm:$0xff] %v151_v13  ;;  %154 = vst [vmem:[%s1060_s24 + $0x70] sm:$0xff] %v153_v14  ;;  %v161_v18 = vld [vmem:[%s1052_s23 + $0x110] sm:$0xff]  ;;  %v163_v19 = vld [vmem:[%s1052_s23 + $0x118] sm:$0xff] }
  0x1d   : > { %156 = vst [vmem:[%s1060_s24 + $0x78] sm:$0xff] %v155_v15  ;;  %158 = vst [vmem:[%s1060_s24 + $0x80] sm:$0xff] %v157_v16  ;;  %v165_v20 = vld [vmem:[%s1052_s23 + $0x140] sm:$0xff]  ;;  %v167_v21 = vld [vmem:[%s1052_s23 + $0x148] sm:$0xff] }
  0x1e   : > { %160 = vst [vmem:[%s1060_s24 + $0x88] sm:$0xff] %v159_v17  ;;  %162 = vst [vmem:[%s1060_s24 + $0x90] sm:$0xff] %v161_v18  ;;  %v169_v22 = vld [vmem:[%s1052_s23 + $0x150] sm:$0xff]  ;;  %v171_v23 = vld [vmem:[%s1052_s23 + $0x158] sm:$0xff] }
  0x1f   : > { %164 = vst [vmem:[%s1060_s24 + $0x98] sm:$0xff] %v163_v19  ;;  %166 = vst [vmem:[%s1060_s24 + $0xa0] sm:$0xff] %v165_v20  ;;  %v173_v24 = vld [vmem:[%s1052_s23 + $0x180] sm:$0xff]  ;;  %v175_v25 = vld [vmem:[%s1052_s23 + $0x188] sm:$0xff] }
  0x20   : > { %168 = vst [vmem:[%s1060_s24 + $0xa8] sm:$0xff] %v167_v21  ;;  %170 = vst [vmem:[%s1060_s24 + $0xb0] sm:$0xff] %v169_v22  ;;  %v177_v26 = vld [vmem:[%s1052_s23 + $0x190] sm:$0xff]  ;;  %v179_v27 = vld [vmem:[%s1052_s23 + $0x198] sm:$0xff] }
  0x21   : > { %172 = vst [vmem:[%s1060_s24 + $0xb8] sm:$0xff] %v171_v23  ;;  %174 = vst [vmem:[%s1060_s24 + $0xc0] sm:$0xff] %v173_v24  ;;  %v181_v28 = vld [vmem:[%s1052_s23 + $0x1c0] sm:$0xff]  ;;  %v183_v29 = vld [vmem:[%s1052_s23 + $0x1c8] sm:$0xff] }
  0x22   : > { %176 = vst [vmem:[%s1060_s24 + $0xc8] sm:$0xff] %v175_v25  ;;  %178 = vst [vmem:[%s1060_s24 + $0xd0] sm:$0xff] %v177_v26  ;;  %v185_v30 = vld [vmem:[%s1052_s23 + $0x1d0] sm:$0xff]  ;;  %v187_v31 = vld [vmem:[%s1052_s23 + $0x1d8] sm:$0xff] }
  0x23   : > { %180 = vst [vmem:[%s1060_s24 + $0xd8] sm:$0xff] %v179_v27  ;;  %182 = vst [vmem:[%s1060_s24 + $0xe0] sm:$0xff] %v181_v28  ;;  %v189_v32 = vld [vmem:[%s1052_s23 + $0x200] sm:$0xff]  ;;  %v191_v33 = vld [vmem:[%s1052_s23 + $0x208] sm:$0xff] }
  0x24   : > { %184 = vst [vmem:[%s1060_s24 + $0xe8] sm:$0xff] %v183_v29  ;;  %186 = vst [vmem:[%s1060_s24 + $0xf0] sm:$0xff] %v185_v30  ;;  %v193_v34 = vld [vmem:[%s1052_s23 + $0x210] sm:$0xff]  ;;  %v195_v35 = vld [vmem:[%s1052_s23 + $0x218] sm:$0xff] }
  0x25   : > { %188 = vst [vmem:[%s1060_s24 + $0xf8] sm:$0xff] %v187_v31  ;;  %190 = vst [vmem:[%s1060_s24 + $0x100] sm:$0xff] %v189_v32 }
  0x26   : > { %192 = vst [vmem:[%s1060_s24 + $0x108] sm:$0xff] %v191_v33  ;;  %194 = vst [vmem:[%s1060_s24 + $0x110] sm:$0xff] %v193_v34 }
  0x27   : > { %196 = vst [vmem:[%s1060_s24 + $0x118] sm:$0xff] %v195_v35 }
  0x28 PF: > { %p830_p7 = scmp.ge.s32.totalorder %s994_s11, 1  ;;  %p201_p8 = scmp.lt.s32.totalorder %s994_s11, 3 }
  0x2a   : > { %p202_p9 = pnand %p830_p7, %p201_p8 }
  0x2b   : > { %s208_s25 = sand.u32 (!%p202_p9), 1, %s986_s9   ;;  %v996_v36 = vmov (!%p202_p9), 0   ;;  %vm458_vm0 = vcmask (!%p202_p9), 1043456   ;;  %v935_v21 = vld [vmem:[%s1227_s0] sm:$0x3f] (!%p202_p9)   ;;  %vm454_vm1 = vcmask (!%p202_p9), 588800  }
  0x2c   : > { %205 = sbr.rel (%p202_p9) target bundleno = 333 (0x14d), region = 47  ;;  %515 = vmatprep.mubr.bf16.mxu0 (!%p202_p9), %v996_v36  ;;  %558 = vmatprep.mubr.bf16.mxu1 (!%p202_p9), %v996_v36  ;;  %s831_s30 = sshll.u32 (!%p202_p9), %s208_s25, 6 }
  0x2d   : > { %s905_s26 = smul.u32 (!%p202_p9), 288, %s208_s25  ;;  %s1192_s3 = scalar_lea.vmem (!%p202_p9), [#allocation3], %s831_s30 }
  0x2f   : > { %s1135_s27 = scalar_lea.vmem (!%p202_p9), [#allocation2], %s905_s26 }
  0x30   : > { %v233_v37 = vld [vmem:[%s1135_s27] sm:$0xff] (!%p202_p9)  ;;  %v234_v39 = vld [vmem:[%s1135_s27 + $0x8] sm:$0xff] (!%p202_p9)  ;;  %v235_v11 = vld [vmem:[%s1135_s27 + $0x10] sm:$0xff] (!%p202_p9) }
  0x31   : > { %v237_v38 = vld [vmem:[%s1135_s27 + $0x20] sm:$0xff] (!%p202_p9)  ;;  %v238_v41 = vld [vmem:[%s1135_s27 + $0x28] sm:$0xff] (!%p202_p9)  ;;  %v239_v12 = vld [vmem:[%s1135_s27 + $0x30] sm:$0xff] (!%p202_p9) }
  0x32   : > { %v834_v40 = vcombine.high (!%p202_p9), %v233_v37, %v237_v38  ;;  %v833_v42 = vcombine.low (!%p202_p9), %v233_v37, %v237_v38  ;;  %v241_v43 = vld [vmem:[%s1135_s27 + $0x40] sm:$0xff] (!%p202_p9)  ;;  %v836_v45 = vcombine.high (!%p202_p9), %v234_v39, %v238_v41  ;;  %v835_v46 = vcombine.low (!%p202_p9), %v234_v39, %v238_v41  ;;  %v242_v48 = vld [vmem:[%s1135_s27 + $0x48] sm:$0xff] (!%p202_p9)  ;;  %v236_v13 = vld [vmem:[%s1135_s27 + $0x18] sm:$0xff] (!%p202_p9) }
  0x33   : > { %v245_v44 = vld [vmem:[%s1135_s27 + $0x60] sm:$0xff]  ;;  %v246_v49 = vld [vmem:[%s1135_s27 + $0x68] sm:$0xff]  ;;  %v240_v14 = vld [vmem:[%s1135_s27 + $0x38] sm:$0xff]  ;;  %v838_v16 = vcombine.high %v235_v11, %v239_v12  ;;  %v837_v24 = vcombine.low %v235_v11, %v239_v12  ;;  %s903_s4 = sshll.u32 (%p1042_p5), %s824_s12, 5 }
  0x34   : > { %v842_v47 = vcombine.high %v241_v43, %v245_v44  ;;  %v249_v50 = vld [vmem:[%s1135_s27 + $0x80] sm:$0xff]  ;;  %483 = vmatprep.subr.bf16.mxu0 %v834_v40  ;;  %v844_v51 = vcombine.high %v242_v48, %v246_v49  ;;  %v250_v53 = vld [vmem:[%s1135_s27 + $0x88] sm:$0xff]  ;;  %526 = vmatprep.subr.bf16.mxu1 %v836_v45  ;;  %v841_v55 = vcombine.low %v241_v43, %v245_v44  ;;  %v243_v19 = vld [vmem:[%s1135_s27 + $0x50] sm:$0xff]  ;;  %s736_s7 = scalar_lea.vmem (%p1042_p5), %s1229_s2, %s903_s4 }
  0x35   : > { %v253_v52 = vld [vmem:[%s1135_s27 + $0xa0] sm:$0xff]  ;;  %v254_v54 = vld [vmem:[%s1135_s27 + $0xa8] sm:$0xff]  ;;  %484 = vmatpush1.bf16.msra.mxu0 %v833_v42  ;;  %527 = vmatpush1.bf16.msra.mxu1 %v835_v46  ;;  %v843_v56 = vcombine.low %v242_v48, %v246_v49  ;;  %v840_v18 = vcombine.high %v236_v13, %v240_v14  ;;  %v247_v20 = vld [vmem:[%s1135_s27 + $0x70] sm:$0xff]  ;;  %v839_v25 = vcombine.low %v236_v13, %v240_v14 }
  0x36   : > { %485 = vmatprep.subr.bf16.mxu0 %v842_v47  ;;  %v850_v57 = vcombine.high %v249_v50, %v253_v52  ;;  %528 = vmatprep.subr.bf16.mxu1 %v844_v51  ;;  %v852_v58 = vcombine.high %v250_v53, %v254_v54  ;;  %v257_v59 = vld [vmem:[%s1135_s27 + $0xc0] sm:$0xff]  ;;  %v258_v61 = vld [vmem:[%s1135_s27 + $0xc8] sm:$0xff]  ;;  %v849_v63 = vcombine.low %v249_v50, %v253_v52  ;;  %v244_v22 = vld [vmem:[%s1135_s27 + $0x58] sm:$0xff] }
  0x37   : > { %v261_v60 = vld [vmem:[%s1135_s27 + $0xe0] sm:$0xff]  ;;  %v262_v62 = vld [vmem:[%s1135_s27 + $0xe8] sm:$0xff]  ;;  %v851_v0 = vcombine.low %v250_v53, %v254_v54  ;;  %v248_v23 = vld [vmem:[%s1135_s27 + $0x78] sm:$0xff]  ;;  %v846_v26 = vcombine.high %v243_v19, %v247_v20  ;;  %v845_v32 = vcombine.low %v243_v19, %v247_v20 }
  0x38   : > { %v858_v1 = vcombine.high %v257_v59, %v261_v60  ;;  %v860_v2 = vcombine.high %v258_v61, %v262_v62  ;;  %v265_v3 = vld [vmem:[%s1135_s27 + $0x100] sm:$0xff]  ;;  %v266_v4 = vld [vmem:[%s1135_s27 + $0x108] sm:$0xff]  ;;  %v857_v5 = vcombine.low %v257_v59, %v261_v60  ;;  %v859_v6 = vcombine.low %v258_v61, %v262_v62  ;;  %v251_v28 = vld [vmem:[%s1135_s27 + $0x90] sm:$0xff] }
  0x39   : > { %486 = vmatpush1.bf16.msra.mxu0 %v841_v55  ;;  %529 = vmatpush1.bf16.msra.mxu1 %v843_v56  ;;  %v866_v7 = vcombine.high %v265_v3, %v265_v3  ;;  %v865_v8 = vcombine.low %v265_v3, %v265_v3  ;;  %v868_v9 = vcombine.high %v266_v4, %v266_v4  ;;  %v255_v29 = vld [vmem:[%s1135_s27 + $0xb0] sm:$0xff]  ;;  %v252_v30 = vld [vmem:[%s1135_s27 + $0x98] sm:$0xff] }
  0x3a   : > { %487 = vmatprep.subr.bf16.mxu0 %v850_v57  ;;  %530 = vmatprep.subr.bf16.mxu1 %v852_v58  ;;  %v867_v10 = vcombine.low %v266_v4, %v266_v4  ;;  %v848_v27 = vcombine.high %v244_v22, %v248_v23  ;;  %v256_v31 = vld [vmem:[%s1135_s27 + $0xb8] sm:$0xff]  ;;  %v847_v33 = vcombine.low %v244_v22, %v248_v23  ;;  %v259_v37 = vld [vmem:[%s1135_s27 + $0xd0] sm:$0xff] }
  0x3b   : > { %v460_v15 = vsel %vm458_vm0, %v865_v8, 0  ;;  %v854_v34 = vcombine.high %v251_v28, %v255_v29  ;;  %v856_v35 = vcombine.high %v252_v30, %v256_v31  ;;  %v263_v38 = vld [vmem:[%s1135_s27 + $0xf0] sm:$0xff]  ;;  %v260_v39 = vld [vmem:[%s1135_s27 + $0xd8] sm:$0xff]  ;;  %v853_v41 = vcombine.low %v251_v28, %v255_v29 }
  0x3c   : > { %v466_v17 = vsel %vm458_vm0, %v867_v10, 0  ;;  %v264_v40 = vld [vmem:[%s1135_s27 + $0xf8] sm:$0xff]  ;;  %v855_v42 = vcombine.low %v252_v30, %v256_v31  ;;  %v862_v43 = vcombine.high %v259_v37, %v263_v38  ;;  %v267_v45 = vld [vmem:[%s1135_s27 + $0x110] sm:$0xff]  ;;  %v861_v47 = vcombine.low %v259_v37, %v263_v38 }
  0x3d   : > { %488 = vmatpush1.bf16.msra.mxu0 %v849_v63  ;;  %531 = vmatpush1.bf16.msra.mxu1 %v851_v0  ;;  %v864_v44 = vcombine.high %v260_v39, %v264_v40  ;;  %v268_v46 = vld [vmem:[%s1135_s27 + $0x118] sm:$0xff]  ;;  %v863_v48 = vcombine.low %v260_v39, %v264_v40  ;;  %v870_v49 = vcombine.high %v267_v45, %v267_v45 }
  0x3e   : > { %489 = vmatprep.subr.bf16.mxu0 %v858_v1  ;;  %532 = vmatprep.subr.bf16.mxu1 %v860_v2  ;;  %v869_v50 = vcombine.low %v267_v45, %v267_v45  ;;  %v872_v51 = vcombine.high %v268_v46, %v268_v46 }
  0x40   : > { %v472_v52 = vsel %vm458_vm0, %v869_v50, 0 }
  0x41   : > { %490 = vmatpush1.bf16.msra.mxu0 %v857_v5  ;;  %533 = vmatpush1.bf16.msra.mxu1 %v859_v6 }
  0x42   : > { %873 = vmatprep.subr.msk.bf16.mxu0 %vm458_vm0, %v866_v7  ;;  %875 = vmatprep.subr.msk.bf16.mxu1 %vm458_vm0, %v868_v9 }
  0x45   : > { %492 = vmatpush1.bf16.msra.mxu0 %v460_v15  ;;  %535 = vmatpush1.bf16.msra.mxu1 %v466_v17 }
  0x46   : > { %569 = vmatprep.subr.bf16.mxu0 %v838_v16  ;;  %612 = vmatprep.subr.bf16.mxu1 %v840_v18 }
  0x48   : > { %874 = vmatmul.mubr.msk.bf16.vlgmr.msra.gmra.mrb[0].mxu0 %vm454_vm1, %v935_v21  ;;  %876 = vmatmul.mubr.msk.bf16.vlgmr.msra.gmra.mrb[0].mxu1 %vm454_vm1, %v935_v21 }
  0x49   : > { %570 = vmatpush1.bf16.msra.mxu0 %v837_v24  ;;  %613 = vmatpush1.bf16.msra.mxu1 %v839_v25 }
  0x4a   : > { %571 = vmatprep.subr.bf16.mxu0 %v846_v26  ;;  %614 = vmatprep.subr.bf16.mxu1 %v848_v27 }
  0x4b   : > { %601 = vmatprep.mubr.bf16.mxu0 %v996_v36  ;;  %644 = vmatprep.mubr.bf16.mxu1 %v996_v36  ;;  %v871_v36 = vcombine.low %v268_v46, %v268_v46 }
  0x4d   : > { %572 = vmatpush1.bf16.msra.mxu0 %v845_v32  ;;  %615 = vmatpush1.bf16.msra.mxu1 %v847_v33  ;;  %v478_v53 = vsel %vm458_vm0, %v871_v36, 0 }
  0x4e   : > { %573 = vmatprep.subr.bf16.mxu0 %v854_v34  ;;  %616 = vmatprep.subr.bf16.mxu1 %v856_v35 }
  0x51   : > { %574 = vmatpush1.bf16.msra.mxu0 %v853_v41  ;;  %617 = vmatpush1.bf16.msra.mxu1 %v855_v42 }
  0x52   : > { %575 = vmatprep.subr.bf16.mxu0 %v862_v43  ;;  %618 = vmatprep.subr.bf16.mxu1 %v864_v44 }
  0x55   : > { %576 = vmatpush1.bf16.msra.mxu0 %v861_v47  ;;  %619 = vmatpush1.bf16.msra.mxu1 %v863_v48 }
  0x56   : > { %877 = vmatprep.subr.msk.bf16.mxu0 %vm458_vm0, %v870_v49  ;;  %879 = vmatprep.subr.msk.bf16.mxu1 %vm458_vm0, %v872_v51 }
  0x59   : > { %578 = vmatpush1.bf16.msra.mxu0 %v472_v52  ;;  %621 = vmatpush1.bf16.msra.mxu1 %v478_v53 }
  0x5c   : > { %878 = vmatmul.mubr.msk.bf16.vlgmr.msra.gmra.mrb[4].mxu0 %vm454_vm1, %v935_v21  ;;  %880 = vmatmul.mubr.msk.bf16.vlgmr.msra.gmra.mrb[4].mxu1 %vm454_vm1, %v935_v21 }
 0x11b   : > { %v517_v54 = vpop.f32.mrb[0].mxu0  ;;  %v560_v55 = vpop.f32.mrb[0].mxu1 }
 0x11c   : > { %940 = vtanh.f32 %v517_v54  ;;  %v519_v56 = vpop.f32.mrb[1].mxu0  ;;  %v562_v57 = vpop.f32.mrb[1].mxu1 }
 0x11d   : > { %942 = vtanh.f32 %v560_v55  ;;  %v521_v58 = vpop.f32.mrb[2].mxu0  ;;  %v564_v59 = vpop.f32.mrb[2].mxu1 }
 0x11e   : > { %944 = vtanh.f32 %v519_v56  ;;  %v523_v60 = vpop.f32.mrb[3].mxu0  ;;  %v566_v61 = vpop.f32.mrb[3].mxu1 }
 0x11f   : > { %946 = vtanh.f32 %v562_v57 }
 0x120   : > { %948 = vtanh.f32 %v521_v58 }
 0x121   : > { %950 = vtanh.f32 %v564_v59 }
 0x122   : > { %952 = vtanh.f32 %v523_v60 }
 0x123   : > { %954 = vtanh.f32 %v566_v61 }
 0x126   : > { %v941_v62 = vpop.eup %940 }
 0x127   : > { %v943_v63 = vpop.eup %942 }
 0x128   : > { %v945_v0 = vpop.eup %944 }
 0x129   : > { %v947_v1 = vpop.eup %946  ;;  %v895_v2 = vpack.c.bf16 %v945_v0, %v941_v62 }
 0x12a   : > { %v949_v3 = vpop.eup %948  ;;  %v896_v4 = vpack.c.bf16 %v947_v1, %v943_v63 }
 0x12b   : > { %v951_v5 = vpop.eup %950  ;;  %719 = vst [vmem:[%s1192_s3] sm:$0xff] %v895_v2 }
 0x12c   : > { %v953_v6 = vpop.eup %952  ;;  %720 = vst [vmem:[%s1192_s3 + $0x8] sm:$0xff] %v896_v4 }
 0x12d   : > { %v955_v7 = vpop.eup %954  ;;  %v899_v8 = vpack.c.bf16 %v953_v6, %v949_v3 }
 0x12e   : > { %v900_v9 = vpack.c.bf16 %v955_v7, %v951_v5 }
 0x12f   : > { %723 = vst [vmem:[%s1192_s3 + $0x20] sm:$0x33] %v899_v8  ;;  %v603_v10 = vpop.f32.mrb[4].mxu0  ;;  %v646_v11 = vpop.f32.mrb[4].mxu1 }
 0x130   : > { %724 = vst [vmem:[%s1192_s3 + $0x28] sm:$0x33] %v900_v9  ;;  %956 = vtanh.f32 %v603_v10  ;;  %v605_v12 = vpop.f32.mrb[5].mxu0  ;;  %v648_v13 = vpop.f32.mrb[5].mxu1 }
 0x131   : > { %958 = vtanh.f32 %v646_v11  ;;  %v607_v14 = vpop.f32.mrb[6].mxu0  ;;  %v650_v15 = vpop.f32.mrb[6].mxu1 }
 0x132   : > { %960 = vtanh.f32 %v605_v12  ;;  %v609_v16 = vpop.f32.mrb[7].mxu0  ;;  %v652_v17 = vpop.f32.mrb[7].mxu1  ;;  %v749_v30 = vld [vmem:[%s1192_s3] sm:$0xff] (%p1042_p5) }
 0x133   : > { %962 = vtanh.f32 %v648_v13  ;;  %v751_v31 = vld [vmem:[%s1192_s3 + $0x8] sm:$0xff] (%p1042_p5)  ;;  %750 = vst [vmem:[%s736_s7] sm:$0xff] (%p1042_p5), %v749_v30 }
 0x134   : > { %964 = vtanh.f32 %v607_v14  ;;  %752 = vst [vmem:[%s736_s7 + $0x8] sm:$0xff] (%p1042_p5), %v751_v31 }
 0x135   : > { %966 = vtanh.f32 %v650_v15 }
 0x136   : > { %968 = vtanh.f32 %v609_v16  ;;  %v757_v34 = vld [vmem:[%s1192_s3 + $0x20] sm:$0xff] (%p1042_p5) }
 0x137   : > { %970 = vtanh.f32 %v652_v17  ;;  %v759_v35 = vld [vmem:[%s1192_s3 + $0x28] sm:$0xff] (%p1042_p5)  ;;  %758 = vst [vmem:[%s736_s7 + $0x40] sm:$0xff] (%p1042_p5), %v757_v34 }
 0x138   : > { %760 = vst [vmem:[%s736_s7 + $0x48] sm:$0xff] (%p1042_p5), %v759_v35 }
 0x13a   : > { %v957_v18 = vpop.eup %956 }
 0x13b   : > { %v959_v19 = vpop.eup %958 }
 0x13c   : > { %v961_v20 = vpop.eup %960 }
 0x13d   : > { %v963_v21 = vpop.eup %962  ;;  %v897_v22 = vpack.c.bf16 %v961_v20, %v957_v18 }
 0x13e   : > { %v965_v23 = vpop.eup %964  ;;  %v898_v24 = vpack.c.bf16 %v963_v21, %v959_v19  ;;  %733 = sbr.rel (!%p1042_p5) target bundleno = 333 (0x14d), region = 55 }
 0x13f   : > { %v967_v25 = vpop.eup %966  ;;  %721 = vst [vmem:[%s1192_s3 + $0x10] sm:$0xff] %v897_v22 }
 0x140   : > { %v969_v26 = vpop.eup %968  ;;  %722 = vst [vmem:[%s1192_s3 + $0x18] sm:$0xff] %v898_v24 }
 0x141   : > { %v971_v27 = vpop.eup %970  ;;  %v901_v28 = vpack.c.bf16 %v969_v26, %v965_v23 }
 0x142   : > { %v902_v29 = vpack.c.bf16 %v971_v27, %v967_v25 }
 0x143   : > { %725 = vst [vmem:[%s1192_s3 + $0x30] sm:$0x33] %v901_v28 }
 0x144   : > { %726 = vst [vmem:[%s1192_s3 + $0x38] sm:$0x33] %v902_v29 }
 0x146   : > { %v753_v32 = vld [vmem:[%s1192_s3 + $0x10] sm:$0xff] }
 0x147   : > { %v755_v33 = vld [vmem:[%s1192_s3 + $0x18] sm:$0xff]  ;;  %754 = vst [vmem:[%s736_s7 + $0x10] sm:$0xff] %v753_v32 }
 0x148   : > { %756 = vst [vmem:[%s736_s7 + $0x18] sm:$0xff] %v755_v33 }
 0x14a   : > { %v761_v37 = vld [vmem:[%s1192_s3 + $0x30] sm:$0xff] }
 0x14b   : > { %v763_v38 = vld [vmem:[%s1192_s3 + $0x38] sm:$0xff]  ;;  %762 = vst [vmem:[%s736_s7 + $0x50] sm:$0xff] %v761_v37 }
 0x14c   : > { %764 = vst [vmem:[%s736_s7 + $0x58] sm:$0xff] %v763_v38 }
 0x14d PF: > { %p9_p10 = scmp.ge.s32.totalorder %s1029_s13, 4   ;;  %s1231_s9 = smov %s990_s10 }
 0x14e   : > { %s1232_s10 = smov %s1040_s16  ;;  %s1233_s11 = smov %s1029_s13 }
 0x14f   :  { %11 = sbr.rel (!%p9_p10) target bundleno = 2 (0x2), region = 109 }

</bundles_post_ra>
